<compile_context>
chip_gen: v7x
topology: tpu7x:2x2x1
jax: 0.10.0
libtpu: 0.0.40
codegen_flags: <defaults>
</compile_context>

<pallas_src>
import functools

import jax
import jax.numpy as jnp
from jax import lax
from jax.experimental import pallas as pl
from jax.experimental.pallas import tpu as pltpu

LANE = 128
SUBLANE = 8


def _round_up(x, m):
    return (x + m - 1) // m * m


# ----------------------------------------------------------------------------
# Fused encoder kernel: multi-layer GRU recurrence + Linear for one batch tile.
# ----------------------------------------------------------------------------
def encoder_kernel(*refs, num_layers, seq_len, bt, hp, unroll):
    """refs layout:
        [0]                      x     (1, S*bt, Din0)  bf16, time-major batch tile
        [1+4l .. 4+4l] (l<L)     wih_l (Din_l, 3*hp) bf16 | whh_l (hp, 3*hp) bf16 |
                                 gib_l (1, 3*hp) f32 (= b_ih + [b_hr,b_hz,0]) |
                                 bhn_l (1, hp)   f32 (= b_hn)
        [1+4L], [2+4L]           dense dw (hp, Op) bf16, db (1, Op) f32
        [3+4L], [4+4L]           outputs y (1, S*bt, Op) f32, state (1, L, bt, hp) f32
        [5+4L]..[7+4L]           scratch gi (S*bt, 3*hp) f32, seq0/seq1 (S*bt, hp) f32
    """
    L, S, Bt, Hp = num_layers, seq_len, bt, hp
    x_ref = refs[0]
    dw_ref = refs[1 + 4 * L]
    db_ref = refs[2 + 4 * L]
    y_ref = refs[3 + 4 * L]
    state_ref = refs[4 + 4 * L]
    gi_ref = refs[5 + 4 * L]
    seq_refs = (refs[6 + 4 * L], refs[7 + 4 * L])

    cur = x_ref[0]                                        # (S*Bt, Din0) bf16
    for l in range(L):
        wih = refs[1 + 4 * l][...]                        # (Din_l, 3Hp) bf16
        whh = refs[2 + 4 * l][...]                        # (Hp, 3Hp)   bf16
        gib = refs[3 + 4 * l][...]                        # (1, 3Hp)    f32
        bhn = refs[4 + 4 * l][...]                        # (1, Hp)     f32
        out_ref = seq_refs[l % 2]                         # ping-pong: no WAR hazard

        # Hoisted, time-invariant input projection with b_ih and b_hh[r,z] folded in:
        # one big MXU call per layer instead of S tiny ones on the serial path.
        gi_ref[...] = jnp.dot(cur.astype(jnp.bfloat16), wih,
                              preferred_element_type=jnp.float32) + gib

        # Pre-broadcast the n-gate hidden bias once per layer (kept out of the unrolled
        # per-step dependency chain).
        bhn_b = jnp.broadcast_to(bhn, (Bt, Hp))

        def step(t, h):
            row = pl.multiple_of(t * Bt, Bt)
            gi_t = gi_ref[pl.ds(row, Bt), :]              # (Bt, 3Hp) f32
            gh = jnp.dot(h.astype(jnp.bfloat16), whh,     # bf16 MXU, f32 accumulate
                         preferred_element_type=jnp.float32)
            # r and z share one fused sigmoid over the first 2*Hp lane-aligned columns.
            rz = jax.nn.sigmoid(gi_t[:, :2 * Hp] + gh[:, :2 * Hp])
            r = rz[:, :Hp]
            z = rz[:, Hp:]
            # b_hh of the n-gate stays inside r*(.)  (PyTorch GRU semantics).
            n = jnp.tanh(gi_t[:, 2 * Hp:] + r * (gh[:, 2 * Hp:] + bhn_b))
            h_new = (1.0 - z) * n + z * h
            out_ref[pl.ds(row, Bt), :] = h_new            # unmasked (8,128)-aligned store
            return h_new

        h_final = lax.fori_loop(0, S, step, jnp.zeros((Bt, Hp), jnp.float32),
                                unroll=unroll)
        state_ref[0, l] = h_final                         # lane-dense final-state store
        cur = out_ref[...]                                # input to next layer / dense
        # TODO(synk): inter-layer dropout is training-only in PyTorch; skipped (inference).

    # Dense epilogue fused in: one bf16 matmul + one lane-dense store (Op multiple of 128).
    y_ref[0] = (jnp.dot(cur.astype(jnp.bfloat16), dw_ref[...],
                        preferred_element_type=jnp.float32)
                + db_ref[...]).astype(y_ref.dtype)


# ----------------------------------------------------------------------------
# Parameter packing: transpose, per-gate 128-lane padding, bias folding, bf16 cast.
# ----------------------------------------------------------------------------
def _pack_params(params, Hp, Op):
    H = params["gru"][0][1].shape[1]
    O = params["dense_w"].shape[0]

    def pad_gate_cols(w):  # (rows, 3H) -> (rows, 3*Hp): each gate gets a full lane block
        r, z, n = jnp.split(w, 3, axis=1)
        pad = ((0, 0), (0, Hp - H))
        return jnp.concatenate([jnp.pad(r, pad), jnp.pad(z, pad), jnp.pad(n, pad)],
                               axis=1)

    flat = []
    for i, (w_ih, w_hh, b_ih, b_hh) in enumerate(params["gru"]):
        din = w_ih.shape[1]
        din_p = din if i == 0 else Hp                    # layer>=1 input is Hp-padded seq
        wih = jnp.pad(pad_gate_cols(w_ih.T), ((0, din_p - din), (0, 0)))
        whh = jnp.pad(pad_gate_cols(w_hh.T), ((0, Hp - H), (0, 0)))
        bih3 = pad_gate_cols(b_ih.reshape(1, -1))        # (1, 3Hp)
        bhh3 = pad_gate_cols(b_hh.reshape(1, -1))        # (1, 3Hp)
        gib = bih3 + bhh3.at[:, 2 * Hp:].set(0.0)        # fold b_hh[r,z] into hoisted gi
        bhn = bhh3[:, 2 * Hp:]                           # (1, Hp): b_hh[n] stays in loop
        flat += [wih.astype(jnp.bfloat16), whh.astype(jnp.bfloat16),
                 gib.astype(jnp.float32), bhn.astype(jnp.float32)]

    dw = jnp.pad(params["dense_w"].T, ((0, Hp - H), (0, Op - O))).astype(jnp.bfloat16)
    db = jnp.pad(params["dense_b"].reshape(1, -1), ((0, 0), (0, Op - O)))
    flat += [dw, db.astype(jnp.float32)]
    return flat


# ----------------------------------------------------------------------------
# Encoder forward: multi-layer GRU (batch_first) + Linear
# ----------------------------------------------------------------------------
def encoder_forward(inputs, params):
    """inputs: (B, S, Din) batch-first. Returns (encoder_out (B,S,O), state (L,B,H))."""
    B, S, Din = inputs.shape
    L = len(params["gru"])
    H = params["gru"][0][1].shape[1]
    O = params["dense_w"].shape[0]
    Hp = _round_up(H, LANE)                              # 128-lane per-gate padding
    Op = _round_up(O, LANE)                              # lane-dense output slab
    Bt = SUBLANE                                         # rows per batch tile
    nbt = pl.cdiv(B, Bt)
    Bp = nbt * Bt

    flat = _pack_params(params, Hp, Op)

    # batch-first -> time-major, pad batch, split into per-core batch tiles, bf16 cast.
    x = jnp.transpose(inputs, (1, 0, 2))                 # (S, B, Din)
    x = jnp.pad(x, ((0, 0), (0, Bp - B), (0, 0)))        # (S, Bp, Din)
    x = x.reshape(S, nbt, Bt, Din).transpose(1, 0, 2, 3) # (nbt, S, Bt, Din)
    x = x.reshape(nbt, S * Bt, Din).astype(jnp.bfloat16)

    def bcast_spec(a):                                   # weights: same block every tile
        return pl.BlockSpec(a.shape, lambda b, _nd=a.ndim: (0,) * _nd)

    kernel = functools.partial(encoder_kernel, num_layers=L, seq_len=S,
                               bt=Bt, hp=Hp, unroll=min(S, 8))
    y, state = pl.pallas_call(
        kernel,
        out_shape=(jax.ShapeDtypeStruct((nbt, S * Bt, Op), jnp.float32),
                   jax.ShapeDtypeStruct((nbt, L, Bt, Hp), jnp.float32)),
        grid=(nbt,),
        in_specs=[pl.BlockSpec((1, S * Bt, Din), lambda b: (b, 0, 0))]
                 + [bcast_spec(a) for a in flat],
        out_specs=(pl.BlockSpec((1, S * Bt, Op), lambda b: (b, 0, 0)),
                   pl.BlockSpec((1, L, Bt, Hp), lambda b: (b, 0, 0, 0))),
        scratch_shapes=[pltpu.VMEM((S * Bt, 3 * Hp), jnp.float32),   # hoisted gi
                        pltpu.VMEM((S * Bt, Hp), jnp.float32),       # seq ping
                        pltpu.VMEM((S * Bt, Hp), jnp.float32)],      # seq pong
        compiler_params=pltpu.CompilerParams(
            dimension_semantics=("parallel",),           # batch tiles -> both TCs on v7x
            vmem_limit_bytes=48 * 1024 * 1024),
    )(x, *flat)

    y = y.reshape(nbt, S, Bt, Op).transpose(1, 0, 2, 3).reshape(S, Bp, Op)
    enc_out = jnp.transpose(y[:, :B, :O], (1, 0, 2))                       # (B, S, O)
    state = state.transpose(1, 0, 2, 3).reshape(L, Bp, Hp)[:, :B, :H]      # (L, B, H)
    return enc_out, state


# ----------------------------------------------------------------------------
# Deterministic parameter construction (PyTorch-style uniform(-1/sqrt(H), 1/sqrt(H)))
# ----------------------------------------------------------------------------
def init_params(key, input_size, output_size, hidden_size, num_layers):
    k = 1.0 / jnp.sqrt(hidden_size)
    gru = []
    for layer in range(num_layers):
        din = input_size if layer == 0 else hidden_size
        key, k1, k2, k3, k4 = jax.random.split(key, 5)
        w_ih = jax.random.uniform(k1, (3 * hidden_size, din), jnp.float32, -k, k)
        w_hh = jax.random.uniform(k2, (3 * hidden_size, hidden_size), jnp.float32, -k, k)
        b_ih = jax.random.uniform(k3, (3 * hidden_size,), jnp.float32, -k, k)
        b_hh = jax.random.uniform(k4, (3 * hidden_size,), jnp.float32, -k, k)
        gru.append((w_ih, w_hh, b_ih, b_hh))
    key, k5, k6 = jax.random.split(key, 3)
    dense_w = jax.random.uniform(k5, (output_size, hidden_size), jnp.float32, -k, k)
    dense_b = jax.random.uniform(k6, (output_size,), jnp.float32, -k, k)
    return {"gru": gru, "dense_w": dense_w, "dense_b": dense_b}


# ----------------------------------------------------------------------------
# Pure-JAX reference (lax.scan). matmul_dtype=bf16 mirrors the kernel's numerics
# (bf16 MXU operands, f32 accumulation); matmul_dtype=f32 is the PyTorch-f32 reference.
# ----------------------------------------------------------------------------
def encoder_reference(inputs, params, matmul_dtype=jnp.float32):
    def mm(a, b):
        return jnp.dot(a.astype(matmul_dtype), b.astype(matmul_dtype),
                       preferred_element_type=jnp.float32)

    x = jnp.transpose(inputs, (1, 0, 2))
    finals = []
    for (w_ih, w_hh, b_ih, b_hh) in params["gru"]:
        H = w_hh.shape[1]
        w_ih_t, w_hh_t = w_ih.T, w_hh.T

        def step(h, x_t):
            gi = mm(x_t, w_ih_t) + b_ih
            gh = mm(h, w_hh_t) + b_hh
            i_r, i_z, i_n = gi[:, :H], gi[:, H:2 * H], gi[:, 2 * H:]
            h_r, h_z, h_n = gh[:, :H], gh[:, H:2 * H], gh[:, 2 * H:]
            r = jax.nn.sigmoid(i_r + h_r)
            z = jax.nn.sigmoid(i_z + h_z)
            n = jnp.tanh(i_n + r * h_n)
            h_new = (1.0 - z) * n + z * h
            return h_new, h_new

        h0 = jnp.zeros((x.shape[1], H), jnp.float32)
        h_T, outs = lax.scan(step, h0, x)
        x = outs
        finals.append(h_T)
    state = jnp.stack(finals, axis=0)
    y = mm(x, params["dense_w"].T) + params["dense_b"]
    return jnp.transpose(y, (1, 0, 2)), state


if __name__ == "__main__":
    # Encoder(input_size=8, output_size=16, hiddens_size=32, num_layers=2, dropout=0.0)
    input_size, output_size, hidden_size, num_layers = 8, 16, 32, 2
    batch, seq = 2, 8

    key = jax.random.PRNGKey(0)
    key, pkey, xkey = jax.random.split(key, 3)
    params = init_params(pkey, input_size, output_size, hidden_size, num_layers)
    inputs = jax.random.normal(xkey, (batch, seq, input_size), jnp.float32)

    enc_out, state = jax.jit(encoder_forward)(inputs, params)
    enc_out = jax.block_until_ready(enc_out)
    state = jax.block_until_ready(state)

    assert enc_out.shape == (batch, seq, output_size)
    assert state.shape == (num_layers, batch, hidden_size)

    # Tight check vs numerics-matched reference (bf16 MXU operands, f32 accumulation).
    ref_out, ref_state = encoder_reference(inputs, params, matmul_dtype=jnp.bfloat16)
    assert jnp.allclose(enc_out, ref_out, atol=2e-3, rtol=2e-3)
    assert jnp.allclose(state, ref_state, atol=2e-3, rtol=2e-3)

    # Loose check vs full-f32 (PyTorch-equivalent) reference; gap is bf16 MXU rounding.
    ref_out32, ref_state32 = encoder_reference(inputs, params, matmul_dtype=jnp.float32)
    assert jnp.allclose(enc_out, ref_out32, atol=3e-2, rtol=3e-2)
    assert jnp.allclose(state, ref_state32, atol=3e-2, rtol=3e-2)

    print("KERNEL_OK")
</pallas_src>

<mosaic_0001>
module attributes {stable_mosaic.version = 11 : i64} {
  func.func @encoder_kernel(%arg0: i32, %arg1: memref<1x64x8xbf16, #tpu.memory_space<vmem>>, %arg2: memref<8x384xbf16, #tpu.memory_space<vmem>>, %arg3: memref<128x384xbf16, #tpu.memory_space<vmem>>, %arg4: memref<1x384xf32, #tpu.memory_space<vmem>>, %arg5: memref<1x128xf32, #tpu.memory_space<vmem>>, %arg6: memref<128x384xbf16, #tpu.memory_space<vmem>>, %arg7: memref<128x384xbf16, #tpu.memory_space<vmem>>, %arg8: memref<1x384xf32, #tpu.memory_space<vmem>>, %arg9: memref<1x128xf32, #tpu.memory_space<vmem>>, %arg10: memref<128x128xbf16, #tpu.memory_space<vmem>>, %arg11: memref<1x128xf32, #tpu.memory_space<vmem>>, %arg12: memref<1x64x128xf32, #tpu.memory_space<vmem>>, %arg13: memref<1x2x8x128xf32, #tpu.memory_space<vmem>>, %arg14: memref<64x384xf32, #tpu.memory_space<vmem>>, %arg15: memref<64x128xf32, #tpu.memory_space<vmem>>, %arg16: memref<64x128xf32, #tpu.memory_space<vmem>>) attributes {dimension_semantics = [#tpu.dimension_semantics<parallel>], iteration_bounds = array<i64: 1>, scalar_prefetch = 0 : i64, scratch_operands = 3 : i64, tpu.core_type = #tpu.core_type<tc>, window_params = [{transform_indices = @transform_0, window_bounds = array<i64: 1, 64, 8>}, {pipeline_mode = #tpu.pipeline_mode<synchronous>, transform_indices = @transform_1, window_bounds = array<i64: 8, 384>}, {pipeline_mode = #tpu.pipeline_mode<synchronous>, transform_indices = @transform_2, window_bounds = array<i64: 128, 384>}, {pipeline_mode = #tpu.pipeline_mode<synchronous>, transform_indices = @transform_3, window_bounds = array<i64: 1, 384>}, {pipeline_mode = #tpu.pipeline_mode<synchronous>, transform_indices = @transform_4, window_bounds = array<i64: 1, 128>}, {pipeline_mode = #tpu.pipeline_mode<synchronous>, transform_indices = @transform_5, window_bounds = array<i64: 128, 384>}, {pipeline_mode = #tpu.pipeline_mode<synchronous>, transform_indices = @transform_6, window_bounds = array<i64: 128, 384>}, {pipeline_mode = #tpu.pipeline_mode<synchronous>, transform_indices = @transform_7, window_bounds = array<i64: 1, 384>}, {pipeline_mode = #tpu.pipeline_mode<synchronous>, transform_indices = @transform_8, window_bounds = array<i64: 1, 128>}, {pipeline_mode = #tpu.pipeline_mode<synchronous>, transform_indices = @transform_9, window_bounds = array<i64: 128, 128>}, {pipeline_mode = #tpu.pipeline_mode<synchronous>, transform_indices = @transform_10, window_bounds = array<i64: 1, 128>}, {transform_indices = @transform_11, window_bounds = array<i64: 1, 64, 128>}, {transform_indices = @transform_12, window_bounds = array<i64: 1, 2, 8, 128>}]} {
    %c0 = arith.constant 0 : index
    %c0_0 = arith.constant 0 : index
    %c0_1 = arith.constant 0 : index
    %0 = vector.load %arg1[%c0, %c0_0, %c0_1] : memref<1x64x8xbf16, #tpu.memory_space<vmem>>, vector<1x64x8xbf16>
    %1 = vector.shape_cast %0 : vector<1x64x8xbf16> to vector<64x8xbf16>
    %c0_2 = arith.constant 0 : index
    %c0_3 = arith.constant 0 : index
    %2 = vector.load %arg2[%c0_2, %c0_3] : memref<8x384xbf16, #tpu.memory_space<vmem>>, vector<8x384xbf16>
    %c0_4 = arith.constant 0 : index
    %c0_5 = arith.constant 0 : index
    %3 = vector.load %arg3[%c0_4, %c0_5] : memref<128x384xbf16, #tpu.memory_space<vmem>>, vector<128x384xbf16>
    %c0_6 = arith.constant 0 : index
    %c0_7 = arith.constant 0 : index
    %4 = vector.load %arg4[%c0_6, %c0_7] : memref<1x384xf32, #tpu.memory_space<vmem>>, vector<1x384xf32>
    %c0_8 = arith.constant 0 : index
    %c0_9 = arith.constant 0 : index
    %5 = vector.load %arg5[%c0_8, %c0_9] : memref<1x128xf32, #tpu.memory_space<vmem>>, vector<1x128xf32>
    %cst = arith.constant dense<0.000000e+00> : vector<64x384xf32>
    %6 = tpu.matmul %1, %2, %cst {dimension_numbers = #tpu.dot_dimension_numbers<[1], [0], [0], [1], [0, 0, 1, 1], [], []>} : vector<64x8xbf16>, vector<8x384xbf16>, vector<64x384xf32> -> vector<64x384xf32>
    %7 = vector.broadcast %4 : vector<1x384xf32> to vector<64x384xf32>
    %8 = arith.addf %6, %7 : vector<64x384xf32>
    %c0_10 = arith.constant 0 : index
    %c0_11 = arith.constant 0 : index
    %9 = vector.load %arg14[%c0_10, %c0_11] : memref<64x384xf32, #tpu.memory_space<vmem>>, vector<64x384xf32>
    tpu.vector_store %arg14[%c0_10, %c0_11], %8 {strides = array<i32>} : memref<64x384xf32, #tpu.memory_space<vmem>>, vector<64x384xf32>,
    %10 = vector.shape_cast %5 : vector<1x128xf32> to vector<1x128xf32>
    %11 = vector.broadcast %10 : vector<1x128xf32> to vector<8x128xf32>
    %cst_12 = arith.constant 0.000000e+00 : f32
    %12 = vector.broadcast %cst_12 : f32 to vector<8x128xf32>
    %c0_i32 = arith.constant 0 : i32
    %c8_i32 = arith.constant 8 : i32
    %13 = arith.muli %c0_i32, %c8_i32 : i32
    %14 = tpu.assume_multiple %13, 8 : i32
    %15 = arith.index_cast %14 : i32 to index
    %c0_13 = arith.constant 0 : index
    %16 = vector.load %arg14[%15, %c0_13] : memref<64x384xf32, #tpu.memory_space<vmem>>, vector<8x384xf32>
    %17 = arith.truncf %12 : vector<8x128xf32> to vector<8x128xbf16>
    %cst_14 = arith.constant dense<0.000000e+00> : vector<8x384xf32>
    %18 = tpu.matmul %17, %3, %cst_14 {dimension_numbers = #tpu.dot_dimension_numbers<[1], [0], [0], [1], [0, 0, 1, 1], [], []>} : vector<8x128xbf16>, vector<128x384xbf16>, vector<8x384xf32> -> vector<8x384xf32>
    %19 = vector.extract_strided_slice %16 {offsets = [0, 0], sizes = [8, 256], strides = [1, 1]} : vector<8x384xf32> to vector<8x256xf32>
    %20 = vector.extract_strided_slice %18 {offsets = [0, 0], sizes = [8, 256], strides = [1, 1]} : vector<8x384xf32> to vector<8x256xf32>
    %21 = arith.addf %19, %20 : vector<8x256xf32>
    %22 = arith.negf %21 : vector<8x256xf32>
    %23 = math.exp %22 : vector<8x256xf32>
    %cst_15 = arith.constant 1.000000e+00 : f32
    %24 = vector.broadcast %cst_15 : f32 to vector<8x256xf32>
    %25 = arith.addf %24, %23 : vector<8x256xf32>
    %26 = arith.divf %24, %25 : vector<8x256xf32>
    %27 = vector.extract_strided_slice %26 {offsets = [0, 0], sizes = [8, 128], strides = [1, 1]} : vector<8x256xf32> to vector<8x128xf32>
    %28 = vector.extract_strided_slice %26 {offsets = [0, 128], sizes = [8, 128], strides = [1, 1]} : vector<8x256xf32> to vector<8x128xf32>
    %29 = vector.extract_strided_slice %16 {offsets = [0, 256], sizes = [8, 128], strides = [1, 1]} : vector<8x384xf32> to vector<8x128xf32>
    %30 = vector.extract_strided_slice %18 {offsets = [0, 256], sizes = [8, 128], strides = [1, 1]} : vector<8x384xf32> to vector<8x128xf32>
    %31 = arith.addf %30, %11 : vector<8x128xf32>
    %32 = arith.mulf %27, %31 : vector<8x128xf32>
    %33 = arith.addf %29, %32 : vector<8x128xf32>
    %34 = math.tanh %33 : vector<8x128xf32>
    %cst_16 = arith.constant 1.000000e+00 : f32
    %35 = vector.broadcast %cst_16 : f32 to vector<8x128xf32>
    %36 = arith.subf %35, %28 : vector<8x128xf32>
    %37 = arith.mulf %36, %34 : vector<8x128xf32>
    %38 = arith.mulf %28, %12 : vector<8x128xf32>
    %39 = arith.addf %37, %38 : vector<8x128xf32>
    %40 = arith.index_cast %14 : i32 to index
    %c0_17 = arith.constant 0 : index
    %41 = vector.load %arg15[%40, %c0_17] : memref<64x128xf32, #tpu.memory_space<vmem>>, vector<8x128xf32>
    tpu.vector_store %arg15[%40, %c0_17], %39 {strides = array<i32>} : memref<64x128xf32, #tpu.memory_space<vmem>>, vector<8x128xf32>,
    %c1_i32 = arith.constant 1 : i32
    %c8_i32_18 = arith.constant 8 : i32
    %42 = arith.muli %c1_i32, %c8_i32_18 : i32
    %43 = tpu.assume_multiple %42, 8 : i32
    %44 = arith.index_cast %43 : i32 to index
    %c0_19 = arith.constant 0 : index
    %45 = vector.load %arg14[%44, %c0_19] : memref<64x384xf32, #tpu.memory_space<vmem>>, vector<8x384xf32>
    %46 = arith.truncf %39 : vector<8x128xf32> to vector<8x128xbf16>
    %cst_20 = arith.constant dense<0.000000e+00> : vector<8x384xf32>
    %47 = tpu.matmul %46, %3, %cst_20 {dimension_numbers = #tpu.dot_dimension_numbers<[1], [0], [0], [1], [0, 0, 1, 1], [], []>} : vector<8x128xbf16>, vector<128x384xbf16>, vector<8x384xf32> -> vector<8x384xf32>
    %48 = vector.extract_strided_slice %45 {offsets = [0, 0], sizes = [8, 256], strides = [1, 1]} : vector<8x384xf32> to vector<8x256xf32>
    %49 = vector.extract_strided_slice %47 {offsets = [0, 0], sizes = [8, 256], strides = [1, 1]} : vector<8x384xf32> to vector<8x256xf32>
    %50 = arith.addf %48, %49 : vector<8x256xf32>
    %51 = arith.negf %50 : vector<8x256xf32>
    %52 = math.exp %51 : vector<8x256xf32>
    %cst_21 = arith.constant 1.000000e+00 : f32
    %53 = vector.broadcast %cst_21 : f32 to vector<8x256xf32>
    %54 = arith.addf %53, %52 : vector<8x256xf32>
    %55 = arith.divf %53, %54 : vector<8x256xf32>
    %56 = vector.extract_strided_slice %55 {offsets = [0, 0], sizes = [8, 128], strides = [1, 1]} : vector<8x256xf32> to vector<8x128xf32>
    %57 = vector.extract_strided_slice %55 {offsets = [0, 128], sizes = [8, 128], strides = [1, 1]} : vector<8x256xf32> to vector<8x128xf32>
    %58 = vector.extract_strided_slice %45 {offsets = [0, 256], sizes = [8, 128], strides = [1, 1]} : vector<8x384xf32> to vector<8x128xf32>
    %59 = vector.extract_strided_slice %47 {offsets = [0, 256], sizes = [8, 128], strides = [1, 1]} : vector<8x384xf32> to vector<8x128xf32>
    %60 = arith.addf %59, %11 : vector<8x128xf32>
    %61 = arith.mulf %56, %60 : vector<8x128xf32>
    %62 = arith.addf %58, %61 : vector<8x128xf32>
    %63 = math.tanh %62 : vector<8x128xf32>
    %cst_22 = arith.constant 1.000000e+00 : f32
    %64 = vector.broadcast %cst_22 : f32 to vector<8x128xf32>
    %65 = arith.subf %64, %57 : vector<8x128xf32>
    %66 = arith.mulf %65, %63 : vector<8x128xf32>
    %67 = arith.mulf %57, %39 : vector<8x128xf32>
    %68 = arith.addf %66, %67 : vector<8x128xf32>
    %69 = arith.index_cast %43 : i32 to index
    %c0_23 = arith.constant 0 : index
    %70 = vector.load %arg15[%69, %c0_23] : memref<64x128xf32, #tpu.memory_space<vmem>>, vector<8x128xf32>
    tpu.vector_store %arg15[%69, %c0_23], %68 {strides = array<i32>} : memref<64x128xf32, #tpu.memory_space<vmem>>, vector<8x128xf32>,
    %c2_i32 = arith.constant 2 : i32
    %c8_i32_24 = arith.constant 8 : i32
    %71 = arith.muli %c2_i32, %c8_i32_24 : i32
    %72 = tpu.assume_multiple %71, 8 : i32
    %73 = arith.index_cast %72 : i32 to index
    %c0_25 = arith.constant 0 : index
    %74 = vector.load %arg14[%73, %c0_25] : memref<64x384xf32, #tpu.memory_space<vmem>>, vector<8x384xf32>
    %75 = arith.truncf %68 : vector<8x128xf32> to vector<8x128xbf16>
    %cst_26 = arith.constant dense<0.000000e+00> : vector<8x384xf32>
    %76 = tpu.matmul %75, %3, %cst_26 {dimension_numbers = #tpu.dot_dimension_numbers<[1], [0], [0], [1], [0, 0, 1, 1], [], []>} : vector<8x128xbf16>, vector<128x384xbf16>, vector<8x384xf32> -> vector<8x384xf32>
    %77 = vector.extract_strided_slice %74 {offsets = [0, 0], sizes = [8, 256], strides = [1, 1]} : vector<8x384xf32> to vector<8x256xf32>
    %78 = vector.extract_strided_slice %76 {offsets = [0, 0], sizes = [8, 256], strides = [1, 1]} : vector<8x384xf32> to vector<8x256xf32>
    %79 = arith.addf %77, %78 : vector<8x256xf32>
    %80 = arith.negf %79 : vector<8x256xf32>
    %81 = math.exp %80 : vector<8x256xf32>
    %cst_27 = arith.constant 1.000000e+00 : f32
    %82 = vector.broadcast %cst_27 : f32 to vector<8x256xf32>
    %83 = arith.addf %82, %81 : vector<8x256xf32>
    %84 = arith.divf %82, %83 : vector<8x256xf32>
    %85 = vector.extract_strided_slice %84 {offsets = [0, 0], sizes = [8, 128], strides = [1, 1]} : vector<8x256xf32> to vector<8x128xf32>
    %86 = vector.extract_strided_slice %84 {offsets = [0, 128], sizes = [8, 128], strides = [1, 1]} : vector<8x256xf32> to vector<8x128xf32>
    %87 = vector.extract_strided_slice %74 {offsets = [0, 256], sizes = [8, 128], strides = [1, 1]} : vector<8x384xf32> to vector<8x128xf32>
    %88 = vector.extract_strided_slice %76 {offsets = [0, 256], sizes = [8, 128], strides = [1, 1]} : vector<8x384xf32> to vector<8x128xf32>
    %89 = arith.addf %88, %11 : vector<8x128xf32>
    %90 = arith.mulf %85, %89 : vector<8x128xf32>
    %91 = arith.addf %87, %90 : vector<8x128xf32>
    %92 = math.tanh %91 : vector<8x128xf32>
    %cst_28 = arith.constant 1.000000e+00 : f32
    %93 = vector.broadcast %cst_28 : f32 to vector<8x128xf32>
    %94 = arith.subf %93, %86 : vector<8x128xf32>
    %95 = arith.mulf %94, %92 : vector<8x128xf32>
    %96 = arith.mulf %86, %68 : vector<8x128xf32>
    %97 = arith.addf %95, %96 : vector<8x128xf32>
    %98 = arith.index_cast %72 : i32 to index
    %c0_29 = arith.constant 0 : index
    %99 = vector.load %arg15[%98, %c0_29] : memref<64x128xf32, #tpu.memory_space<vmem>>, vector<8x128xf32>
    tpu.vector_store %arg15[%98, %c0_29], %97 {strides = array<i32>} : memref<64x128xf32, #tpu.memory_space<vmem>>, vector<8x128xf32>,
    %c3_i32 = arith.constant 3 : i32
    %c8_i32_30 = arith.constant 8 : i32
    %100 = arith.muli %c3_i32, %c8_i32_30 : i32
    %101 = tpu.assume_multiple %100, 8 : i32
    %102 = arith.index_cast %101 : i32 to index
    %c0_31 = arith.constant 0 : index
    %103 = vector.load %arg14[%102, %c0_31] : memref<64x384xf32, #tpu.memory_space<vmem>>, vector<8x384xf32>
    %104 = arith.truncf %97 : vector<8x128xf32> to vector<8x128xbf16>
    %cst_32 = arith.constant dense<0.000000e+00> : vector<8x384xf32>
    %105 = tpu.matmul %104, %3, %cst_32 {dimension_numbers = #tpu.dot_dimension_numbers<[1], [0], [0], [1], [0, 0, 1, 1], [], []>} : vector<8x128xbf16>, vector<128x384xbf16>, vector<8x384xf32> -> vector<8x384xf32>
    %106 = vector.extract_strided_slice %103 {offsets = [0, 0], sizes = [8, 256], strides = [1, 1]} : vector<8x384xf32> to vector<8x256xf32>
    %107 = vector.extract_strided_slice %105 {offsets = [0, 0], sizes = [8, 256], strides = [1, 1]} : vector<8x384xf32> to vector<8x256xf32>
    %108 = arith.addf %106, %107 : vector<8x256xf32>
    %109 = arith.negf %108 : vector<8x256xf32>
    %110 = math.exp %109 : vector<8x256xf32>
    %cst_33 = arith.constant 1.000000e+00 : f32
    %111 = vector.broadcast %cst_33 : f32 to vector<8x256xf32>
    %112 = arith.addf %111, %110 : vector<8x256xf32>
    %113 = arith.divf %111, %112 : vector<8x256xf32>
    %114 = vector.extract_strided_slice %113 {offsets = [0, 0], sizes = [8, 128], strides = [1, 1]} : vector<8x256xf32> to vector<8x128xf32>
    %115 = vector.extract_strided_slice %113 {offsets = [0, 128], sizes = [8, 128], strides = [1, 1]} : vector<8x256xf32> to vector<8x128xf32>
    %116 = vector.extract_strided_slice %103 {offsets = [0, 256], sizes = [8, 128], strides = [1, 1]} : vector<8x384xf32> to vector<8x128xf32>
    %117 = vector.extract_strided_slice %105 {offsets = [0, 256], sizes = [8, 128], strides = [1, 1]} : vector<8x384xf32> to vector<8x128xf32>
    %118 = arith.addf %117, %11 : vector<8x128xf32>
    %119 = arith.mulf %114, %118 : vector<8x128xf32>
    %120 = arith.addf %116, %119 : vector<8x128xf32>
    %121 = math.tanh %120 : vector<8x128xf32>
    %cst_34 = arith.constant 1.000000e+00 : f32
    %122 = vector.broadcast %cst_34 : f32 to vector<8x128xf32>
    %123 = arith.subf %122, %115 : vector<8x128xf32>
    %124 = arith.mulf %123, %121 : vector<8x128xf32>
    %125 = arith.mulf %115, %97 : vector<8x128xf32>
    %126 = arith.addf %124, %125 : vector<8x128xf32>
    %127 = arith.index_cast %101 : i32 to index
    %c0_35 = arith.constant 0 : index
    %128 = vector.load %arg15[%127, %c0_35] : memref<64x128xf32, #tpu.memory_space<vmem>>, vector<8x128xf32>
    tpu.vector_store %arg15[%127, %c0_35], %126 {strides = array<i32>} : memref<64x128xf32, #tpu.memory_space<vmem>>, vector<8x128xf32>,
    %c4_i32 = arith.constant 4 : i32
    %c8_i32_36 = arith.constant 8 : i32
    %129 = arith.muli %c4_i32, %c8_i32_36 : i32
    %130 = tpu.assume_multiple %129, 8 : i32
    %131 = arith.index_cast %130 : i32 to index
    %c0_37 = arith.constant 0 : index
    %132 = vector.load %arg14[%131, %c0_37] : memref<64x384xf32, #tpu.memory_space<vmem>>, vector<8x384xf32>
    %133 = arith.truncf %126 : vector<8x128xf32> to vector<8x128xbf16>
    %cst_38 = arith.constant dense<0.000000e+00> : vector<8x384xf32>
    %134 = tpu.matmul %133, %3, %cst_38 {dimension_numbers = #tpu.dot_dimension_numbers<[1], [0], [0], [1], [0, 0, 1, 1], [], []>} : vector<8x128xbf16>, vector<128x384xbf16>, vector<8x384xf32> -> vector<8x384xf32>
    %135 = vector.extract_strided_slice %132 {offsets = [0, 0], sizes = [8, 256], strides = [1, 1]} : vector<8x384xf32> to vector<8x256xf32>
    %136 = vector.extract_strided_slice %134 {offsets = [0, 0], sizes = [8, 256], strides = [1, 1]} : vector<8x384xf32> to vector<8x256xf32>
    %137 = arith.addf %135, %136 : vector<8x256xf32>
    %138 = arith.negf %137 : vector<8x256xf32>
    %139 = math.exp %138 : vector<8x256xf32>
    %cst_39 = arith.constant 1.000000e+00 : f32
    %140 = vector.broadcast %cst_39 : f32 to vector<8x256xf32>
    %141 = arith.addf %140, %139 : vector<8x256xf32>
    %142 = arith.divf %140, %141 : vector<8x256xf32>
    %143 = vector.extract_strided_slice %142 {offsets = [0, 0], sizes = [8, 128], strides = [1, 1]} : vector<8x256xf32> to vector<8x128xf32>
    %144 = vector.extract_strided_slice %142 {offsets = [0, 128], sizes = [8, 128], strides = [1, 1]} : vector<8x256xf32> to vector<8x128xf32>
    %145 = vector.extract_strided_slice %132 {offsets = [0, 256], sizes = [8, 128], strides = [1, 1]} : vector<8x384xf32> to vector<8x128xf32>
    %146 = vector.extract_strided_slice %134 {offsets = [0, 256], sizes = [8, 128], strides = [1, 1]} : vector<8x384xf32> to vector<8x128xf32>
    %147 = arith.addf %146, %11 : vector<8x128xf32>
    %148 = arith.mulf %143, %147 : vector<8x128xf32>
    %149 = arith.addf %145, %148 : vector<8x128xf32>
    %150 = math.tanh %149 : vector<8x128xf32>
    %cst_40 = arith.constant 1.000000e+00 : f32
    %151 = vector.broadcast %cst_40 : f32 to vector<8x128xf32>
    %152 = arith.subf %151, %144 : vector<8x128xf32>
    %153 = arith.mulf %152, %150 : vector<8x128xf32>
    %154 = arith.mulf %144, %126 : vector<8x128xf32>
    %155 = arith.addf %153, %154 : vector<8x128xf32>
    %156 = arith.index_cast %130 : i32 to index
    %c0_41 = arith.constant 0 : index
    %157 = vector.load %arg15[%156, %c0_41] : memref<64x128xf32, #tpu.memory_space<vmem>>, vector<8x128xf32>
    tpu.vector_store %arg15[%156, %c0_41], %155 {strides = array<i32>} : memref<64x128xf32, #tpu.memory_space<vmem>>, vector<8x128xf32>,
    %c5_i32 = arith.constant 5 : i32
    %c8_i32_42 = arith.constant 8 : i32
    %158 = arith.muli %c5_i32, %c8_i32_42 : i32
    %159 = tpu.assume_multiple %158, 8 : i32
    %160 = arith.index_cast %159 : i32 to index
    %c0_43 = arith.constant 0 : index
    %161 = vector.load %arg14[%160, %c0_43] : memref<64x384xf32, #tpu.memory_space<vmem>>, vector<8x384xf32>
    %162 = arith.truncf %155 : vector<8x128xf32> to vector<8x128xbf16>
    %cst_44 = arith.constant dense<0.000000e+00> : vector<8x384xf32>
    %163 = tpu.matmul %162, %3, %cst_44 {dimension_numbers = #tpu.dot_dimension_numbers<[1], [0], [0], [1], [0, 0, 1, 1], [], []>} : vector<8x128xbf16>, vector<128x384xbf16>, vector<8x384xf32> -> vector<8x384xf32>
    %164 = vector.extract_strided_slice %161 {offsets = [0, 0], sizes = [8, 256], strides = [1, 1]} : vector<8x384xf32> to vector<8x256xf32>
    %165 = vector.extract_strided_slice %163 {offsets = [0, 0], sizes = [8, 256], strides = [1, 1]} : vector<8x384xf32> to vector<8x256xf32>
    %166 = arith.addf %164, %165 : vector<8x256xf32>
    %167 = arith.negf %166 : vector<8x256xf32>
    %168 = math.exp %167 : vector<8x256xf32>
    %cst_45 = arith.constant 1.000000e+00 : f32
    %169 = vector.broadcast %cst_45 : f32 to vector<8x256xf32>
    %170 = arith.addf %169, %168 : vector<8x256xf32>
    %171 = arith.divf %169, %170 : vector<8x256xf32>
    %172 = vector.extract_strided_slice %171 {offsets = [0, 0], sizes = [8, 128], strides = [1, 1]} : vector<8x256xf32> to vector<8x128xf32>
    %173 = vector.extract_strided_slice %171 {offsets = [0, 128], sizes = [8, 128], strides = [1, 1]} : vector<8x256xf32> to vector<8x128xf32>
    %174 = vector.extract_strided_slice %161 {offsets = [0, 256], sizes = [8, 128], strides = [1, 1]} : vector<8x384xf32> to vector<8x128xf32>
    %175 = vector.extract_strided_slice %163 {offsets = [0, 256], sizes = [8, 128], strides = [1, 1]} : vector<8x384xf32> to vector<8x128xf32>
    %176 = arith.addf %175, %11 : vector<8x128xf32>
    %177 = arith.mulf %172, %176 : vector<8x128xf32>
    %178 = arith.addf %174, %177 : vector<8x128xf32>
    %179 = math.tanh %178 : vector<8x128xf32>
    %cst_46 = arith.constant 1.000000e+00 : f32
    %180 = vector.broadcast %cst_46 : f32 to vector<8x128xf32>
    %181 = arith.subf %180, %173 : vector<8x128xf32>
    %182 = arith.mulf %181, %179 : vector<8x128xf32>
    %183 = arith.mulf %173, %155 : vector<8x128xf32>
    %184 = arith.addf %182, %183 : vector<8x128xf32>
    %185 = arith.index_cast %159 : i32 to index
    %c0_47 = arith.constant 0 : index
    %186 = vector.load %arg15[%185, %c0_47] : memref<64x128xf32, #tpu.memory_space<vmem>>, vector<8x128xf32>
    tpu.vector_store %arg15[%185, %c0_47], %184 {strides = array<i32>} : memref<64x128xf32, #tpu.memory_space<vmem>>, vector<8x128xf32>,
    %c6_i32 = arith.constant 6 : i32
    %c8_i32_48 = arith.constant 8 : i32
    %187 = arith.muli %c6_i32, %c8_i32_48 : i32
    %188 = tpu.assume_multiple %187, 8 : i32
    %189 = arith.index_cast %188 : i32 to index
    %c0_49 = arith.constant 0 : index
    %190 = vector.load %arg14[%189, %c0_49] : memref<64x384xf32, #tpu.memory_space<vmem>>, vector<8x384xf32>
    %191 = arith.truncf %184 : vector<8x128xf32> to vector<8x128xbf16>
    %cst_50 = arith.constant dense<0.000000e+00> : vector<8x384xf32>
    %192 = tpu.matmul %191, %3, %cst_50 {dimension_numbers = #tpu.dot_dimension_numbers<[1], [0], [0], [1], [0, 0, 1, 1], [], []>} : vector<8x128xbf16>, vector<128x384xbf16>, vector<8x384xf32> -> vector<8x384xf32>
    %193 = vector.extract_strided_slice %190 {offsets = [0, 0], sizes = [8, 256], strides = [1, 1]} : vector<8x384xf32> to vector<8x256xf32>
    %194 = vector.extract_strided_slice %192 {offsets = [0, 0], sizes = [8, 256], strides = [1, 1]} : vector<8x384xf32> to vector<8x256xf32>
    %195 = arith.addf %193, %194 : vector<8x256xf32>
    %196 = arith.negf %195 : vector<8x256xf32>
    %197 = math.exp %196 : vector<8x256xf32>
    %cst_51 = arith.constant 1.000000e+00 : f32
    %198 = vector.broadcast %cst_51 : f32 to vector<8x256xf32>
    %199 = arith.addf %198, %197 : vector<8x256xf32>
    %200 = arith.divf %198, %199 : vector<8x256xf32>
    %201 = vector.extract_strided_slice %200 {offsets = [0, 0], sizes = [8, 128], strides = [1, 1]} : vector<8x256xf32> to vector<8x128xf32>
    %202 = vector.extract_strided_slice %200 {offsets = [0, 128], sizes = [8, 128], strides = [1, 1]} : vector<8x256xf32> to vector<8x128xf32>
    %203 = vector.extract_strided_slice %190 {offsets = [0, 256], sizes = [8, 128], strides = [1, 1]} : vector<8x384xf32> to vector<8x128xf32>
    %204 = vector.extract_strided_slice %192 {offsets = [0, 256], sizes = [8, 128], strides = [1, 1]} : vector<8x384xf32> to vector<8x128xf32>
    %205 = arith.addf %204, %11 : vector<8x128xf32>
    %206 = arith.mulf %201, %205 : vector<8x128xf32>
    %207 = arith.addf %203, %206 : vector<8x128xf32>
    %208 = math.tanh %207 : vector<8x128xf32>
    %cst_52 = arith.constant 1.000000e+00 : f32
    %209 = vector.broadcast %cst_52 : f32 to vector<8x128xf32>
    %210 = arith.subf %209, %202 : vector<8x128xf32>
    %211 = arith.mulf %210, %208 : vector<8x128xf32>
    %212 = arith.mulf %202, %184 : vector<8x128xf32>
    %213 = arith.addf %211, %212 : vector<8x128xf32>
    %214 = arith.index_cast %188 : i32 to index
    %c0_53 = arith.constant 0 : index
    %215 = vector.load %arg15[%214, %c0_53] : memref<64x128xf32, #tpu.memory_space<vmem>>, vector<8x128xf32>
    tpu.vector_store %arg15[%214, %c0_53], %213 {strides = array<i32>} : memref<64x128xf32, #tpu.memory_space<vmem>>, vector<8x128xf32>,
    %c7_i32 = arith.constant 7 : i32
    %c8_i32_54 = arith.constant 8 : i32
    %216 = arith.muli %c7_i32, %c8_i32_54 : i32
    %217 = tpu.assume_multiple %216, 8 : i32
    %218 = arith.index_cast %217 : i32 to index
    %c0_55 = arith.constant 0 : index
    %219 = vector.load %arg14[%218, %c0_55] : memref<64x384xf32, #tpu.memory_space<vmem>>, vector<8x384xf32>
    %220 = arith.truncf %213 : vector<8x128xf32> to vector<8x128xbf16>
    %cst_56 = arith.constant dense<0.000000e+00> : vector<8x384xf32>
    %221 = tpu.matmul %220, %3, %cst_56 {dimension_numbers = #tpu.dot_dimension_numbers<[1], [0], [0], [1], [0, 0, 1, 1], [], []>} : vector<8x128xbf16>, vector<128x384xbf16>, vector<8x384xf32> -> vector<8x384xf32>
    %222 = vector.extract_strided_slice %219 {offsets = [0, 0], sizes = [8, 256], strides = [1, 1]} : vector<8x384xf32> to vector<8x256xf32>
    %223 = vector.extract_strided_slice %221 {offsets = [0, 0], sizes = [8, 256], strides = [1, 1]} : vector<8x384xf32> to vector<8x256xf32>
    %224 = arith.addf %222, %223 : vector<8x256xf32>
    %225 = arith.negf %224 : vector<8x256xf32>
    %226 = math.exp %225 : vector<8x256xf32>
    %cst_57 = arith.constant 1.000000e+00 : f32
    %227 = vector.broadcast %cst_57 : f32 to vector<8x256xf32>
    %228 = arith.addf %227, %226 : vector<8x256xf32>
    %229 = arith.divf %227, %228 : vector<8x256xf32>
    %230 = vector.extract_strided_slice %229 {offsets = [0, 0], sizes = [8, 128], strides = [1, 1]} : vector<8x256xf32> to vector<8x128xf32>
    %231 = vector.extract_strided_slice %229 {offsets = [0, 128], sizes = [8, 128], strides = [1, 1]} : vector<8x256xf32> to vector<8x128xf32>
    %232 = vector.extract_strided_slice %219 {offsets = [0, 256], sizes = [8, 128], strides = [1, 1]} : vector<8x384xf32> to vector<8x128xf32>
    %233 = vector.extract_strided_slice %221 {offsets = [0, 256], sizes = [8, 128], strides = [1, 1]} : vector<8x384xf32> to vector<8x128xf32>
    %234 = arith.addf %233, %11 : vector<8x128xf32>
    %235 = arith.mulf %230, %234 : vector<8x128xf32>
    %236 = arith.addf %232, %235 : vector<8x128xf32>
    %237 = math.tanh %236 : vector<8x128xf32>
    %cst_58 = arith.constant 1.000000e+00 : f32
    %238 = vector.broadcast %cst_58 : f32 to vector<8x128xf32>
    %239 = arith.subf %238, %231 : vector<8x128xf32>
    %240 = arith.mulf %239, %237 : vector<8x128xf32>
    %241 = arith.mulf %231, %213 : vector<8x128xf32>
    %242 = arith.addf %240, %241 : vector<8x128xf32>
    %243 = arith.index_cast %217 : i32 to index
    %c0_59 = arith.constant 0 : index
    %244 = vector.load %arg15[%243, %c0_59] : memref<64x128xf32, #tpu.memory_space<vmem>>, vector<8x128xf32>
    tpu.vector_store %arg15[%243, %c0_59], %242 {strides = array<i32>} : memref<64x128xf32, #tpu.memory_space<vmem>>, vector<8x128xf32>,
    %c8_i32_60 = arith.constant 8 : i32
    %c0_61 = arith.constant 0 : index
    %c0_62 = arith.constant 0 : index
    %c0_63 = arith.constant 0 : index
    %c0_64 = arith.constant 0 : index
    %245 = vector.load %arg13[%c0_61, %c0_62, %c0_63, %c0_64] : memref<1x2x8x128xf32, #tpu.memory_space<vmem>>, vector<1x1x8x128xf32>
    %246 = vector.shape_cast %245 : vector<1x1x8x128xf32> to vector<8x128xf32>
    %247 = vector.shape_cast %242 : vector<8x128xf32> to vector<1x1x8x128xf32>
    tpu.vector_store %arg13[%c0_61, %c0_62, %c0_63, %c0_64], %247 {strides = array<i32>} : memref<1x2x8x128xf32, #tpu.memory_space<vmem>>, vector<1x1x8x128xf32>,
    %c0_65 = arith.constant 0 : index
    %c0_66 = arith.constant 0 : index
    %248 = vector.load %arg15[%c0_65, %c0_66] : memref<64x128xf32, #tpu.memory_space<vmem>>, vector<64x128xf32>
    %c0_67 = arith.constant 0 : index
    %c0_68 = arith.constant 0 : index
    %249 = vector.load %arg6[%c0_67, %c0_68] : memref<128x384xbf16, #tpu.memory_space<vmem>>, vector<128x384xbf16>
    %c0_69 = arith.constant 0 : index
    %c0_70 = arith.constant 0 : index
    %250 = vector.load %arg7[%c0_69, %c0_70] : memref<128x384xbf16, #tpu.memory_space<vmem>>, vector<128x384xbf16>
    %c0_71 = arith.constant 0 : index
    %c0_72 = arith.constant 0 : index
    %251 = vector.load %arg8[%c0_71, %c0_72] : memref<1x384xf32, #tpu.memory_space<vmem>>, vector<1x384xf32>
    %c0_73 = arith.constant 0 : index
    %c0_74 = arith.constant 0 : index
    %252 = vector.load %arg9[%c0_73, %c0_74] : memref<1x128xf32, #tpu.memory_space<vmem>>, vector<1x128xf32>
    %253 = arith.truncf %248 : vector<64x128xf32> to vector<64x128xbf16>
    %cst_75 = arith.constant dense<0.000000e+00> : vector<64x384xf32>
    %254 = tpu.matmul %253, %249, %cst_75 {dimension_numbers = #tpu.dot_dimension_numbers<[1], [0], [0], [1], [0, 0, 1, 1], [], []>} : vector<64x128xbf16>, vector<128x384xbf16>, vector<64x384xf32> -> vector<64x384xf32>
    %255 = vector.broadcast %251 : vector<1x384xf32> to vector<64x384xf32>
    %256 = arith.addf %254, %255 : vector<64x384xf32>
    %c0_76 = arith.constant 0 : index
    %c0_77 = arith.constant 0 : index
    %257 = vector.load %arg14[%c0_76, %c0_77] : memref<64x384xf32, #tpu.memory_space<vmem>>, vector<64x384xf32>
    tpu.vector_store %arg14[%c0_76, %c0_77], %256 {strides = array<i32>} : memref<64x384xf32, #tpu.memory_space<vmem>>, vector<64x384xf32>,
    %258 = vector.shape_cast %252 : vector<1x128xf32> to vector<1x128xf32>
    %259 = vector.broadcast %258 : vector<1x128xf32> to vector<8x128xf32>
    %cst_78 = arith.constant 0.000000e+00 : f32
    %260 = vector.broadcast %cst_78 : f32 to vector<8x128xf32>
    %c0_i32_79 = arith.constant 0 : i32
    %c8_i32_80 = arith.constant 8 : i32
    %261 = arith.muli %c0_i32_79, %c8_i32_80 : i32
    %262 = tpu.assume_multiple %261, 8 : i32
    %263 = arith.index_cast %262 : i32 to index
    %c0_81 = arith.constant 0 : index
    %264 = vector.load %arg14[%263, %c0_81] : memref<64x384xf32, #tpu.memory_space<vmem>>, vector<8x384xf32>
    %265 = arith.truncf %260 : vector<8x128xf32> to vector<8x128xbf16>
    %cst_82 = arith.constant dense<0.000000e+00> : vector<8x384xf32>
    %266 = tpu.matmul %265, %250, %cst_82 {dimension_numbers = #tpu.dot_dimension_numbers<[1], [0], [0], [1], [0, 0, 1, 1], [], []>} : vector<8x128xbf16>, vector<128x384xbf16>, vector<8x384xf32> -> vector<8x384xf32>
    %267 = vector.extract_strided_slice %264 {offsets = [0, 0], sizes = [8, 256], strides = [1, 1]} : vector<8x384xf32> to vector<8x256xf32>
    %268 = vector.extract_strided_slice %266 {offsets = [0, 0], sizes = [8, 256], strides = [1, 1]} : vector<8x384xf32> to vector<8x256xf32>
    %269 = arith.addf %267, %268 : vector<8x256xf32>
    %270 = arith.negf %269 : vector<8x256xf32>
    %271 = math.exp %270 : vector<8x256xf32>
    %cst_83 = arith.constant 1.000000e+00 : f32
    %272 = vector.broadcast %cst_83 : f32 to vector<8x256xf32>
    %273 = arith.addf %272, %271 : vector<8x256xf32>
    %274 = arith.divf %272, %273 : vector<8x256xf32>
    %275 = vector.extract_strided_slice %274 {offsets = [0, 0], sizes = [8, 128], strides = [1, 1]} : vector<8x256xf32> to vector<8x128xf32>
    %276 = vector.extract_strided_slice %274 {offsets = [0, 128], sizes = [8, 128], strides = [1, 1]} : vector<8x256xf32> to vector<8x128xf32>
    %277 = vector.extract_strided_slice %264 {offsets = [0, 256], sizes = [8, 128], strides = [1, 1]} : vector<8x384xf32> to vector<8x128xf32>
    %278 = vector.extract_strided_slice %266 {offsets = [0, 256], sizes = [8, 128], strides = [1, 1]} : vector<8x384xf32> to vector<8x128xf32>
    %279 = arith.addf %278, %259 : vector<8x128xf32>
    %280 = arith.mulf %275, %279 : vector<8x128xf32>
    %281 = arith.addf %277, %280 : vector<8x128xf32>
    %282 = math.tanh %281 : vector<8x128xf32>
    %cst_84 = arith.constant 1.000000e+00 : f32
    %283 = vector.broadcast %cst_84 : f32 to vector<8x128xf32>
    %284 = arith.subf %283, %276 : vector<8x128xf32>
    %285 = arith.mulf %284, %282 : vector<8x128xf32>
    %286 = arith.mulf %276, %260 : vector<8x128xf32>
    %287 = arith.addf %285, %286 : vector<8x128xf32>
    %288 = arith.index_cast %262 : i32 to index
    %c0_85 = arith.constant 0 : index
    %289 = vector.load %arg16[%288, %c0_85] : memref<64x128xf32, #tpu.memory_space<vmem>>, vector<8x128xf32>
    tpu.vector_store %arg16[%288, %c0_85], %287 {strides = array<i32>} : memref<64x128xf32, #tpu.memory_space<vmem>>, vector<8x128xf32>,
    %c1_i32_86 = arith.constant 1 : i32
    %c8_i32_87 = arith.constant 8 : i32
    %290 = arith.muli %c1_i32_86, %c8_i32_87 : i32
    %291 = tpu.assume_multiple %290, 8 : i32
    %292 = arith.index_cast %291 : i32 to index
    %c0_88 = arith.constant 0 : index
    %293 = vector.load %arg14[%292, %c0_88] : memref<64x384xf32, #tpu.memory_space<vmem>>, vector<8x384xf32>
    %294 = arith.truncf %287 : vector<8x128xf32> to vector<8x128xbf16>
    %cst_89 = arith.constant dense<0.000000e+00> : vector<8x384xf32>
    %295 = tpu.matmul %294, %250, %cst_89 {dimension_numbers = #tpu.dot_dimension_numbers<[1], [0], [0], [1], [0, 0, 1, 1], [], []>} : vector<8x128xbf16>, vector<128x384xbf16>, vector<8x384xf32> -> vector<8x384xf32>
    %296 = vector.extract_strided_slice %293 {offsets = [0, 0], sizes = [8, 256], strides = [1, 1]} : vector<8x384xf32> to vector<8x256xf32>
    %297 = vector.extract_strided_slice %295 {offsets = [0, 0], sizes = [8, 256], strides = [1, 1]} : vector<8x384xf32> to vector<8x256xf32>
    %298 = arith.addf %296, %297 : vector<8x256xf32>
    %299 = arith.negf %298 : vector<8x256xf32>
    %300 = math.exp %299 : vector<8x256xf32>
    %cst_90 = arith.constant 1.000000e+00 : f32
    %301 = vector.broadcast %cst_90 : f32 to vector<8x256xf32>
    %302 = arith.addf %301, %300 : vector<8x256xf32>
    %303 = arith.divf %301, %302 : vector<8x256xf32>
    %304 = vector.extract_strided_slice %303 {offsets = [0, 0], sizes = [8, 128], strides = [1, 1]} : vector<8x256xf32> to vector<8x128xf32>
    %305 = vector.extract_strided_slice %303 {offsets = [0, 128], sizes = [8, 128], strides = [1, 1]} : vector<8x256xf32> to vector<8x128xf32>
    %306 = vector.extract_strided_slice %293 {offsets = [0, 256], sizes = [8, 128], strides = [1, 1]} : vector<8x384xf32> to vector<8x128xf32>
    %307 = vector.extract_strided_slice %295 {offsets = [0, 256], sizes = [8, 128], strides = [1, 1]} : vector<8x384xf32> to vector<8x128xf32>
    %308 = arith.addf %307, %259 : vector<8x128xf32>
    %309 = arith.mulf %304, %308 : vector<8x128xf32>
    %310 = arith.addf %306, %309 : vector<8x128xf32>
    %311 = math.tanh %310 : vector<8x128xf32>
    %cst_91 = arith.constant 1.000000e+00 : f32
    %312 = vector.broadcast %cst_91 : f32 to vector<8x128xf32>
    %313 = arith.subf %312, %305 : vector<8x128xf32>
    %314 = arith.mulf %313, %311 : vector<8x128xf32>
    %315 = arith.mulf %305, %287 : vector<8x128xf32>
    %316 = arith.addf %314, %315 : vector<8x128xf32>
    %317 = arith.index_cast %291 : i32 to index
    %c0_92 = arith.constant 0 : index
    %318 = vector.load %arg16[%317, %c0_92] : memref<64x128xf32, #tpu.memory_space<vmem>>, vector<8x128xf32>
    tpu.vector_store %arg16[%317, %c0_92], %316 {strides = array<i32>} : memref<64x128xf32, #tpu.memory_space<vmem>>, vector<8x128xf32>,
    %c2_i32_93 = arith.constant 2 : i32
    %c8_i32_94 = arith.constant 8 : i32
    %319 = arith.muli %c2_i32_93, %c8_i32_94 : i32
    %320 = tpu.assume_multiple %319, 8 : i32
    %321 = arith.index_cast %320 : i32 to index
    %c0_95 = arith.constant 0 : index
    %322 = vector.load %arg14[%321, %c0_95] : memref<64x384xf32, #tpu.memory_space<vmem>>, vector<8x384xf32>
    %323 = arith.truncf %316 : vector<8x128xf32> to vector<8x128xbf16>
    %cst_96 = arith.constant dense<0.000000e+00> : vector<8x384xf32>
    %324 = tpu.matmul %323, %250, %cst_96 {dimension_numbers = #tpu.dot_dimension_numbers<[1], [0], [0], [1], [0, 0, 1, 1], [], []>} : vector<8x128xbf16>, vector<128x384xbf16>, vector<8x384xf32> -> vector<8x384xf32>
    %325 = vector.extract_strided_slice %322 {offsets = [0, 0], sizes = [8, 256], strides = [1, 1]} : vector<8x384xf32> to vector<8x256xf32>
    %326 = vector.extract_strided_slice %324 {offsets = [0, 0], sizes = [8, 256], strides = [1, 1]} : vector<8x384xf32> to vector<8x256xf32>
    %327 = arith.addf %325, %326 : vector<8x256xf32>
    %328 = arith.negf %327 : vector<8x256xf32>
    %329 = math.exp %328 : vector<8x256xf32>
    %cst_97 = arith.constant 1.000000e+00 : f32
    %330 = vector.broadcast %cst_97 : f32 to vector<8x256xf32>
    %331 = arith.addf %330, %329 : vector<8x256xf32>
    %332 = arith.divf %330, %331 : vector<8x256xf32>
    %333 = vector.extract_strided_slice %332 {offsets = [0, 0], sizes = [8, 128], strides = [1, 1]} : vector<8x256xf32> to vector<8x128xf32>
    %334 = vector.extract_strided_slice %332 {offsets = [0, 128], sizes = [8, 128], strides = [1, 1]} : vector<8x256xf32> to vector<8x128xf32>
    %335 = vector.extract_strided_slice %322 {offsets = [0, 256], sizes = [8, 128], strides = [1, 1]} : vector<8x384xf32> to vector<8x128xf32>
    %336 = vector.extract_strided_slice %324 {offsets = [0, 256], sizes = [8, 128], strides = [1, 1]} : vector<8x384xf32> to vector<8x128xf32>
    %337 = arith.addf %336, %259 : vector<8x128xf32>
    %338 = arith.mulf %333, %337 : vector<8x128xf32>
    %339 = arith.addf %335, %338 : vector<8x128xf32>
    %340 = math.tanh %339 : vector<8x128xf32>
    %cst_98 = arith.constant 1.000000e+00 : f32
    %341 = vector.broadcast %cst_98 : f32 to vector<8x128xf32>
    %342 = arith.subf %341, %334 : vector<8x128xf32>
    %343 = arith.mulf %342, %340 : vector<8x128xf32>
    %344 = arith.mulf %334, %316 : vector<8x128xf32>
    %345 = arith.addf %343, %344 : vector<8x128xf32>
    %346 = arith.index_cast %320 : i32 to index
    %c0_99 = arith.constant 0 : index
    %347 = vector.load %arg16[%346, %c0_99] : memref<64x128xf32, #tpu.memory_space<vmem>>, vector<8x128xf32>
    tpu.vector_store %arg16[%346, %c0_99], %345 {strides = array<i32>} : memref<64x128xf32, #tpu.memory_space<vmem>>, vector<8x128xf32>,
    %c3_i32_100 = arith.constant 3 : i32
    %c8_i32_101 = arith.constant 8 : i32
    %348 = arith.muli %c3_i32_100, %c8_i32_101 : i32
    %349 = tpu.assume_multiple %348, 8 : i32
    %350 = arith.index_cast %349 : i32 to index
    %c0_102 = arith.constant 0 : index
    %351 = vector.load %arg14[%350, %c0_102] : memref<64x384xf32, #tpu.memory_space<vmem>>, vector<8x384xf32>
    %352 = arith.truncf %345 : vector<8x128xf32> to vector<8x128xbf16>
    %cst_103 = arith.constant dense<0.000000e+00> : vector<8x384xf32>
    %353 = tpu.matmul %352, %250, %cst_103 {dimension_numbers = #tpu.dot_dimension_numbers<[1], [0], [0], [1], [0, 0, 1, 1], [], []>} : vector<8x128xbf16>, vector<128x384xbf16>, vector<8x384xf32> -> vector<8x384xf32>
    %354 = vector.extract_strided_slice %351 {offsets = [0, 0], sizes = [8, 256], strides = [1, 1]} : vector<8x384xf32> to vector<8x256xf32>
    %355 = vector.extract_strided_slice %353 {offsets = [0, 0], sizes = [8, 256], strides = [1, 1]} : vector<8x384xf32> to vector<8x256xf32>
    %356 = arith.addf %354, %355 : vector<8x256xf32>
    %357 = arith.negf %356 : vector<8x256xf32>
    %358 = math.exp %357 : vector<8x256xf32>
    %cst_104 = arith.constant 1.000000e+00 : f32
    %359 = vector.broadcast %cst_104 : f32 to vector<8x256xf32>
    %360 = arith.addf %359, %358 : vector<8x256xf32>
    %361 = arith.divf %359, %360 : vector<8x256xf32>
    %362 = vector.extract_strided_slice %361 {offsets = [0, 0], sizes = [8, 128], strides = [1, 1]} : vector<8x256xf32> to vector<8x128xf32>
    %363 = vector.extract_strided_slice %361 {offsets = [0, 128], sizes = [8, 128], strides = [1, 1]} : vector<8x256xf32> to vector<8x128xf32>
    %364 = vector.extract_strided_slice %351 {offsets = [0, 256], sizes = [8, 128], strides = [1, 1]} : vector<8x384xf32> to vector<8x128xf32>
    %365 = vector.extract_strided_slice %353 {offsets = [0, 256], sizes = [8, 128], strides = [1, 1]} : vector<8x384xf32> to vector<8x128xf32>
    %366 = arith.addf %365, %259 : vector<8x128xf32>
    %367 = arith.mulf %362, %366 : vector<8x128xf32>
    %368 = arith.addf %364, %367 : vector<8x128xf32>
    %369 = math.tanh %368 : vector<8x128xf32>
    %cst_105 = arith.constant 1.000000e+00 : f32
    %370 = vector.broadcast %cst_105 : f32 to vector<8x128xf32>
    %371 = arith.subf %370, %363 : vector<8x128xf32>
    %372 = arith.mulf %371, %369 : vector<8x128xf32>
    %373 = arith.mulf %363, %345 : vector<8x128xf32>
    %374 = arith.addf %372, %373 : vector<8x128xf32>
    %375 = arith.index_cast %349 : i32 to index
    %c0_106 = arith.constant 0 : index
    %376 = vector.load %arg16[%375, %c0_106] : memref<64x128xf32, #tpu.memory_space<vmem>>, vector<8x128xf32>
    tpu.vector_store %arg16[%375, %c0_106], %374 {strides = array<i32>} : memref<64x128xf32, #tpu.memory_space<vmem>>, vector<8x128xf32>,
    %c4_i32_107 = arith.constant 4 : i32
    %c8_i32_108 = arith.constant 8 : i32
    %377 = arith.muli %c4_i32_107, %c8_i32_108 : i32
    %378 = tpu.assume_multiple %377, 8 : i32
    %379 = arith.index_cast %378 : i32 to index
    %c0_109 = arith.constant 0 : index
    %380 = vector.load %arg14[%379, %c0_109] : memref<64x384xf32, #tpu.memory_space<vmem>>, vector<8x384xf32>
    %381 = arith.truncf %374 : vector<8x128xf32> to vector<8x128xbf16>
    %cst_110 = arith.constant dense<0.000000e+00> : vector<8x384xf32>
    %382 = tpu.matmul %381, %250, %cst_110 {dimension_numbers = #tpu.dot_dimension_numbers<[1], [0], [0], [1], [0, 0, 1, 1], [], []>} : vector<8x128xbf16>, vector<128x384xbf16>, vector<8x384xf32> -> vector<8x384xf32>
    %383 = vector.extract_strided_slice %380 {offsets = [0, 0], sizes = [8, 256], strides = [1, 1]} : vector<8x384xf32> to vector<8x256xf32>
    %384 = vector.extract_strided_slice %382 {offsets = [0, 0], sizes = [8, 256], strides = [1, 1]} : vector<8x384xf32> to vector<8x256xf32>
    %385 = arith.addf %383, %384 : vector<8x256xf32>
    %386 = arith.negf %385 : vector<8x256xf32>
    %387 = math.exp %386 : vector<8x256xf32>
    %cst_111 = arith.constant 1.000000e+00 : f32
    %388 = vector.broadcast %cst_111 : f32 to vector<8x256xf32>
    %389 = arith.addf %388, %387 : vector<8x256xf32>
    %390 = arith.divf %388, %389 : vector<8x256xf32>
    %391 = vector.extract_strided_slice %390 {offsets = [0, 0], sizes = [8, 128], strides = [1, 1]} : vector<8x256xf32> to vector<8x128xf32>
    %392 = vector.extract_strided_slice %390 {offsets = [0, 128], sizes = [8, 128], strides = [1, 1]} : vector<8x256xf32> to vector<8x128xf32>
    %393 = vector.extract_strided_slice %380 {offsets = [0, 256], sizes = [8, 128], strides = [1, 1]} : vector<8x384xf32> to vector<8x128xf32>
    %394 = vector.extract_strided_slice %382 {offsets = [0, 256], sizes = [8, 128], strides = [1, 1]} : vector<8x384xf32> to vector<8x128xf32>
    %395 = arith.addf %394, %259 : vector<8x128xf32>
    %396 = arith.mulf %391, %395 : vector<8x128xf32>
    %397 = arith.addf %393, %396 : vector<8x128xf32>
    %398 = math.tanh %397 : vector<8x128xf32>
    %cst_112 = arith.constant 1.000000e+00 : f32
    %399 = vector.broadcast %cst_112 : f32 to vector<8x128xf32>
    %400 = arith.subf %399, %392 : vector<8x128xf32>
    %401 = arith.mulf %400, %398 : vector<8x128xf32>
    %402 = arith.mulf %392, %374 : vector<8x128xf32>
    %403 = arith.addf %401, %402 : vector<8x128xf32>
    %404 = arith.index_cast %378 : i32 to index
    %c0_113 = arith.constant 0 : index
    %405 = vector.load %arg16[%404, %c0_113] : memref<64x128xf32, #tpu.memory_space<vmem>>, vector<8x128xf32>
    tpu.vector_store %arg16[%404, %c0_113], %403 {strides = array<i32>} : memref<64x128xf32, #tpu.memory_space<vmem>>, vector<8x128xf32>,
    %c5_i32_114 = arith.constant 5 : i32
    %c8_i32_115 = arith.constant 8 : i32
    %406 = arith.muli %c5_i32_114, %c8_i32_115 : i32
    %407 = tpu.assume_multiple %406, 8 : i32
    %408 = arith.index_cast %407 : i32 to index
    %c0_116 = arith.constant 0 : index
    %409 = vector.load %arg14[%408, %c0_116] : memref<64x384xf32, #tpu.memory_space<vmem>>, vector<8x384xf32>
    %410 = arith.truncf %403 : vector<8x128xf32> to vector<8x128xbf16>
    %cst_117 = arith.constant dense<0.000000e+00> : vector<8x384xf32>
    %411 = tpu.matmul %410, %250, %cst_117 {dimension_numbers = #tpu.dot_dimension_numbers<[1], [0], [0], [1], [0, 0, 1, 1], [], []>} : vector<8x128xbf16>, vector<128x384xbf16>, vector<8x384xf32> -> vector<8x384xf32>
    %412 = vector.extract_strided_slice %409 {offsets = [0, 0], sizes = [8, 256], strides = [1, 1]} : vector<8x384xf32> to vector<8x256xf32>
    %413 = vector.extract_strided_slice %411 {offsets = [0, 0], sizes = [8, 256], strides = [1, 1]} : vector<8x384xf32> to vector<8x256xf32>
    %414 = arith.addf %412, %413 : vector<8x256xf32>
    %415 = arith.negf %414 : vector<8x256xf32>
    %416 = math.exp %415 : vector<8x256xf32>
    %cst_118 = arith.constant 1.000000e+00 : f32
    %417 = vector.broadcast %cst_118 : f32 to vector<8x256xf32>
    %418 = arith.addf %417, %416 : vector<8x256xf32>
    %419 = arith.divf %417, %418 : vector<8x256xf32>
    %420 = vector.extract_strided_slice %419 {offsets = [0, 0], sizes = [8, 128], strides = [1, 1]} : vector<8x256xf32> to vector<8x128xf32>
    %421 = vector.extract_strided_slice %419 {offsets = [0, 128], sizes = [8, 128], strides = [1, 1]} : vector<8x256xf32> to vector<8x128xf32>
    %422 = vector.extract_strided_slice %409 {offsets = [0, 256], sizes = [8, 128], strides = [1, 1]} : vector<8x384xf32> to vector<8x128xf32>
    %423 = vector.extract_strided_slice %411 {offsets = [0, 256], sizes = [8, 128], strides = [1, 1]} : vector<8x384xf32> to vector<8x128xf32>
    %424 = arith.addf %423, %259 : vector<8x128xf32>
    %425 = arith.mulf %420, %424 : vector<8x128xf32>
    %426 = arith.addf %422, %425 : vector<8x128xf32>
    %427 = math.tanh %426 : vector<8x128xf32>
    %cst_119 = arith.constant 1.000000e+00 : f32
    %428 = vector.broadcast %cst_119 : f32 to vector<8x128xf32>
    %429 = arith.subf %428, %421 : vector<8x128xf32>
    %430 = arith.mulf %429, %427 : vector<8x128xf32>
    %431 = arith.mulf %421, %403 : vector<8x128xf32>
    %432 = arith.addf %430, %431 : vector<8x128xf32>
    %433 = arith.index_cast %407 : i32 to index
    %c0_120 = arith.constant 0 : index
    %434 = vector.load %arg16[%433, %c0_120] : memref<64x128xf32, #tpu.memory_space<vmem>>, vector<8x128xf32>
    tpu.vector_store %arg16[%433, %c0_120], %432 {strides = array<i32>} : memref<64x128xf32, #tpu.memory_space<vmem>>, vector<8x128xf32>,
    %c6_i32_121 = arith.constant 6 : i32
    %c8_i32_122 = arith.constant 8 : i32
    %435 = arith.muli %c6_i32_121, %c8_i32_122 : i32
    %436 = tpu.assume_multiple %435, 8 : i32
    %437 = arith.index_cast %436 : i32 to index
    %c0_123 = arith.constant 0 : index
    %438 = vector.load %arg14[%437, %c0_123] : memref<64x384xf32, #tpu.memory_space<vmem>>, vector<8x384xf32>
    %439 = arith.truncf %432 : vector<8x128xf32> to vector<8x128xbf16>
    %cst_124 = arith.constant dense<0.000000e+00> : vector<8x384xf32>
    %440 = tpu.matmul %439, %250, %cst_124 {dimension_numbers = #tpu.dot_dimension_numbers<[1], [0], [0], [1], [0, 0, 1, 1], [], []>} : vector<8x128xbf16>, vector<128x384xbf16>, vector<8x384xf32> -> vector<8x384xf32>
    %441 = vector.extract_strided_slice %438 {offsets = [0, 0], sizes = [8, 256], strides = [1, 1]} : vector<8x384xf32> to vector<8x256xf32>
    %442 = vector.extract_strided_slice %440 {offsets = [0, 0], sizes = [8, 256], strides = [1, 1]} : vector<8x384xf32> to vector<8x256xf32>
    %443 = arith.addf %441, %442 : vector<8x256xf32>
    %444 = arith.negf %443 : vector<8x256xf32>
    %445 = math.exp %444 : vector<8x256xf32>
    %cst_125 = arith.constant 1.000000e+00 : f32
    %446 = vector.broadcast %cst_125 : f32 to vector<8x256xf32>
    %447 = arith.addf %446, %445 : vector<8x256xf32>
    %448 = arith.divf %446, %447 : vector<8x256xf32>
    %449 = vector.extract_strided_slice %448 {offsets = [0, 0], sizes = [8, 128], strides = [1, 1]} : vector<8x256xf32> to vector<8x128xf32>
    %450 = vector.extract_strided_slice %448 {offsets = [0, 128], sizes = [8, 128], strides = [1, 1]} : vector<8x256xf32> to vector<8x128xf32>
    %451 = vector.extract_strided_slice %438 {offsets = [0, 256], sizes = [8, 128], strides = [1, 1]} : vector<8x384xf32> to vector<8x128xf32>
    %452 = vector.extract_strided_slice %440 {offsets = [0, 256], sizes = [8, 128], strides = [1, 1]} : vector<8x384xf32> to vector<8x128xf32>
    %453 = arith.addf %452, %259 : vector<8x128xf32>
    %454 = arith.mulf %449, %453 : vector<8x128xf32>
    %455 = arith.addf %451, %454 : vector<8x128xf32>
    %456 = math.tanh %455 : vector<8x128xf32>
    %cst_126 = arith.constant 1.000000e+00 : f32
    %457 = vector.broadcast %cst_126 : f32 to vector<8x128xf32>
    %458 = arith.subf %457, %450 : vector<8x128xf32>
    %459 = arith.mulf %458, %456 : vector<8x128xf32>
    %460 = arith.mulf %450, %432 : vector<8x128xf32>
    %461 = arith.addf %459, %460 : vector<8x128xf32>
    %462 = arith.index_cast %436 : i32 to index
    %c0_127 = arith.constant 0 : index
    %463 = vector.load %arg16[%462, %c0_127] : memref<64x128xf32, #tpu.memory_space<vmem>>, vector<8x128xf32>
    tpu.vector_store %arg16[%462, %c0_127], %461 {strides = array<i32>} : memref<64x128xf32, #tpu.memory_space<vmem>>, vector<8x128xf32>,
    %c7_i32_128 = arith.constant 7 : i32
    %c8_i32_129 = arith.constant 8 : i32
    %464 = arith.muli %c7_i32_128, %c8_i32_129 : i32
    %465 = tpu.assume_multiple %464, 8 : i32
    %466 = arith.index_cast %465 : i32 to index
    %c0_130 = arith.constant 0 : index
    %467 = vector.load %arg14[%466, %c0_130] : memref<64x384xf32, #tpu.memory_space<vmem>>, vector<8x384xf32>
    %468 = arith.truncf %461 : vector<8x128xf32> to vector<8x128xbf16>
    %cst_131 = arith.constant dense<0.000000e+00> : vector<8x384xf32>
    %469 = tpu.matmul %468, %250, %cst_131 {dimension_numbers = #tpu.dot_dimension_numbers<[1], [0], [0], [1], [0, 0, 1, 1], [], []>} : vector<8x128xbf16>, vector<128x384xbf16>, vector<8x384xf32> -> vector<8x384xf32>
    %470 = vector.extract_strided_slice %467 {offsets = [0, 0], sizes = [8, 256], strides = [1, 1]} : vector<8x384xf32> to vector<8x256xf32>
    %471 = vector.extract_strided_slice %469 {offsets = [0, 0], sizes = [8, 256], strides = [1, 1]} : vector<8x384xf32> to vector<8x256xf32>
    %472 = arith.addf %470, %471 : vector<8x256xf32>
    %473 = arith.negf %472 : vector<8x256xf32>
    %474 = math.exp %473 : vector<8x256xf32>
    %cst_132 = arith.constant 1.000000e+00 : f32
    %475 = vector.broadcast %cst_132 : f32 to vector<8x256xf32>
    %476 = arith.addf %475, %474 : vector<8x256xf32>
    %477 = arith.divf %475, %476 : vector<8x256xf32>
    %478 = vector.extract_strided_slice %477 {offsets = [0, 0], sizes = [8, 128], strides = [1, 1]} : vector<8x256xf32> to vector<8x128xf32>
    %479 = vector.extract_strided_slice %477 {offsets = [0, 128], sizes = [8, 128], strides = [1, 1]} : vector<8x256xf32> to vector<8x128xf32>
    %480 = vector.extract_strided_slice %467 {offsets = [0, 256], sizes = [8, 128], strides = [1, 1]} : vector<8x384xf32> to vector<8x128xf32>
    %481 = vector.extract_strided_slice %469 {offsets = [0, 256], sizes = [8, 128], strides = [1, 1]} : vector<8x384xf32> to vector<8x128xf32>
    %482 = arith.addf %481, %259 : vector<8x128xf32>
    %483 = arith.mulf %478, %482 : vector<8x128xf32>
    %484 = arith.addf %480, %483 : vector<8x128xf32>
    %485 = math.tanh %484 : vector<8x128xf32>
    %cst_133 = arith.constant 1.000000e+00 : f32
    %486 = vector.broadcast %cst_133 : f32 to vector<8x128xf32>
    %487 = arith.subf %486, %479 : vector<8x128xf32>
    %488 = arith.mulf %487, %485 : vector<8x128xf32>
    %489 = arith.mulf %479, %461 : vector<8x128xf32>
    %490 = arith.addf %488, %489 : vector<8x128xf32>
    %491 = arith.index_cast %465 : i32 to index
    %c0_134 = arith.constant 0 : index
    %492 = vector.load %arg16[%491, %c0_134] : memref<64x128xf32, #tpu.memory_space<vmem>>, vector<8x128xf32>
    tpu.vector_store %arg16[%491, %c0_134], %490 {strides = array<i32>} : memref<64x128xf32, #tpu.memory_space<vmem>>, vector<8x128xf32>,
    %c8_i32_135 = arith.constant 8 : i32
    %c0_136 = arith.constant 0 : index
    %c1 = arith.constant 1 : index
    %c0_137 = arith.constant 0 : index
    %c0_138 = arith.constant 0 : index
    %493 = vector.load %arg13[%c0_136, %c1, %c0_137, %c0_138] : memref<1x2x8x128xf32, #tpu.memory_space<vmem>>, vector<1x1x8x128xf32>
    %494 = vector.shape_cast %493 : vector<1x1x8x128xf32> to vector<8x128xf32>
    %495 = vector.shape_cast %490 : vector<8x128xf32> to vector<1x1x8x128xf32>
    tpu.vector_store %arg13[%c0_136, %c1, %c0_137, %c0_138], %495 {strides = array<i32>} : memref<1x2x8x128xf32, #tpu.memory_space<vmem>>, vector<1x1x8x128xf32>,
    %c0_139 = arith.constant 0 : index
    %c0_140 = arith.constant 0 : index
    %496 = vector.load %arg16[%c0_139, %c0_140] : memref<64x128xf32, #tpu.memory_space<vmem>>, vector<64x128xf32>
    %497 = arith.truncf %496 : vector<64x128xf32> to vector<64x128xbf16>
    %c0_141 = arith.constant 0 : index
    %c0_142 = arith.constant 0 : index
    %498 = vector.load %arg10[%c0_141, %c0_142] : memref<128x128xbf16, #tpu.memory_space<vmem>>, vector<128x128xbf16>
    %cst_143 = arith.constant dense<0.000000e+00> : vector<64x128xf32>
    %499 = tpu.matmul %497, %498, %cst_143 {dimension_numbers = #tpu.dot_dimension_numbers<[1], [0], [0], [1], [0, 0, 1, 1], [], []>} : vector<64x128xbf16>, vector<128x128xbf16>, vector<64x128xf32> -> vector<64x128xf32>
    %c0_144 = arith.constant 0 : index
    %c0_145 = arith.constant 0 : index
    %500 = vector.load %arg11[%c0_144, %c0_145] : memref<1x128xf32, #tpu.memory_space<vmem>>, vector<1x128xf32>
    %501 = vector.broadcast %500 : vector<1x128xf32> to vector<64x128xf32>
    %502 = arith.addf %499, %501 : vector<64x128xf32>
    %c0_146 = arith.constant 0 : index
    %c0_147 = arith.constant 0 : index
    %c0_148 = arith.constant 0 : index
    %503 = vector.load %arg12[%c0_146, %c0_147, %c0_148] : memref<1x64x128xf32, #tpu.memory_space<vmem>>, vector<1x64x128xf32>
    %504 = vector.shape_cast %503 : vector<1x64x128xf32> to vector<64x128xf32>
    %505 = vector.shape_cast %502 : vector<64x128xf32> to vector<1x64x128xf32>
    tpu.vector_store %arg12[%c0_146, %c0_147, %c0_148], %505 {strides = array<i32>} : memref<1x64x128xf32, #tpu.memory_space<vmem>>, vector<1x64x128xf32>,
    return
  }
  func.func @transform_0(%arg0: i32) -> (i32, i32, i32) {
    %c0_i32 = arith.constant 0 : i32
    %c0_i32_0 = arith.constant 0 : i32
    %c0_i32_1 = arith.constant 0 : i32
    return %arg0, %c0_i32, %c0_i32_0 : i32, i32, i32
  }
  func.func @transform_1(%arg0: i32) -> (i32, i32) {
    %c0_i32 = arith.constant 0 : i32
    %c0_i32_0 = arith.constant 0 : i32
    %c0_i32_1 = arith.constant 0 : i32
    return %c0_i32, %c0_i32_0 : i32, i32
  }
  func.func @transform_2(%arg0: i32) -> (i32, i32) {
    %c0_i32 = arith.constant 0 : i32
    %c0_i32_0 = arith.constant 0 : i32
    %c0_i32_1 = arith.constant 0 : i32
    return %c0_i32, %c0_i32_0 : i32, i32
  }
  func.func @transform_3(%arg0: i32) -> (i32, i32) {
    %c0_i32 = arith.constant 0 : i32
    %c0_i32_0 = arith.constant 0 : i32
    %c0_i32_1 = arith.constant 0 : i32
    return %c0_i32, %c0_i32_0 : i32, i32
  }
  func.func @transform_4(%arg0: i32) -> (i32, i32) {
    %c0_i32 = arith.constant 0 : i32
    %c0_i32_0 = arith.constant 0 : i32
    %c0_i32_1 = arith.constant 0 : i32
    return %c0_i32, %c0_i32_0 : i32, i32
  }
  func.func @transform_5(%arg0: i32) -> (i32, i32) {
    %c0_i32 = arith.constant 0 : i32
    %c0_i32_0 = arith.constant 0 : i32
    %c0_i32_1 = arith.constant 0 : i32
    return %c0_i32, %c0_i32_0 : i32, i32
  }
  func.func @transform_6(%arg0: i32) -> (i32, i32) {
    %c0_i32 = arith.constant 0 : i32
    %c0_i32_0 = arith.constant 0 : i32
    %c0_i32_1 = arith.constant 0 : i32
    return %c0_i32, %c0_i32_0 : i32, i32
  }
  func.func @transform_7(%arg0: i32) -> (i32, i32) {
    %c0_i32 = arith.constant 0 : i32
    %c0_i32_0 = arith.constant 0 : i32
    %c0_i32_1 = arith.constant 0 : i32
    return %c0_i32, %c0_i32_0 : i32, i32
  }
  func.func @transform_8(%arg0: i32) -> (i32, i32) {
    %c0_i32 = arith.constant 0 : i32
    %c0_i32_0 = arith.constant 0 : i32
    %c0_i32_1 = arith.constant 0 : i32
    return %c0_i32, %c0_i32_0 : i32, i32
  }
  func.func @transform_9(%arg0: i32) -> (i32, i32) {
    %c0_i32 = arith.constant 0 : i32
    %c0_i32_0 = arith.constant 0 : i32
    %c0_i32_1 = arith.constant 0 : i32
    return %c0_i32, %c0_i32_0 : i32, i32
  }
  func.func @transform_10(%arg0: i32) -> (i32, i32) {
    %c0_i32 = arith.constant 0 : i32
    %c0_i32_0 = arith.constant 0 : i32
    %c0_i32_1 = arith.constant 0 : i32
    return %c0_i32, %c0_i32_0 : i32, i32
  }
  func.func @transform_11(%arg0: i32) -> (i32, i32, i32) {
    %c0_i32 = arith.constant 0 : i32
    %c0_i32_0 = arith.constant 0 : i32
    %c0_i32_1 = arith.constant 0 : i32
    return %arg0, %c0_i32, %c0_i32_0 : i32, i32, i32
  }
  func.func @transform_12(%arg0: i32) -> (i32, i32, i32, i32) {
    %c0_i32 = arith.constant 0 : i32
    %c0_i32_0 = arith.constant 0 : i32
    %c0_i32_1 = arith.constant 0 : i32
    %c0_i32_2 = arith.constant 0 : i32
    return %arg0, %c0_i32, %c0_i32_0, %c0_i32_1 : i32, i32, i32, i32
  }
}

</mosaic_0001>

<bundles_post_ra>
// kernel: encoder_forward.1
= control target key start
LH: loop header
LB: loop body
LE: loop exit
PB: predicated region body
PF: predicated region fallthrough
CT: control target
= control target key end

     0   :  { %vm142_vm0 = vcmask 1043456   ;;  %vm129_vm1 = vcmask 64512   ;;  %v5360_v1 = vmov 0   ;;  %v5362_v28 = vmov 0.0   ;;  %s5344_s1 = inlined_call_operand.vmem [shape: bf16[8,384], index: 1, kind: input, shape index: {}]   ;;  %s5345_s0 = inlined_call_operand.vmem [shape: bf16[1,64,8], index: 0, kind: input, shape index: {}]   ;;  %s5346_s2 = inlined_call_operand.vmem [shape: bf16[128,384], index: 2, kind: input, shape index: {}]   ;;  %s5347_s3 = inlined_call_operand.vmem [shape: f32[1,384], index: 3, kind: input, shape index: {}]   ;;  %s5348_s4 = inlined_call_operand.vmem [shape: f32[1,128], index: 4, kind: input, shape index: {}]   ;;  %s5349_s5 = inlined_call_operand.vmem [shape: bf16[128,384], index: 5, kind: input, shape index: {}]   ;;  %s5350_s6 = inlined_call_operand.vmem [shape: bf16[128,384], index: 6, kind: input, shape index: {}]   ;;  %s5351_s12 = inlined_call_operand.vmem [shape: f32[1,2,8,128], index: 12, kind: output, shape index: {1}]   ;;  %s5352_s7 = inlined_call_operand.vmem [shape: f32[1,384], index: 7, kind: input, shape index: {}]   ;;  %s5353_s8 = inlined_call_operand.vmem [shape: f32[1,128], index: 8, kind: input, shape index: {}]   ;;  %s5354_s9 = inlined_call_operand.vmem [shape: bf16[128,128], index: 9, kind: input, shape index: {}]   ;;  %s5355_s10 = inlined_call_operand.vmem [shape: f32[1,128], index: 10, kind: input, shape index: {}]   ;;  %s5356_s11 = inlined_call_operand.vmem [shape: f32[1,64,128], index: 11, kind: output, shape index: {0}]  }
   0x1   :  { %v3591_v0 = vld [vmem:[%s5344_s1 + $0x8] ss:$0 sps:$4 sm:$0xff]   ;;  %184 = vmatprep.mubr.bf16.mxu0 %v5360_v1  ;;  %v3592_v2 = vld [vmem:[%s5345_s0] sm:$0xff]   ;;  %v4016_v10 = vld [vmem:[%s5346_s2 + $0x30] ss:$12 sps:$4 sm:$0xff]   ;;  %vm3905_vm2 = vmmov 0   ;;  %v86_v36 = vlaneseq }
   0x2   :  { %3587 = vmatprep.subr.msk.bf16.mxu1 %vm142_vm0, %v3591_v0  ;;  %v150_v3 = vsel %vm142_vm0, %v3591_v0, 0  ;;  %v3593_v4 = vld [vmem:[%s5345_s0 + $0x8] sm:$0xff]   ;;  %3211 = vmatprep.mubr.msk.bf16.mxu1 %vm129_vm1, %v3592_v2  ;;  %v3987_v5 = vld [vmem:[%s5346_s2 + $0x4] ss:$12 sps:$4 sm:$0xff]   ;;  %v4011_v9 = vld [vmem:[%s5346_s2 + $0x34] ss:$12 sps:$4 sm:$0xff]  }
   0x3   :  { %3210 = vmatpush3.bf16.msra.mxu1 %v150_v3  ;;  %v3992_v6 = vld [vmem:[%s5346_s2] ss:$12 sps:$4 sm:$0xff]   ;;  %v3997_v7 = vld [vmem:[%s5346_s2 + $0x1c] ss:$12 sps:$4 sm:$0xff]   ;;  %v4005_v8 = vld [vmem:[%s5346_s2 + $0x18] ss:$12 sps:$4 sm:$0xff]  }
   0x4   :  { %454 = vmatprep.subr.bf16.mxu1 %v3987_v5  ;;  %v4022_v11 = vld [vmem:[%s5346_s2 + $0x4c] ss:$12 sps:$4 sm:$0xff]   ;;  %v3611_v12 = vld [vmem:[%s5345_s0 + $0x10] sm:$0xff]   ;;  %v49_v14 = vld [vmem:[%s5344_s1] sm:$0xff]  ;;  %v4199_v37 = vshrl.u32 %v86_v36, 7 }
   0x5   :  { %v3613_v13 = vld [vmem:[%s5345_s0 + $0x18] sm:$0xff]   ;;  %v4040_v15 = vld [vmem:[%s5346_s2 + $0x48] ss:$12 sps:$4 sm:$0xff]   ;;  %v2909_v16 = vcombine.high %v49_v14, %v49_v14  ;;  %v2908_v17 = vcombine.low %v49_v14, %v49_v14  ;;  %v4047_v18 = vld [vmem:[%s5346_s2 + $0x64] ss:$12 sps:$4 sm:$0xff]  }
   0x6   :  { %3212 = vmatmul.mubr.msk.bf16.vlgmr.msra.gmra.mrb[0].mxu1 %vm129_vm1, %v3593_v4  ;;  %v4055_v20 = vld [vmem:[%s5346_s2 + $0x60] ss:$12 sps:$4 sm:$0xff]   ;;  %v4062_v21 = vld [vmem:[%s5346_s2 + $0x7c] ss:$12 sps:$4 sm:$0xff]   ;;  %v4071_v22 = vld [vmem:[%s5346_s2 + $0x78] ss:$12 sps:$4 sm:$0xff]  }
   0x7   :  { %455 = vmatpush1.bf16.msra.mxu1 %v3992_v6  ;;  %3215 = vmatprep.mubr.msk.bf16.mxu1 %vm129_vm1, %v3611_v12  ;;  %v144_v19 = vsel %vm142_vm0, %v2908_v17, 0  ;;  %v4078_v23 = vld [vmem:[%s5346_s2 + $0x94] ss:$12 sps:$4 sm:$0xff]   ;;  %v4085_v24 = vld [vmem:[%s5346_s2 + $0x90] ss:$12 sps:$4 sm:$0xff]   ;;  %5366 = vst [vmem:[#allocation5_spill] sm:$0xff] %v4199_v37 }
   0x8   :  { %456 = vmatprep.subr.bf16.mxu1 %v3997_v7  ;;  %2911 = vmatprep.subr.msk.bf16.mxu0 %vm142_vm0, %v2909_v16  ;;  %v4092_v25 = vld [vmem:[%s5346_s2 + $0xac] ss:$12 sps:$4 sm:$0xff]   ;;  %v4101_v26 = vld [vmem:[%s5346_s2 + $0xa8] ss:$12 sps:$4 sm:$0xff]   ;;  %v4144_v31 = vld [vmem:[%s5346_s2 + $0x50] ss:$12 sps:$4 sm:$0xff]  }
   0x9   :  { %153 = vmatpush1.bf16.msra.mxu0 %v144_v19  ;;  %v4110_v27 = vld [vmem:[%s5346_s2 + $0x8] ss:$12 sps:$4 sm:$0xff]   ;;  %v4121_v29 = vld [vmem:[%s5346_s2 + $0x20] ss:$12 sps:$4 sm:$0xff]   ;;  %v4133_v30 = vld [vmem:[%s5346_s2 + $0x38] ss:$12 sps:$4 sm:$0xff]  }
   0xa   :  { %565 = vmatprep.subr.bf16.mxu0 %v3987_v5  ;;  %v4153_v32 = vld [vmem:[%s5346_s2 + $0x68] ss:$12 sps:$4 sm:$0xff]   ;;  %v4161_v33 = vld [vmem:[%s5346_s2 + $0x80] ss:$12 sps:$4 sm:$0xff]   ;;  %v4168_v34 = vld [vmem:[%s5346_s2 + $0x98] ss:$12 sps:$4 sm:$0xff]  }
   0xb   :  { %457 = vmatpush1.bf16.msra.mxu1 %v4005_v8  ;;  %v4175_v35 = vld [vmem:[%s5346_s2 + $0xb0] ss:$12 sps:$4 sm:$0xff]   ;;  %v5357_v38 = vsub.s32 2, %v4199_v37  ;;  %v83_v39 = vld [vmem:[%s5347_s3] sm:$0x7]  ;;  %v5359_v56 = vsub.s32 0, %v4199_v37 }
   0xc   :  { %458 = vmatprep.subr.bf16.mxu1 %v4011_v9  ;;  %2912 = vmatmul.mubr.msk.bf16.vlgmr.msra.gmra.mrb[0].mxu0 %vm129_vm1, %v3592_v2  ;;  %v5358_v57 = vsub.s32 1, %v4199_v37 }
   0xd   :  { %566 = vmatpush1.bf16.msra.mxu0 %v3992_v6  ;;  %194 = vmatprep.mubr.bf16.mxu0 %v5360_v1  ;;  %v4207_v40 = vrot.slane %v83_v39, %v5357_v38  ;;  %v89_v59 = vrot.slane %v83_v39, %v5359_v56 }
   0xe   :  { %3216 = vmatmul.mubr.msk.bf16.gmra.mrb[4].mxu1 %vm129_vm1, %v3613_v13  ;;  %567 = vmatprep.subr.bf16.mxu0 %v3997_v7  ;;  %v93_v61 = vrot.slane %v83_v39, %v5358_v57 }
   0xf   :  { %459 = vmatpush1.bf16.msra.mxu1 %v4016_v10  ;;  %486 = vmatprep.mubr.bf16.mxu1 %v5360_v1 }
  0x10   :  { %460 = vmatprep.subr.bf16.mxu1 %v4022_v11 }
  0x11   :  { %568 = vmatpush1.bf16.msra.mxu0 %v4005_v8 }
  0x12   :  { %569 = vmatprep.subr.bf16.mxu0 %v4011_v9 }
  0x13   :  { %461 = vmatpush1.bf16.msra.mxu1 %v4040_v15 }
  0x14   :  { %462 = vmatprep.subr.bf16.mxu1 %v4047_v18  ;;  %2913 = vmatmul.mubr.msk.bf16.gmra.mrb[4].mxu0 %vm129_vm1, %v3593_v4 }
  0x15   :  { %570 = vmatpush1.bf16.msra.mxu0 %v4016_v10  ;;  %204 = vmatprep.mubr.bf16.mxu0 %v5360_v1 }
  0x16   :  { %571 = vmatprep.subr.bf16.mxu0 %v4022_v11 }
  0x17   :  { %463 = vmatpush1.bf16.msra.mxu1 %v4055_v20 }
  0x18   :  { %464 = vmatprep.subr.bf16.mxu1 %v4062_v21 }
  0x19   :  { %572 = vmatpush1.bf16.msra.mxu0 %v4040_v15 }
  0x1a   :  { %573 = vmatprep.subr.bf16.mxu0 %v4047_v18 }
  0x1b   :  { %465 = vmatpush1.bf16.msra.mxu1 %v4071_v22 }
  0x1c   :  { %466 = vmatprep.subr.bf16.mxu1 %v4078_v23  ;;  %2914 = vmatmul.mubr.msk.bf16.gmra.mrb[8].mxu0 %vm129_vm1, %v3611_v12 }
  0x1d   :  { %574 = vmatpush1.bf16.msra.mxu0 %v4055_v20  ;;  %214 = vmatprep.mubr.bf16.mxu0 %v5360_v1 }
  0x1e   :  { %575 = vmatprep.subr.bf16.mxu0 %v4062_v21 }
  0x1f   :  { %467 = vmatpush1.bf16.msra.mxu1 %v4085_v24 }
  0x20   :  { %468 = vmatprep.subr.bf16.mxu1 %v4092_v25 }
  0x21   :  { %576 = vmatpush1.bf16.msra.mxu0 %v4071_v22 }
  0x22   :  { %577 = vmatprep.subr.bf16.mxu0 %v4078_v23 }
  0x23   :  { %469 = vmatpush1.bf16.msra.mxu1 %v4101_v26 }
  0x24   :  { %3219 = vmatprep.subr.bf16.mxu1 %v5362_v28  ;;  %2915 = vmatmul.mubr.msk.bf16.gmra.mrb[12].mxu0 %vm129_vm1, %v3613_v13 }
  0x25   :  { %578 = vmatpush1.bf16.msra.mxu0 %v4085_v24  ;;  %597 = vmatprep.mubr.bf16.mxu0 %v5360_v1 }
  0x26   :  { %487 = vmatmul.mubr.bf16.vlgmr.msra.gmra.mrb[8].mxu1 %v5360_v1  ;;  %579 = vmatprep.subr.bf16.mxu0 %v4092_v25 }
  0x27   :  { %3220 = vmatpush3.bf16.msra.mxu1 %v4110_v27  ;;  %3235 = vmatprep.mubr.msk.bf16.mxu1 %vm3905_vm2, %v5362_v28 }
  0x28   :  { %3221 = vmatprep.subr.bf16.mxu1 %v5362_v28 }
  0x29   :  { %580 = vmatpush1.bf16.msra.mxu0 %v4101_v26 }
  0x2a   :  { %677 = vmatprep.subr.bf16.mxu0 %v3987_v5 }
  0x2b   :  { %3222 = vmatpush3.bf16.msra.mxu1 %v4121_v29 }
  0x2c   :  { %3223 = vmatprep.subr.bf16.mxu1 %v5362_v28 }
  0x2f   :  { %3224 = vmatpush3.bf16.msra.mxu1 %v4133_v30 }
  0x30   :  { %3225 = vmatprep.subr.bf16.mxu1 %v5362_v28 }
  0x33   :  { %3226 = vmatpush3.bf16.msra.mxu1 %v4144_v31 }
  0x34   :  { %3227 = vmatprep.subr.bf16.mxu1 %v5362_v28 }
  0x37   :  { %3228 = vmatpush3.bf16.msra.mxu1 %v4153_v32 }
  0x38   :  { %3229 = vmatprep.subr.bf16.mxu1 %v5362_v28 }
  0x3b   :  { %3230 = vmatpush3.bf16.msra.mxu1 %v4161_v33 }
  0x3c   :  { %3231 = vmatprep.subr.bf16.mxu1 %v5362_v28 }
  0x3f   :  { %3232 = vmatpush3.bf16.msra.mxu1 %v4168_v34 }
  0x40   :  { %3233 = vmatprep.subr.bf16.mxu1 %v5362_v28 }
  0x43   :  { %3234 = vmatpush3.bf16.msra.mxu1 %v4175_v35 }
  0x44   :  { %3239 = vmatprep.subr.bf16.mxu1 %v5362_v28 }
  0x46   :  { %3236 = vmatmul.mubr.bf16.vlgmr.msra.gmra.mrb[12].mxu1 %v5360_v1 }
  0x47   :  { %3240 = vmatpush3.bf16.msra.mxu1 %v4110_v27  ;;  %3255 = vmatprep.mubr.msk.bf16.mxu1 %vm3905_vm2, %v5362_v28 }
  0x48   :  { %3241 = vmatprep.subr.bf16.mxu1 %v5362_v28 }
  0x4b   :  { %3242 = vmatpush3.bf16.msra.mxu1 %v4121_v29 }
  0x4c   :  { %3243 = vmatprep.subr.bf16.mxu1 %v5362_v28 }
  0x4f   :  { %3244 = vmatpush3.bf16.msra.mxu1 %v4133_v30 }
  0x50   :  { %3245 = vmatprep.subr.bf16.mxu1 %v5362_v28 }
  0x53   :  { %3246 = vmatpush3.bf16.msra.mxu1 %v4144_v31 }
  0x54   :  { %3247 = vmatprep.subr.bf16.mxu1 %v5362_v28 }
  0x57   :  { %3248 = vmatpush3.bf16.msra.mxu1 %v4153_v32 }
  0x58   :  { %3249 = vmatprep.subr.bf16.mxu1 %v5362_v28 }
  0x5b   :  { %3250 = vmatpush3.bf16.msra.mxu1 %v4161_v33 }
  0x5c   :  { %3251 = vmatprep.subr.bf16.mxu1 %v5362_v28 }
  0x5f   :  { %3252 = vmatpush3.bf16.msra.mxu1 %v4168_v34 }
  0x60   :  { %3253 = vmatprep.subr.bf16.mxu1 %v5362_v28 }
  0x63   :  { %3254 = vmatpush3.bf16.msra.mxu1 %v4175_v35 }
  0x64   :  { %3259 = vmatprep.subr.bf16.mxu1 %v5362_v28 }
  0xd9   :  { %v3213_v41 = vpop.f32.mrb[0].mxu1 }
  0xda   :  { %v4210_v42 = vadd.f32 %v3213_v41, %v4207_v40  ;;  %v4212_v43 = vpop.f32.mrb[1].mxu1 }
  0xdb   :  { %v3214_v44 = vpop.f32.mrb[2].mxu1 }
  0xdc   :  { %v4215_v45 = vadd.f32 %v3214_v44, %v4207_v40  ;;  %v262_v46 = vpop.f32.mrb[3].mxu1 }
  0xdd   :  { %v4218_v47 = vadd.f32 %v262_v46, %v4207_v40 }
  0xdf   :  { %v186_v58 = vpop.f32.mrb[0].mxu0 }
  0xe0   :  { %v188_v60 = vpop.f32.mrb[1].mxu0  ;;  %v187_v36 = vadd.f32 %v186_v58, %v89_v59 }
  0xe1   :  { %v3217_v48 = vpop.f32.mrb[4].mxu1  ;;  %v190_v62 = vpop.f32.mrb[2].mxu0  ;;  %v189_v39 = vadd.f32 %v188_v60, %v93_v61 }
  0xe2   :  { %v4221_v49 = vadd.f32 %v3217_v48, %v4207_v40  ;;  %v275_v50 = vpop.f32.mrb[5].mxu1  ;;  %v4238_v63 = vadd.f32 %v190_v62, %v89_v59  ;;  %v192_v0 = vpop.f32.mrb[3].mxu0 }
  0xe3   :  { %v4224_v51 = vadd.f32 %v275_v50, %v4207_v40  ;;  %v3218_v52 = vpop.f32.mrb[6].mxu1  ;;  %v4240_v2 = vadd.f32 %v192_v0, %v93_v61 }
  0xe4   :  { %v4227_v53 = vadd.f32 %v3218_v52, %v4207_v40  ;;  %v278_v54 = vpop.f32.mrb[7].mxu1 }
  0xe5   :  { %v4230_v55 = vadd.f32 %v278_v54, %v4207_v40 }
  0xe6   :  { %5367 = vst [vmem:[#allocation6_spill] sm:$0xff] %v4227_v53 }
  0xe7   :  { %v196_v3 = vpop.f32.mrb[4].mxu0 }
  0xe8   :  { %v4242_v4 = vadd.f32 %v196_v3, %v89_v59  ;;  %v198_v12 = vpop.f32.mrb[5].mxu0 }
  0xe9   :  { %v4244_v13 = vadd.f32 %v198_v12, %v93_v61  ;;  %v200_v14 = vpop.f32.mrb[6].mxu0 }
  0xea   :  { %v4246_v16 = vadd.f32 %v200_v14, %v89_v59  ;;  %v202_v17 = vpop.f32.mrb[7].mxu0 }
  0xeb   :  { %v4248_v19 = vadd.f32 %v202_v17, %v93_v61 }
  0xef   :  { %v206_v41 = vpop.f32.mrb[8].mxu0 }
  0xf0   :  { %v4250_v46 = vadd.f32 %v206_v41, %v89_v59  ;;  %v208_v48 = vpop.f32.mrb[9].mxu0 }
  0xf1   :  { %v4252_v54 = vadd.f32 %v208_v48, %v93_v61  ;;  %v210_v62 = vpop.f32.mrb[10].mxu0 }
  0xf2   :  { %v4254_v12 = vadd.f32 %v210_v62, %v89_v59  ;;  %v212_v14 = vpop.f32.mrb[11].mxu0 }
  0xf3   :  { %v4256_v57 = vadd.f32 %v212_v14, %v93_v61 }
  0xf7   :  { %v216_v58 = vpop.f32.mrb[12].mxu0 }
  0xf8   :  { %v4258_v60 = vadd.f32 %v216_v58, %v89_v59  ;;  %v218_v41 = vpop.f32.mrb[13].mxu0 }
  0xf9   :  { %v488_v44 = vpop.f32.mrb[8].mxu1  ;;  %v4260_v56 = vadd.f32 %v218_v41, %v93_v61 }
  0xfa   :  { %v535_v50 = vadd.f32 %v488_v44, %v187_v36  ;;  %v490_v52 = vpop.f32.mrb[9].mxu1  ;;  %v220_v36 = vpop.f32.mrb[14].mxu0 }
  0xfb   :  { %v536_v0 = vadd.f32 %v490_v52, %v189_v39  ;;  %v492_v3 = vpop.f32.mrb[10].mxu1  ;;  %v4262_v44 = vadd.f32 %v220_v36, %v89_v59  ;;  %v222_v48 = vpop.f32.mrb[15].mxu0 }
  0xfc   :  { %v2945_v38 = vmul.f32 -1.442695, %v535_v50  ;;  %v493_v17 = vpop.f32.mrb[11].mxu1  ;;  %v4264_v39 = vadd.f32 %v222_v48, %v93_v61  ;;  %v260_v61 = vadd.f32 %v4212_v43, %v4207_v40  ;;  %v5369_v40 = vmov 0.0  }
  0xfd   :  { %v2946_v52 = vmul.f32 -1.442695, %v536_v0  ;;  %v5370_v43 = vmov 0  }
  0xfe   :  { %3702 = vpow2.f32 %v2945_v38  ;;  %5368 = vst [vmem:[#allocation7_spill] sm:$0xff] %v4264_v39  ;;  %v4269_v38 = vld [vmem:[%s5348_s4] ss:$0 sm:$0xff] }
  0xff   :  { %3704 = vpow2.f32 %v2946_v52 }
 0x108   :  { %v3703_v62 = vpop.eup %3702 }
 0x109   :  { %v543_v50 = vadd.f32 1.0, %v3703_v62  ;;  %v3705_v3 = vpop.eup %3704 }
 0x10a   :  { %v544_v14 = vadd.f32 1.0, %v3705_v3 }
 0x10b   :  { %3706 = vrcp.f32 %v543_v50 }
 0x10c   :  { %3708 = vrcp.f32 %v544_v14 }
 0x115   :  { %v3707_v41 = vpop.eup %3706 }
 0x116   :  { %v3709_v62 = vpop.eup %3708 }
 0x117   :  { %v553_v50 = vsub.f32 1.0, %v3709_v62  ;;  %v555_v28 = vmul.f32 0.0, %v3709_v62 }
 0x119   :  { %v529_v17 = vpop.f32.mrb[12].mxu1 }
 0x11a   :  { %v549_v58 = vadd.f32 %v4269_v38, %v529_v17  ;;  %v3237_v59 = vpop.f32.mrb[13].mxu1 }
 0x11b   :  { %v532_v36 = vpop.f32.mrb[14].mxu1 }
 0x11c   :  { %v550_v0 = vmul.f32 %v3707_v41, %v549_v58  ;;  %v3238_v48 = vpop.f32.mrb[15].mxu1 }
 0x11e   :  { %v551_v52 = vadd.f32 %v550_v0, %v260_v61 }
 0x120   :  { %3710 = vtanh.f32 %v551_v52 }
 0x12a   :  { %v3711_v1 = vpop.eup %3710 }
 0x12b   :  { %v554_v37 = vmul.f32 %v3711_v1, %v553_v50 }
 0x12d   :  { %v4274_v3 = vadd.f32 %v555_v28, %v554_v37 }
 0x12f   :  { %v564_v17 = vpack.c.bf16 %v4274_v3, %v4274_v3 }
 0x131   :  { %598 = vmatmul.mubr.bf16.vlgmr.msra.gmra.mrb[16].mxu0 %v564_v17  ;;  %3256 = vmatmul.mubr.bf16.vlgmr.msra.gmra.mrb[16].mxu1 %v564_v17 }
 0x132   :  { %678 = vmatpush1.bf16.msra.mxu0 %v3992_v6  ;;  %3260 = vmatpush3.bf16.msra.mxu1 %v4110_v27 }
 0x133   :  { %679 = vmatprep.subr.bf16.mxu0 %v3997_v7  ;;  %3261 = vmatprep.subr.bf16.mxu1 %v5369_v40 }
 0x134   :  { %709 = vmatprep.mubr.bf16.mxu0 %v5370_v43  ;;  %3275 = vmatprep.mubr.msk.bf16.mxu1 %vm3905_vm2, %v5369_v40 }
 0x136   :  { %680 = vmatpush1.bf16.msra.mxu0 %v4005_v8  ;;  %3262 = vmatpush3.bf16.msra.mxu1 %v4121_v29 }
 0x137   :  { %681 = vmatprep.subr.bf16.mxu0 %v4011_v9  ;;  %3263 = vmatprep.subr.bf16.mxu1 %v5369_v40 }
 0x13a   :  { %682 = vmatpush1.bf16.msra.mxu0 %v4016_v10  ;;  %3264 = vmatpush3.bf16.msra.mxu1 %v4133_v30 }
 0x13b   :  { %683 = vmatprep.subr.bf16.mxu0 %v4022_v11  ;;  %3265 = vmatprep.subr.bf16.mxu1 %v5369_v40 }
 0x13e   :  { %684 = vmatpush1.bf16.msra.mxu0 %v4040_v15  ;;  %3266 = vmatpush3.bf16.msra.mxu1 %v4144_v31 }
 0x13f   :  { %685 = vmatprep.subr.bf16.mxu0 %v4047_v18  ;;  %3267 = vmatprep.subr.bf16.mxu1 %v5369_v40 }
 0x142   :  { %686 = vmatpush1.bf16.msra.mxu0 %v4055_v20  ;;  %3268 = vmatpush3.bf16.msra.mxu1 %v4153_v32 }
 0x143   :  { %687 = vmatprep.subr.bf16.mxu0 %v4062_v21  ;;  %3269 = vmatprep.subr.bf16.mxu1 %v5369_v40 }
 0x146   :  { %688 = vmatpush1.bf16.msra.mxu0 %v4071_v22  ;;  %3270 = vmatpush3.bf16.msra.mxu1 %v4161_v33 }
 0x147   :  { %689 = vmatprep.subr.bf16.mxu0 %v4078_v23  ;;  %3271 = vmatprep.subr.bf16.mxu1 %v5369_v40 }
 0x14a   :  { %690 = vmatpush1.bf16.msra.mxu0 %v4085_v24  ;;  %3272 = vmatpush3.bf16.msra.mxu1 %v4168_v34 }
 0x14b   :  { %691 = vmatprep.subr.bf16.mxu0 %v4092_v25  ;;  %3273 = vmatprep.subr.bf16.mxu1 %v5369_v40 }
 0x14e   :  { %692 = vmatpush1.bf16.msra.mxu0 %v4101_v26  ;;  %3274 = vmatpush3.bf16.msra.mxu1 %v4175_v35 }
 0x14f   :  { %789 = vmatprep.subr.bf16.mxu0 %v3987_v5  ;;  %3279 = vmatprep.subr.bf16.mxu1 %v5369_v40 }
 0x204   :  { %v599_v1 = vpop.f32.mrb[16].mxu0  ;;  %v640_v28 = vpop.f32.mrb[16].mxu1 }
 0x205   :  { %v646_v37 = vadd.f32 %v599_v1, %v4238_v63  ;;  %v601_v14 = vpop.f32.mrb[17].mxu0  ;;  %v3257_v58 = vpop.f32.mrb[17].mxu1  ;;  %v660_v39 = vadd.f32 %v4269_v38, %v640_v28 }
 0x206   :  { %v647_v59 = vadd.f32 %v601_v14, %v4240_v2  ;;  %v603_v41 = vpop.f32.mrb[18].mxu0  ;;  %v643_v36 = vpop.f32.mrb[18].mxu1 }
 0x207   :  { %v2947_v61 = vmul.f32 -1.442695, %v646_v37  ;;  %v604_v0 = vpop.f32.mrb[19].mxu0  ;;  %v3258_v48 = vpop.f32.mrb[19].mxu1 }
 0x208   :  { %v2948_v52 = vmul.f32 -1.442695, %v647_v59 }
 0x209   :  { %3712 = vpow2.f32 %v2947_v61 }
 0x20a   :  { %3714 = vpow2.f32 %v2948_v52 }
 0x213   :  { %v3713_v62 = vpop.eup %3712 }
 0x214   :  { %v654_v50 = vadd.f32 1.0, %v3713_v62  ;;  %v3715_v17 = vpop.eup %3714 }
 0x215   :  { %v655_v53 = vadd.f32 1.0, %v3715_v17 }
 0x216   :  { %3716 = vrcp.f32 %v654_v50 }
 0x217   :  { %3718 = vrcp.f32 %v655_v53 }
 0x220   :  { %v3717_v63 = vpop.eup %3716 }
 0x221   :  { %v661_v1 = vmul.f32 %v3717_v63, %v660_v39  ;;  %v3719_v14 = vpop.eup %3718 }
 0x222   :  { %v664_v37 = vsub.f32 1.0, %v3719_v14  ;;  %v666_v59 = vmul.f32 %v3719_v14, %v4274_v3 }
 0x223   :  { %v662_v2 = vadd.f32 %v661_v1, %v4218_v47 }
 0x225   :  { %3720 = vtanh.f32 %v662_v2 }
 0x22f   :  { %v3721_v58 = vpop.eup %3720 }
 0x230   :  { %v665_v41 = vmul.f32 %v3721_v58, %v664_v37 }
 0x232   :  { %v4318_v36 = vadd.f32 %v666_v59, %v665_v41 }
 0x234   :  { %v676_v61 = vpack.c.bf16 %v4318_v36, %v4318_v36 }
 0x236   :  { %710 = vmatmul.mubr.bf16.vlgmr.msra.gmra.mrb[20].mxu0 %v676_v61  ;;  %3276 = vmatmul.mubr.bf16.vlgmr.msra.gmra.mrb[20].mxu1 %v676_v61 }
 0x237   :  { %790 = vmatpush1.bf16.msra.mxu0 %v3992_v6  ;;  %3280 = vmatpush3.bf16.msra.mxu1 %v4110_v27 }
 0x238   :  { %791 = vmatprep.subr.bf16.mxu0 %v3997_v7  ;;  %3281 = vmatprep.subr.bf16.mxu1 %v5369_v40 }
 0x239   :  { %821 = vmatprep.mubr.bf16.mxu0 %v5370_v43  ;;  %3295 = vmatprep.mubr.msk.bf16.mxu1 %vm3905_vm2, %v5369_v40 }
 0x23b   :  { %792 = vmatpush1.bf16.msra.mxu0 %v4005_v8  ;;  %3282 = vmatpush3.bf16.msra.mxu1 %v4121_v29 }
 0x23c   :  { %793 = vmatprep.subr.bf16.mxu0 %v4011_v9  ;;  %3283 = vmatprep.subr.bf16.mxu1 %v5369_v40 }
 0x23f   :  { %794 = vmatpush1.bf16.msra.mxu0 %v4016_v10  ;;  %3284 = vmatpush3.bf16.msra.mxu1 %v4133_v30 }
 0x240   :  { %795 = vmatprep.subr.bf16.mxu0 %v4022_v11  ;;  %3285 = vmatprep.subr.bf16.mxu1 %v5369_v40 }
 0x243   :  { %796 = vmatpush1.bf16.msra.mxu0 %v4040_v15  ;;  %3286 = vmatpush3.bf16.msra.mxu1 %v4144_v31 }
 0x244   :  { %797 = vmatprep.subr.bf16.mxu0 %v4047_v18  ;;  %3287 = vmatprep.subr.bf16.mxu1 %v5369_v40 }
 0x247   :  { %798 = vmatpush1.bf16.msra.mxu0 %v4055_v20  ;;  %3288 = vmatpush3.bf16.msra.mxu1 %v4153_v32 }
 0x248   :  { %799 = vmatprep.subr.bf16.mxu0 %v4062_v21  ;;  %3289 = vmatprep.subr.bf16.mxu1 %v5369_v40 }
 0x24b   :  { %800 = vmatpush1.bf16.msra.mxu0 %v4071_v22  ;;  %3290 = vmatpush3.bf16.msra.mxu1 %v4161_v33 }
 0x24c   :  { %801 = vmatprep.subr.bf16.mxu0 %v4078_v23  ;;  %3291 = vmatprep.subr.bf16.mxu1 %v5369_v40 }
 0x24f   :  { %802 = vmatpush1.bf16.msra.mxu0 %v4085_v24  ;;  %3292 = vmatpush3.bf16.msra.mxu1 %v4168_v34 }
 0x250   :  { %803 = vmatprep.subr.bf16.mxu0 %v4092_v25  ;;  %3293 = vmatprep.subr.bf16.mxu1 %v5369_v40 }
 0x253   :  { %804 = vmatpush1.bf16.msra.mxu0 %v4101_v26  ;;  %3294 = vmatpush3.bf16.msra.mxu1 %v4175_v35 }
 0x254   :  { %901 = vmatprep.subr.bf16.mxu0 %v3987_v5  ;;  %3299 = vmatprep.subr.bf16.mxu1 %v5369_v40 }
 0x309   :  { %v711_v47 = vpop.f32.mrb[20].mxu0  ;;  %v752_v53 = vpop.f32.mrb[20].mxu1 }
 0x30a   :  { %v758_v39 = vadd.f32 %v711_v47, %v4242_v4  ;;  %v713_v28 = vpop.f32.mrb[21].mxu0  ;;  %v3277_v0 = vpop.f32.mrb[21].mxu1  ;;  %v772_v41 = vadd.f32 %v4269_v38, %v752_v53 }
 0x30b   :  { %v759_v48 = vadd.f32 %v713_v28, %v4244_v13  ;;  %v715_v52 = vpop.f32.mrb[22].mxu0  ;;  %v755_v62 = vpop.f32.mrb[22].mxu1 }
 0x30c   :  { %v2949_v50 = vmul.f32 -1.442695, %v758_v39  ;;  %v716_v17 = vpop.f32.mrb[23].mxu0  ;;  %v3278_v63 = vpop.f32.mrb[23].mxu1 }
 0x30d   :  { %v2950_v1 = vmul.f32 -1.442695, %v759_v48 }
 0x30e   :  { %3722 = vpow2.f32 %v2949_v50 }
 0x30f   :  { %3724 = vpow2.f32 %v2950_v1 }
 0x318   :  { %v3723_v2 = vpop.eup %3722 }
 0x319   :  { %v766_v14 = vadd.f32 1.0, %v3723_v2  ;;  %v3725_v37 = vpop.eup %3724 }
 0x31a   :  { %v767_v58 = vadd.f32 1.0, %v3725_v37 }
 0x31b   :  { %3726 = vrcp.f32 %v766_v14 }
 0x31c   :  { %3728 = vrcp.f32 %v767_v58 }
 0x325   :  { %v3727_v4 = vpop.eup %3726 }
 0x326   :  { %v773_v59 = vmul.f32 %v3727_v4, %v772_v41  ;;  %v3729_v61 = vpop.eup %3728 }
 0x327   :  { %v776_v47 = vsub.f32 1.0, %v3729_v61  ;;  %v778_v0 = vmul.f32 %v3729_v61, %v4318_v36 }
 0x328   :  { %v774_v13 = vadd.f32 %v773_v59, %v4210_v42 }
 0x32a   :  { %3730 = vtanh.f32 %v774_v13 }
 0x334   :  { %v3731_v39 = vpop.eup %3730 }
 0x335   :  { %v777_v28 = vmul.f32 %v3731_v39, %v776_v47 }
 0x337   :  { %v4362_v48 = vadd.f32 %v778_v0, %v777_v28 }
 0x339   :  { %v788_v52 = vpack.c.bf16 %v4362_v48, %v4362_v48 }
 0x33b   :  { %822 = vmatmul.mubr.bf16.vlgmr.msra.gmra.mrb[24].mxu0 %v788_v52  ;;  %3296 = vmatmul.mubr.bf16.vlgmr.msra.gmra.mrb[24].mxu1 %v788_v52 }
 0x33c   :  { %902 = vmatpush1.bf16.msra.mxu0 %v3992_v6  ;;  %3300 = vmatpush3.bf16.msra.mxu1 %v4110_v27 }
 0x33d   :  { %903 = vmatprep.subr.bf16.mxu0 %v3997_v7  ;;  %3301 = vmatprep.subr.bf16.mxu1 %v5369_v40 }
 0x33e   :  { %933 = vmatprep.mubr.bf16.mxu0 %v5370_v43  ;;  %3315 = vmatprep.mubr.msk.bf16.mxu1 %vm3905_vm2, %v5369_v40 }
 0x340   :  { %904 = vmatpush1.bf16.msra.mxu0 %v4005_v8  ;;  %3302 = vmatpush3.bf16.msra.mxu1 %v4121_v29 }
 0x341   :  { %905 = vmatprep.subr.bf16.mxu0 %v4011_v9  ;;  %3303 = vmatprep.subr.bf16.mxu1 %v5369_v40 }
 0x344   :  { %906 = vmatpush1.bf16.msra.mxu0 %v4016_v10  ;;  %3304 = vmatpush3.bf16.msra.mxu1 %v4133_v30 }
 0x345   :  { %907 = vmatprep.subr.bf16.mxu0 %v4022_v11  ;;  %3305 = vmatprep.subr.bf16.mxu1 %v5369_v40 }
 0x348   :  { %908 = vmatpush1.bf16.msra.mxu0 %v4040_v15  ;;  %3306 = vmatpush3.bf16.msra.mxu1 %v4144_v31 }
 0x349   :  { %909 = vmatprep.subr.bf16.mxu0 %v4047_v18  ;;  %3307 = vmatprep.subr.bf16.mxu1 %v5369_v40 }
 0x34c   :  { %910 = vmatpush1.bf16.msra.mxu0 %v4055_v20  ;;  %3308 = vmatpush3.bf16.msra.mxu1 %v4153_v32 }
 0x34d   :  { %911 = vmatprep.subr.bf16.mxu0 %v4062_v21  ;;  %3309 = vmatprep.subr.bf16.mxu1 %v5369_v40 }
 0x350   :  { %912 = vmatpush1.bf16.msra.mxu0 %v4071_v22  ;;  %3310 = vmatpush3.bf16.msra.mxu1 %v4161_v33 }
 0x351   :  { %913 = vmatprep.subr.bf16.mxu0 %v4078_v23  ;;  %3311 = vmatprep.subr.bf16.mxu1 %v5369_v40 }
 0x354   :  { %914 = vmatpush1.bf16.msra.mxu0 %v4085_v24  ;;  %3312 = vmatpush3.bf16.msra.mxu1 %v4168_v34 }
 0x355   :  { %915 = vmatprep.subr.bf16.mxu0 %v4092_v25  ;;  %3313 = vmatprep.subr.bf16.mxu1 %v5369_v40 }
 0x358   :  { %916 = vmatpush1.bf16.msra.mxu0 %v4101_v26  ;;  %3314 = vmatpush3.bf16.msra.mxu1 %v4175_v35 }
 0x359   :  { %1013 = vmatprep.subr.bf16.mxu0 %v3987_v5  ;;  %3319 = vmatprep.subr.bf16.mxu1 %v5369_v40 }
 0x40e   :  { %v823_v42 = vpop.f32.mrb[24].mxu0  ;;  %v864_v53 = vpop.f32.mrb[24].mxu1 }
 0x40f   :  { %v870_v62 = vadd.f32 %v823_v42, %v4246_v16  ;;  %v825_v50 = vpop.f32.mrb[25].mxu0  ;;  %v3297_v17 = vpop.f32.mrb[25].mxu1  ;;  %v884_v47 = vadd.f32 %v4269_v38, %v864_v53 }
 0x410   :  { %v871_v63 = vadd.f32 %v825_v50, %v4248_v19  ;;  %v827_v1 = vpop.f32.mrb[26].mxu0  ;;  %v867_v2 = vpop.f32.mrb[26].mxu1 }
 0x411   :  { %v2951_v14 = vmul.f32 -1.442695, %v870_v62  ;;  %v828_v37 = vpop.f32.mrb[27].mxu0  ;;  %v3298_v58 = vpop.f32.mrb[27].mxu1 }
 0x412   :  { %v2952_v41 = vmul.f32 -1.442695, %v871_v63 }
 0x413   :  { %3732 = vpow2.f32 %v2951_v14 }
 0x414   :  { %3734 = vpow2.f32 %v2952_v41 }
 0x41d   :  { %v3733_v4 = vpop.eup %3732 }
 0x41e   :  { %v878_v59 = vadd.f32 1.0, %v3733_v4  ;;  %v3735_v13 = vpop.eup %3734 }
 0x41f   :  { %v879_v61 = vadd.f32 1.0, %v3735_v13 }
 0x420   :  { %3736 = vrcp.f32 %v878_v59 }
 0x421   :  { %3738 = vrcp.f32 %v879_v61 }
 0x42a   :  { %v3737_v16 = vpop.eup %3736 }
 0x42b   :  { %v885_v39 = vmul.f32 %v3737_v16, %v884_v47  ;;  %v3739_v28 = vpop.eup %3738 }
 0x42c   :  { %v888_v0 = vsub.f32 1.0, %v3739_v28  ;;  %v890_v62 = vmul.f32 %v3739_v28, %v4362_v48 }
 0x42d   :  { %v886_v19 = vadd.f32 %v885_v39, %v4215_v45 }
 0x42f   :  { %3740 = vtanh.f32 %v886_v19 }
 0x439   :  { %v3741_v52 = vpop.eup %3740 }
 0x43a   :  { %v889_v42 = vmul.f32 %v3741_v52, %v888_v0 }
 0x43c   :  { %v4406_v50 = vadd.f32 %v890_v62, %v889_v42 }
 0x43e   :  { %v900_v17 = vpack.c.bf16 %v4406_v50, %v4406_v50 }
 0x440   :  { %934 = vmatmul.mubr.bf16.vlgmr.msra.gmra.mrb[28].mxu0 %v900_v17  ;;  %3316 = vmatmul.mubr.bf16.vlgmr.msra.gmra.mrb[28].mxu1 %v900_v17  ;;  %v4457_v17 = vld [vmem:[%s5346_s2] ss:$12 sps:$4 sm:$0xff]  }
 0x441   :  { %1014 = vmatpush1.bf16.msra.mxu0 %v3992_v6  ;;  %3320 = vmatpush3.bf16.msra.mxu1 %v4110_v27 }
 0x442   :  { %1015 = vmatprep.subr.bf16.mxu0 %v3997_v7  ;;  %3321 = vmatprep.subr.bf16.mxu1 %v5369_v40 }
 0x443   :  { %1045 = vmatprep.mubr.bf16.mxu0 %v5370_v43  ;;  %3335 = vmatprep.mubr.msk.bf16.mxu1 %vm3905_vm2, %v5369_v40 }
 0x445   :  { %1016 = vmatpush1.bf16.msra.mxu0 %v4005_v8  ;;  %3322 = vmatpush3.bf16.msra.mxu1 %v4121_v29 }
 0x446   :  { %1017 = vmatprep.subr.bf16.mxu0 %v4011_v9  ;;  %3323 = vmatprep.subr.bf16.mxu1 %v5369_v40 }
 0x449   :  { %1018 = vmatpush1.bf16.msra.mxu0 %v4016_v10  ;;  %3324 = vmatpush3.bf16.msra.mxu1 %v4133_v30 }
 0x44a   :  { %1019 = vmatprep.subr.bf16.mxu0 %v4022_v11  ;;  %3325 = vmatprep.subr.bf16.mxu1 %v5369_v40 }
 0x44d   :  { %1020 = vmatpush1.bf16.msra.mxu0 %v4040_v15  ;;  %3326 = vmatpush3.bf16.msra.mxu1 %v4144_v31 }
 0x44e   :  { %1021 = vmatprep.subr.bf16.mxu0 %v4047_v18  ;;  %3327 = vmatprep.subr.bf16.mxu1 %v5369_v40 }
 0x451   :  { %1022 = vmatpush1.bf16.msra.mxu0 %v4055_v20  ;;  %3328 = vmatpush3.bf16.msra.mxu1 %v4153_v32 }
 0x452   :  { %1023 = vmatprep.subr.bf16.mxu0 %v4062_v21  ;;  %3329 = vmatprep.subr.bf16.mxu1 %v5369_v40 }
 0x455   :  { %1024 = vmatpush1.bf16.msra.mxu0 %v4071_v22  ;;  %3330 = vmatpush3.bf16.msra.mxu1 %v4161_v33 }
 0x456   :  { %1025 = vmatprep.subr.bf16.mxu0 %v4078_v23  ;;  %3331 = vmatprep.subr.bf16.mxu1 %v5369_v40 }
 0x459   :  { %1026 = vmatpush1.bf16.msra.mxu0 %v4085_v24  ;;  %3332 = vmatpush3.bf16.msra.mxu1 %v4168_v34 }
 0x45a   :  { %1027 = vmatprep.subr.bf16.mxu0 %v4092_v25  ;;  %3333 = vmatprep.subr.bf16.mxu1 %v5369_v40 }
 0x45d   :  { %1028 = vmatpush1.bf16.msra.mxu0 %v4101_v26  ;;  %3334 = vmatpush3.bf16.msra.mxu1 %v4175_v35 }
 0x45e   :  { %1125 = vmatprep.subr.bf16.mxu0 %v3987_v5  ;;  %3339 = vmatprep.subr.bf16.mxu1 %v5369_v40 }
 0x513   :  { %v935_v6 = vpop.f32.mrb[28].mxu0  ;;  %v976_v7 = vpop.f32.mrb[28].mxu1 }
 0x514   :  { %v982_v45 = vadd.f32 %v935_v6, %v4250_v46  ;;  %v937_v53 = vpop.f32.mrb[29].mxu0  ;;  %v3317_v63 = vpop.f32.mrb[29].mxu1  ;;  %v996_v47 = vadd.f32 %v4269_v38, %v976_v7 }
 0x515   :  { %v983_v1 = vadd.f32 %v937_v53, %v4252_v54  ;;  %v939_v2 = vpop.f32.mrb[30].mxu0  ;;  %v979_v14 = vpop.f32.mrb[30].mxu1 }
 0x516   :  { %v2953_v37 = vmul.f32 -1.442695, %v982_v45  ;;  %v940_v58 = vpop.f32.mrb[31].mxu0  ;;  %v3318_v41 = vpop.f32.mrb[31].mxu1 }
 0x517   :  { %v2954_v4 = vmul.f32 -1.442695, %v983_v1 }
 0x518   :  { %3742 = vpow2.f32 %v2953_v37 }
 0x519   :  { %3744 = vpow2.f32 %v2954_v4 }
 0x522   :  { %v3743_v59 = vpop.eup %3742 }
 0x523   :  { %v990_v5 = vadd.f32 1.0, %v3743_v59  ;;  %v3745_v13 = vpop.eup %3744 }
 0x524   :  { %v991_v61 = vadd.f32 1.0, %v3745_v13  ;;  %v3868_v13 = vld [vmem:[%s5346_s2 + $0x4c] ss:$12 sps:$4 sm:$0xff]  }
 0x525   :  { %3746 = vrcp.f32 %v990_v5  ;;  %v3867_v5 = vld [vmem:[%s5346_s2 + $0x30] ss:$12 sps:$4 sm:$0xff]  }
 0x526   :  { %3748 = vrcp.f32 %v991_v61  ;;  %v3870_v61 = vld [vmem:[%s5346_s2 + $0x64] ss:$12 sps:$4 sm:$0xff]  }
 0x52f   :  { %v3747_v46 = vpop.eup %3746 }
 0x530   :  { %v997_v16 = vmul.f32 %v3747_v46, %v996_v47  ;;  %v3749_v39 = vpop.eup %3748  ;;  %v3872_v47 = vld [vmem:[%s5346_s2 + $0x7c] ss:$12 sps:$4 sm:$0xff]   ;;  %v3874_v46 = vld [vmem:[%s5346_s2 + $0x94] ss:$12 sps:$4 sm:$0xff]  }
 0x531   :  { %v1000_v19 = vsub.f32 1.0, %v3749_v39  ;;  %v1002_v52 = vmul.f32 %v3749_v39, %v4406_v50 }
 0x532   :  { %v998_v54 = vadd.f32 %v997_v16, %v4224_v51  ;;  %v4464_v51 = vld [vmem:[%s5346_s2 + $0x1c] ss:$12 sps:$4 sm:$0xff]   ;;  %v3876_v16 = vld [vmem:[%s5346_s2 + $0xac] ss:$12 sps:$4 sm:$0xff]  }
 0x534   :  { %3750 = vtanh.f32 %v998_v54  ;;  %v3632_v54 = vld [vmem:[%s5349_s5 + $0x4] ss:$12 sps:$4 sm:$0xff]  }
 0x53e   :  { %v3751_v28 = vpop.eup %3750 }
 0x53f   :  { %v1001_v0 = vmul.f32 %v3751_v28, %v1000_v19 }
 0x541   :  { %v4450_v42 = vadd.f32 %v1002_v52, %v1001_v0 }
 0x543   :  { %v1012_v62 = vpack.c.bf16 %v4450_v42, %v4450_v42 }
 0x545   :  { %1046 = vmatmul.mubr.bf16.vlgmr.msra.gmra.mrb[32].mxu0 %v1012_v62  ;;  %3336 = vmatmul.mubr.bf16.vlgmr.msra.gmra.mrb[32].mxu1 %v1012_v62 }
 0x546   :  { %1126 = vmatpush1.bf16.msra.mxu0 %v4457_v17  ;;  %3340 = vmatpush3.bf16.msra.mxu1 %v4110_v27 }
 0x547   :  { %1127 = vmatprep.subr.bf16.mxu0 %v4464_v51  ;;  %3341 = vmatprep.subr.bf16.mxu1 %v5369_v40 }
 0x548   :  { %1157 = vmatprep.mubr.bf16.mxu0 %v5370_v43  ;;  %3355 = vmatprep.mubr.msk.bf16.mxu1 %vm3905_vm2, %v5369_v40 }
 0x54a   :  { %1128 = vmatpush1.bf16.msra.mxu0 %v4005_v8  ;;  %3342 = vmatpush3.bf16.msra.mxu1 %v4121_v29  ;;  %v3864_v8 = vld [vmem:[%s5346_s2 + $0x4] ss:$12 sps:$4 sm:$0xff]  }
 0x54b   :  { %1129 = vmatprep.subr.bf16.mxu0 %v4011_v9  ;;  %3343 = vmatprep.subr.bf16.mxu1 %v5369_v40 }
 0x54e   :  { %1130 = vmatpush1.bf16.msra.mxu0 %v4016_v10  ;;  %3344 = vmatpush3.bf16.msra.mxu1 %v4133_v30 }
 0x54f   :  { %1131 = vmatprep.subr.bf16.mxu0 %v4022_v11  ;;  %3345 = vmatprep.subr.bf16.mxu1 %v5369_v40 }
 0x552   :  { %1132 = vmatpush1.bf16.msra.mxu0 %v4040_v15  ;;  %3346 = vmatpush3.bf16.msra.mxu1 %v4144_v31 }
 0x553   :  { %1133 = vmatprep.subr.bf16.mxu0 %v4047_v18  ;;  %3347 = vmatprep.subr.bf16.mxu1 %v5369_v40 }
 0x556   :  { %1134 = vmatpush1.bf16.msra.mxu0 %v4055_v20  ;;  %3348 = vmatpush3.bf16.msra.mxu1 %v4153_v32 }
 0x557   :  { %1135 = vmatprep.subr.bf16.mxu0 %v4062_v21  ;;  %3349 = vmatprep.subr.bf16.mxu1 %v5369_v40 }
 0x55a   :  { %1136 = vmatpush1.bf16.msra.mxu0 %v4071_v22  ;;  %3350 = vmatpush3.bf16.msra.mxu1 %v4161_v33 }
 0x55b   :  { %1137 = vmatprep.subr.bf16.mxu0 %v4078_v23  ;;  %3351 = vmatprep.subr.bf16.mxu1 %v5369_v40 }
 0x55e   :  { %1138 = vmatpush1.bf16.msra.mxu0 %v4085_v24  ;;  %3352 = vmatpush3.bf16.msra.mxu1 %v4168_v34 }
 0x55f   :  { %1139 = vmatprep.subr.bf16.mxu0 %v4092_v25  ;;  %3353 = vmatprep.subr.bf16.mxu1 %v5369_v40 }
 0x562   :  { %1140 = vmatpush1.bf16.msra.mxu0 %v4101_v26  ;;  %3354 = vmatpush3.bf16.msra.mxu1 %v4175_v35 }
 0x563   :  { %1237 = vmatprep.subr.bf16.mxu0 %v3864_v8  ;;  %3359 = vmatprep.subr.bf16.mxu1 %v5369_v40 }
 0x618   :  { %v1047_v9 = vpop.f32.mrb[32].mxu0  ;;  %v1088_v10 = vpop.f32.mrb[32].mxu1 }
 0x619   :  { %v1094_v11 = vadd.f32 %v1047_v9, %v4254_v12  ;;  %v1049_v15 = vpop.f32.mrb[33].mxu0  ;;  %v3337_v18 = vpop.f32.mrb[33].mxu1  ;;  %v1108_v63 = vadd.f32 %v4269_v38, %v1088_v10 }
 0x61a   :  { %v1095_v20 = vadd.f32 %v1049_v15, %v4256_v57  ;;  %v1051_v21 = vpop.f32.mrb[34].mxu0  ;;  %v1091_v22 = vpop.f32.mrb[34].mxu1 }
 0x61b   :  { %v2955_v23 = vmul.f32 -1.442695, %v1094_v11  ;;  %v1052_v24 = vpop.f32.mrb[35].mxu0  ;;  %v3338_v25 = vpop.f32.mrb[35].mxu1 }
 0x61c   :  { %v2956_v26 = vmul.f32 -1.442695, %v1095_v20 }
 0x61d   :  { %3752 = vpow2.f32 %v2955_v23 }
 0x61e   :  { %3754 = vpow2.f32 %v2956_v26 }
 0x627   :  { %v3753_v6 = vpop.eup %3752 }
 0x628   :  { %v1102_v7 = vadd.f32 1.0, %v3753_v6  ;;  %v3755_v45 = vpop.eup %3754 }
 0x629   :  { %v1103_v53 = vadd.f32 1.0, %v3755_v45  ;;  %v3630_v45 = vld [vmem:[%s5349_s5] ss:$12 sps:$4 sm:$0xff]  }
 0x62a   :  { %3756 = vrcp.f32 %v1102_v7 }
 0x62b   :  { %3758 = vrcp.f32 %v1103_v53  ;;  %v3637_v53 = vld [vmem:[%s5349_s5 + $0x20] ss:$12 sps:$4 sm:$0xff]  }
 0x634   :  { %v3757_v12 = vpop.eup %3756 }
 0x635   :  { %v1109_v1 = vmul.f32 %v3757_v12, %v1108_v63  ;;  %v3759_v2 = vpop.eup %3758  ;;  %v1417_v63 = vpack.c.bf16 %v4318_v36, %v4274_v3  ;;  %v3634_v12 = vld [vmem:[%s5349_s5 + $0x18] ss:$12 sps:$4 sm:$0xff]   ;;  %v3638_v3 = vld [vmem:[%s5349_s5 + $0x30] ss:$12 sps:$4 sm:$0xff]  }
 0x636   :  { %v1112_v14 = vsub.f32 1.0, %v3759_v2  ;;  %v1114_v41 = vmul.f32 %v3759_v2, %v4450_v42  ;;  %v3644_v36 = vld [vmem:[%s5349_s5 + $0x4c] ss:$12 sps:$4 sm:$0xff]   ;;  %v3645_v2 = vld [vmem:[%s5349_s5 + $0x50] ss:$12 sps:$4 sm:$0xff]  }
 0x637   :  { %v1110_v57 = vadd.f32 %v1109_v1, %v4230_v55  ;;  %v3865_v55 = vld [vmem:[%s5346_s2 + $0x18] ss:$12 sps:$4 sm:$0xff]   ;;  %v3640_v1 = vld [vmem:[%s5349_s5 + $0x34] ss:$12 sps:$4 sm:$0xff]  }
 0x639   :  { %3760 = vtanh.f32 %v1110_v57  ;;  %v3641_v57 = vld [vmem:[%s5349_s5 + $0x38] ss:$12 sps:$4 sm:$0xff]  }
 0x643   :  { %v3761_v37 = vpop.eup %3760 }
 0x644   :  { %v1113_v58 = vmul.f32 %v3761_v37, %v1112_v14  ;;  %v3642_v14 = vld [vmem:[%s5349_s5 + $0x48] ss:$12 sps:$4 sm:$0xff]   ;;  %v3648_v37 = vld [vmem:[%s5349_s5 + $0x64] ss:$12 sps:$4 sm:$0xff]  }
 0x646   :  { %v4506_v4 = vadd.f32 %v1114_v41, %v1113_v58  ;;  %v3649_v58 = vld [vmem:[%s5349_s5 + $0x68] ss:$12 sps:$4 sm:$0xff]   ;;  %v3646_v41 = vld [vmem:[%s5349_s5 + $0x60] ss:$12 sps:$4 sm:$0xff]  }
 0x648   :  { %v1124_v59 = vpack.c.bf16 %v4506_v4, %v4506_v4 }
 0x64a   :  { %1158 = vmatmul.mubr.bf16.vlgmr.msra.gmra.mrb[36].mxu0 %v1124_v59  ;;  %3356 = vmatmul.mubr.bf16.vlgmr.msra.gmra.mrb[36].mxu1 %v1124_v59  ;;  %v3652_v59 = vld [vmem:[%s5349_s5 + $0x7c] ss:$12 sps:$4 sm:$0xff]  }
 0x64b   :  { %1238 = vmatpush1.bf16.msra.mxu0 %v4457_v17  ;;  %3360 = vmatpush3.bf16.msra.mxu1 %v4110_v27  ;;  %v3866_v27 = vld [vmem:[%s5346_s2 + $0x34] ss:$12 sps:$4 sm:$0xff]  }
 0x64c   :  { %1239 = vmatprep.subr.bf16.mxu0 %v4464_v51  ;;  %3361 = vmatprep.subr.bf16.mxu1 %v5369_v40 }
 0x64d   :  { %1269 = vmatprep.mubr.bf16.mxu0 %v5370_v43  ;;  %3375 = vmatprep.mubr.msk.bf16.mxu1 %vm3905_vm2, %v5369_v40 }
 0x64f   :  { %1240 = vmatpush1.bf16.msra.mxu0 %v3865_v55  ;;  %3362 = vmatpush3.bf16.msra.mxu1 %v4121_v29  ;;  %v3869_v29 = vld [vmem:[%s5346_s2 + $0x48] ss:$12 sps:$4 sm:$0xff]   ;;  %v3653_v55 = vld [vmem:[%s5349_s5 + $0x80] ss:$12 sps:$4 sm:$0xff]  }
 0x650   :  { %1241 = vmatprep.subr.bf16.mxu0 %v3866_v27  ;;  %3363 = vmatprep.subr.bf16.mxu1 %v5369_v40  ;;  %v3650_v27 = vld [vmem:[%s5349_s5 + $0x78] ss:$12 sps:$4 sm:$0xff]  }
 0x653   :  { %1242 = vmatpush1.bf16.msra.mxu0 %v3867_v5  ;;  %3364 = vmatpush3.bf16.msra.mxu1 %v4133_v30  ;;  %v3871_v30 = vld [vmem:[%s5346_s2 + $0x60] ss:$12 sps:$4 sm:$0xff]  }
 0x654   :  { %1243 = vmatprep.subr.bf16.mxu0 %v3868_v13  ;;  %3365 = vmatprep.subr.bf16.mxu1 %v5369_v40  ;;  %v3656_v5 = vld [vmem:[%s5349_s5 + $0x94] ss:$12 sps:$4 sm:$0xff]   ;;  %v3657_v13 = vld [vmem:[%s5349_s5 + $0x98] ss:$12 sps:$4 sm:$0xff]  }
 0x657   :  { %1244 = vmatpush1.bf16.msra.mxu0 %v3869_v29  ;;  %3366 = vmatpush3.bf16.msra.mxu1 %v4144_v31  ;;  %v3873_v31 = vld [vmem:[%s5346_s2 + $0x78] ss:$12 sps:$4 sm:$0xff]   ;;  %v3654_v29 = vld [vmem:[%s5349_s5 + $0x90] ss:$12 sps:$4 sm:$0xff]  }
 0x658   :  { %1245 = vmatprep.subr.bf16.mxu0 %v3870_v61  ;;  %3367 = vmatprep.subr.bf16.mxu1 %v5369_v40  ;;  %v3660_v61 = vld [vmem:[%s5349_s5 + $0xac] ss:$12 sps:$4 sm:$0xff]  }
 0x65b   :  { %1246 = vmatpush1.bf16.msra.mxu0 %v3871_v30  ;;  %3368 = vmatpush3.bf16.msra.mxu1 %v4153_v32  ;;  %v3875_v32 = vld [vmem:[%s5346_s2 + $0x90] ss:$12 sps:$4 sm:$0xff]  }
 0x65c   :  { %1247 = vmatprep.subr.bf16.mxu0 %v3872_v47  ;;  %3369 = vmatprep.subr.bf16.mxu1 %v5369_v40  ;;  %v3661_v30 = vld [vmem:[%s5349_s5 + $0xb0] ss:$12 sps:$4 sm:$0xff]   ;;  %v3658_v47 = vld [vmem:[%s5349_s5 + $0xa8] ss:$12 sps:$4 sm:$0xff]  }
 0x65f   :  { %1248 = vmatpush1.bf16.msra.mxu0 %v3873_v31  ;;  %3370 = vmatpush3.bf16.msra.mxu1 %v4161_v33  ;;  %v3877_v33 = vld [vmem:[%s5346_s2 + $0xa8] ss:$12 sps:$4 sm:$0xff]   ;;  %v1418_v31 = vpack.c.bf16 %v4406_v50, %v4362_v48  ;;  %v4664_v48 = vld [vmem:[%s5350_s6 + $0x4] ss:$12 sps:$4 sm:$0xff]   ;;  %v4669_v50 = vld [vmem:[%s5350_s6] ss:$12 sps:$4 sm:$0xff]  }
 0x660   :  { %1249 = vmatprep.subr.bf16.mxu0 %v3874_v46  ;;  %3371 = vmatprep.subr.bf16.mxu1 %v5369_v40  ;;  %v1419_v46 = vpack.c.bf16 %v4506_v4, %v4450_v42  ;;  %v4676_v42 = vld [vmem:[%s5350_s6 + $0x1c] ss:$12 sps:$4 sm:$0xff]  }
 0x663   :  { %1250 = vmatpush1.bf16.msra.mxu0 %v3875_v32  ;;  %3372 = vmatpush3.bf16.msra.mxu1 %v4168_v34  ;;  %v3633_v34 = vld [vmem:[%s5349_s5 + $0x8] ss:$12 sps:$4 sm:$0xff]  }
 0x664   :  { %1251 = vmatprep.subr.bf16.mxu0 %v3876_v16  ;;  %3373 = vmatprep.subr.bf16.mxu1 %v5369_v40  ;;  %v4688_v32 = vld [vmem:[%s5350_s6 + $0x34] ss:$12 sps:$4 sm:$0xff]   ;;  %v4693_v16 = vld [vmem:[%s5350_s6 + $0x30] ss:$12 sps:$4 sm:$0xff]  }
 0x667   :  { %1252 = vmatpush1.bf16.msra.mxu0 %v3877_v33  ;;  %3374 = vmatpush3.bf16.msra.mxu1 %v4175_v35  ;;  %v4700_v33 = vld [vmem:[%s5350_s6 + $0x4c] ss:$12 sps:$4 sm:$0xff]  }
 0x668   :  { %1565 = vmatprep.subr.bf16.mxu0 %v3632_v54  ;;  %3379 = vmatprep.subr.bf16.mxu1 %v3633_v34  ;;  %v4705_v54 = vld [vmem:[%s5350_s6 + $0x48] ss:$12 sps:$4 sm:$0xff]  }
 0x71d   :  { %v1159_v39 = vpop.f32.mrb[36].mxu0  ;;  %v1200_v19 = vpop.f32.mrb[36].mxu1 }
 0x71e   :  { %v1206_v28 = vadd.f32 %v1159_v39, %v4258_v60  ;;  %v1161_v0 = vpop.f32.mrb[37].mxu0  ;;  %v3357_v52 = vpop.f32.mrb[37].mxu1  ;;  %v1220_v21 = vadd.f32 %v4269_v38, %v1200_v19  ;;  %v4717_v39 = vld [vmem:[%s5350_s6 + $0x60] ss:$12 sps:$4 sm:$0xff]   ;;  %v4724_v19 = vld [vmem:[%s5350_s6 + $0x7c] ss:$12 sps:$4 sm:$0xff]  }
 0x71f   :  { %v1207_v62 = vadd.f32 %v1161_v0, %v4260_v56  ;;  %v1163_v17 = vpop.f32.mrb[38].mxu0  ;;  %v1203_v35 = vpop.f32.mrb[38].mxu1  ;;  %v4736_v0 = vld [vmem:[%s5350_s6 + $0x94] ss:$12 sps:$4 sm:$0xff]  }
 0x720   :  { %v2957_v51 = vmul.f32 -1.442695, %v1206_v28  ;;  %v1164_v8 = vpop.f32.mrb[39].mxu0  ;;  %v3358_v9 = vpop.f32.mrb[39].mxu1  ;;  %v4729_v28 = vld [vmem:[%s5350_s6 + $0x78] ss:$12 sps:$4 sm:$0xff]  }
 0x721   :  { %v2958_v10 = vmul.f32 -1.442695, %v1207_v62  ;;  %v4741_v52 = vld [vmem:[%s5350_s6 + $0x8] ss:$12 sps:$4 sm:$0xff]   ;;  %v4746_v62 = vld [vmem:[%s5350_s6 + $0x90] ss:$12 sps:$4 sm:$0xff]  }
 0x722   :  { %3762 = vpow2.f32 %v2957_v51  ;;  %v4754_v17 = vld [vmem:[%s5350_s6 + $0xac] ss:$12 sps:$4 sm:$0xff]   ;;  %v4760_v35 = vld [vmem:[%s5350_s6 + $0xa8] ss:$12 sps:$4 sm:$0xff]   ;;  %v4781_v9 = vld [vmem:[%s5350_s6 + $0x50] ss:$12 sps:$4 sm:$0xff]  }
 0x723   :  { %3764 = vpow2.f32 %v2958_v10  ;;  %v4765_v51 = vld [vmem:[%s5350_s6 + $0x20] ss:$12 sps:$4 sm:$0xff]   ;;  %v4774_v8 = vld [vmem:[%s5350_s6 + $0x38] ss:$12 sps:$4 sm:$0xff]   ;;  %v4788_v10 = vld [vmem:[%s5350_s6 + $0x68] ss:$12 sps:$4 sm:$0xff]  }
 0x72c   :  { %v3763_v11 = vpop.eup %3762 }
 0x72d   :  { %v1214_v15 = vadd.f32 1.0, %v3763_v11  ;;  %v3765_v18 = vpop.eup %3764  ;;  %v4795_v11 = vld [vmem:[%s5350_s6 + $0x80] ss:$12 sps:$4 sm:$0xff]  }
 0x72e   :  { %v1215_v20 = vadd.f32 1.0, %v3765_v18  ;;  %v4809_v18 = vld [vmem:[%s5350_s6 + $0xb0] ss:$12 sps:$4 sm:$0xff]  }
 0x72f   :  { %3766 = vrcp.f32 %v1214_v15  ;;  %v4802_v15 = vld [vmem:[%s5350_s6 + $0x98] ss:$12 sps:$4 sm:$0xff]  }
 0x730   :  { %3768 = vrcp.f32 %v1215_v20 }
 0x739   :  { %v3767_v60 = vpop.eup %3766 }
 0x73a   :  { %v1221_v22 = vmul.f32 %v3767_v60, %v1220_v21  ;;  %v3769_v23 = vpop.eup %3768 }
 0x73b   :  { %v1224_v24 = vsub.f32 1.0, %v3769_v23  ;;  %v1226_v6 = vmul.f32 %v3769_v23, %v4506_v4  ;;  %v4681_v4 = vld [vmem:[%s5350_s6 + $0x18] ss:$12 sps:$4 sm:$0xff]   ;;  %v5371_v23 = vld [vmem:[#allocation7_spill] sm:$0xff] }
 0x73c   :  { %v1222_v56 = vadd.f32 %v1221_v22, %v4221_v49  ;;  %v3636_v49 = vld [vmem:[%s5349_s5 + $0x1c] ss:$12 sps:$4 sm:$0xff]  }
 0x73e   :  { %3770 = vtanh.f32 %v1222_v56 }
 0x748   :  { %v3771_v25 = vpop.eup %3770 }
 0x749   :  { %v1225_v26 = vmul.f32 %v3771_v25, %v1224_v24 }
 0x74b   :  { %v4580_v7 = vadd.f32 %v1226_v6, %v1225_v26 }
 0x74d   :  { %v1236_v38 = vpack.c.bf16 %v4580_v7, %v4580_v7 }
 0x74f   :  { %1270 = vmatmul.mubr.bf16.vlgmr.msra.gmra.mrb[40].mxu0 %v1236_v38  ;;  %3376 = vmatmul.mubr.bf16.vlgmr.msra.gmra.mrb[40].mxu1 %v1236_v38 }
 0x750   :  { %1566 = vmatpush1.bf16.msra.mxu0 %v3630_v45  ;;  %3380 = vmatpush3.bf16.msra.mxu1 %v3633_v34  ;;  %v4712_v34 = vld [vmem:[%s5350_s6 + $0x64] ss:$12 sps:$4 sm:$0xff]  }
 0x751   :  { %3395 = vmatprep.mubr.bf16.mxu1 %v1417_v63  ;;  %1567 = vmatprep.subr.bf16.mxu0 %v3636_v49 }
 0x752   :  { %3381 = vmatprep.subr.bf16.mxu1 %v3637_v53  ;;  %1597 = vmatprep.mubr.bf16.mxu0 %v5370_v43 }
 0x754   :  { %1568 = vmatpush1.bf16.msra.mxu0 %v3634_v12  ;;  %3382 = vmatpush3.bf16.msra.mxu1 %v3637_v53 }
 0x755   :  { %1569 = vmatprep.subr.bf16.mxu0 %v3640_v1  ;;  %3383 = vmatprep.subr.bf16.mxu1 %v3641_v57 }
 0x758   :  { %1570 = vmatpush1.bf16.msra.mxu0 %v3638_v3  ;;  %3384 = vmatpush3.bf16.msra.mxu1 %v3641_v57 }
 0x759   :  { %1571 = vmatprep.subr.bf16.mxu0 %v3644_v36  ;;  %3385 = vmatprep.subr.bf16.mxu1 %v3645_v2 }
 0x75c   :  { %1572 = vmatpush1.bf16.msra.mxu0 %v3642_v14  ;;  %3386 = vmatpush3.bf16.msra.mxu1 %v3645_v2  ;;  %v5372_v2 = vld [vmem:[#allocation6_spill] sm:$0xff] }
 0x75d   :  { %1573 = vmatprep.subr.bf16.mxu0 %v3648_v37  ;;  %3387 = vmatprep.subr.bf16.mxu1 %v3649_v58 }
 0x760   :  { %1574 = vmatpush1.bf16.msra.mxu0 %v3646_v41  ;;  %3388 = vmatpush3.bf16.msra.mxu1 %v3649_v58 }
 0x761   :  { %1575 = vmatprep.subr.bf16.mxu0 %v3652_v59  ;;  %3389 = vmatprep.subr.bf16.mxu1 %v3653_v55 }
 0x764   :  { %1576 = vmatpush1.bf16.msra.mxu0 %v3650_v27  ;;  %3390 = vmatpush3.bf16.msra.mxu1 %v3653_v55 }
 0x765   :  { %1577 = vmatprep.subr.bf16.mxu0 %v3656_v5  ;;  %3391 = vmatprep.subr.bf16.mxu1 %v3657_v13 }
 0x768   :  { %1578 = vmatpush1.bf16.msra.mxu0 %v3654_v29  ;;  %3392 = vmatpush3.bf16.msra.mxu1 %v3657_v13 }
 0x769   :  { %1579 = vmatprep.subr.bf16.mxu0 %v3660_v61  ;;  %3393 = vmatprep.subr.bf16.mxu1 %v3661_v30 }
 0x76c   :  { %1580 = vmatpush1.bf16.msra.mxu0 %v3658_v47  ;;  %3394 = vmatpush3.bf16.msra.mxu1 %v3661_v30 }
 0x76d   :  { %3403 = vmatprep.subr.bf16.mxu1 %v5369_v40  ;;  %1864 = vmatprep.subr.bf16.mxu0 %v4664_v48 }
 0x76f   :  { %1598 = vmatmul.mubr.bf16.vlgmr.msra.gmra.mrb[44].mxu0 %v1417_v63  ;;  %3396 = vmatmul.mubr.bf16.vlgmr.msra.gmra.mrb[44].mxu1 %v1418_v31 }
 0x770   :  { %3399 = vmatprep.mubr.bf16.mxu1 %v1419_v46  ;;  %1607 = vmatprep.mubr.bf16.mxu0 %v5370_v43 }
 0x771   :  { %1865 = vmatpush1.bf16.msra.mxu0 %v4669_v50  ;;  %3404 = vmatpush3.bf16.msra.mxu1 %v4741_v52 }
 0x772   :  { %1866 = vmatprep.subr.bf16.mxu0 %v4676_v42  ;;  %3405 = vmatprep.subr.bf16.mxu1 %v5369_v40 }
 0x775   :  { %1867 = vmatpush1.bf16.msra.mxu0 %v4681_v4  ;;  %3406 = vmatpush3.bf16.msra.mxu1 %v4765_v51 }
 0x776   :  { %1868 = vmatprep.subr.bf16.mxu0 %v4688_v32  ;;  %3407 = vmatprep.subr.bf16.mxu1 %v5369_v40 }
 0x777   :  { %1608 = vmatmul.mubr.bf16.gmra.mrb[48].mxu0 %v1418_v31 }
 0x778   :  { %1617 = vmatprep.mubr.bf16.mxu0 %v5370_v43 }
 0x779   :  { %1869 = vmatpush1.bf16.msra.mxu0 %v4693_v16  ;;  %3408 = vmatpush3.bf16.msra.mxu1 %v4774_v8 }
 0x77a   :  { %1870 = vmatprep.subr.bf16.mxu0 %v4700_v33  ;;  %3409 = vmatprep.subr.bf16.mxu1 %v5369_v40 }
 0x77d   :  { %1871 = vmatpush1.bf16.msra.mxu0 %v4705_v54  ;;  %3410 = vmatpush3.bf16.msra.mxu1 %v4781_v9 }
 0x77e   :  { %1872 = vmatprep.subr.bf16.mxu0 %v4712_v34  ;;  %3411 = vmatprep.subr.bf16.mxu1 %v5369_v40 }
 0x77f   :  { %1618 = vmatmul.mubr.bf16.gmra.mrb[52].mxu0 %v1419_v46 }
 0x780   :  { %1627 = vmatprep.mubr.bf16.mxu0 %v5370_v43 }
 0x781   :  { %1873 = vmatpush1.bf16.msra.mxu0 %v4717_v39  ;;  %3412 = vmatpush3.bf16.msra.mxu1 %v4788_v10 }
 0x782   :  { %1874 = vmatprep.subr.bf16.mxu0 %v4724_v19  ;;  %3413 = vmatprep.subr.bf16.mxu1 %v5369_v40 }
 0x785   :  { %1875 = vmatpush1.bf16.msra.mxu0 %v4729_v28  ;;  %3414 = vmatpush3.bf16.msra.mxu1 %v4795_v11 }
 0x786   :  { %1876 = vmatprep.subr.bf16.mxu0 %v4736_v0  ;;  %3415 = vmatprep.subr.bf16.mxu1 %v5369_v40 }
 0x789   :  { %1877 = vmatpush1.bf16.msra.mxu0 %v4746_v62  ;;  %3416 = vmatpush3.bf16.msra.mxu1 %v4802_v15 }
 0x78a   :  { %1878 = vmatprep.subr.bf16.mxu0 %v4754_v17  ;;  %3417 = vmatprep.subr.bf16.mxu1 %v5369_v40 }
 0x78d   :  { %1879 = vmatpush1.bf16.msra.mxu0 %v4760_v35  ;;  %3418 = vmatpush3.bf16.msra.mxu1 %v4809_v18 }
 0x78e   :  { %1972 = vmatprep.subr.bf16.mxu0 %v4664_v48  ;;  %3423 = vmatprep.subr.bf16.mxu1 %v5369_v40 }
 0x822   :  { %v1271_v20 = vpop.f32.mrb[40].mxu0  ;;  %v1312_v21 = vpop.f32.mrb[40].mxu1 }
 0x823   :  { %v1318_v60 = vadd.f32 %v1271_v20, %v4262_v44  ;;  %v1273_v22 = vpop.f32.mrb[41].mxu0  ;;  %v3377_v56 = vpop.f32.mrb[41].mxu1  ;;  %v3878_v44 = vld [vmem:[%s5348_s4] ss:$0 sm:$0xff] }
 0x824   :  { %v1319_v24 = vadd.f32 %v1273_v22, %v5371_v23  ;;  %v1275_v25 = vpop.f32.mrb[42].mxu0  ;;  %v1315_v26 = vpop.f32.mrb[42].mxu1  ;;  %v1332_v57 = vadd.f32 %v3878_v44, %v1312_v21 }
 0x825   :  { %v2959_v6 = vmul.f32 -1.442695, %v1318_v60  ;;  %v1276_v45 = vpop.f32.mrb[43].mxu0  ;;  %v3378_v38 = vpop.f32.mrb[43].mxu1 }
 0x826   :  { %v2960_v49 = vmul.f32 -1.442695, %v1319_v24 }
 0x827   :  { %3772 = vpow2.f32 %v2959_v6 }
 0x828   :  { %3774 = vpow2.f32 %v2960_v49 }
 0x831   :  { %v3773_v53 = vpop.eup %3772 }
 0x832   :  { %v1326_v63 = vadd.f32 1.0, %v3773_v53  ;;  %v3775_v12 = vpop.eup %3774 }
 0x833   :  { %v1327_v1 = vadd.f32 1.0, %v3775_v12  ;;  %v5378_v12 = vld [vmem:[#allocation5_spill] sm:$0xff] }
 0x834   :  { %3776 = vrcp.f32 %v1326_v63 }
 0x835   :  { %3778 = vrcp.f32 %v1327_v1  ;;  %v5379_v1 = vsub.s32 0, %v5378_v12 }
 0x83e   :  { %v3777_v3 = vpop.eup %3776 }
 0x83f   :  { %v1333_v36 = vmul.f32 %v3777_v3, %v1332_v57  ;;  %v3779_v29 = vpop.eup %3778 }
 0x840   :  { %v1336_v31 = vsub.f32 1.0, %v3779_v29  ;;  %v1338_v60 = vmul.f32 %v3779_v29, %v4580_v7 }
 0x841   :  { %v1334_v14 = vadd.f32 %v1333_v36, %v5372_v2  ;;  %v5381_v36 = vsub.s32 1, %v5378_v12 }
 0x842   :  { %v4820_v37 = vpop.f32.mrb[44].mxu0  ;;  %v4822_v58 = vpop.f32.mrb[44].mxu1 }
 0x843   :  { %3780 = vtanh.f32 %v1334_v14  ;;  %v4824_v41 = vpop.f32.mrb[45].mxu0  ;;  %v4826_v59 = vpop.f32.mrb[45].mxu1 }
 0x844   :  { %v4828_v55 = vpop.f32.mrb[46].mxu0  ;;  %v4830_v27 = vpop.f32.mrb[46].mxu1 }
 0x845   :  { %v4832_v5 = vpop.f32.mrb[47].mxu0  ;;  %v4834_v13 = vpop.f32.mrb[47].mxu1 }
 0x84a   :  { %v4836_v61 = vpop.f32.mrb[48].mxu0 }
 0x84b   :  { %v4838_v30 = vpop.f32.mrb[49].mxu0 }
 0x84c   :  { %v4840_v47 = vpop.f32.mrb[50].mxu0 }
 0x84d   :  { %v3781_v46 = vpop.eup %3780  ;;  %v4842_v20 = vpop.f32.mrb[51].mxu0 }
 0x84e   :  { %v1337_v21 = vmul.f32 %v3781_v46, %v1336_v31 }
 0x850   :  { %v1339_v22 = vadd.f32 %v1338_v60, %v1337_v21 }
 0x852   :  { %v4845_v56 = vpop.f32.mrb[52].mxu0  ;;  %1342 = vst [vmem:[%s5351_s12] sm:$0xff] %v1339_v22  ;;  %v1420_v23 = vpack.c.bf16 %v1339_v22, %v4580_v7  ;;  %v1415_v7 = vld [vmem:[%s5352_s7] sm:$0x7] }
 0x853   :  { %v4851_v24 = vpop.f32.mrb[53].mxu0  ;;  %v4914_v44 = vrot.slane %v1415_v7, %v5379_v1  ;;  %v4922_v2 = vrot.slane %v1415_v7, %v5381_v36 }
 0x854   :  { %v4853_v25 = vpop.f32.mrb[54].mxu0  ;;  %1628 = vmatmul.mubr.bf16.gmra.mrb[56].mxu0 %v1420_v23  ;;  %3400 = vmatmul.mubr.bf16.gmra.mrb[48].mxu1 %v1420_v23 }
 0x855   :  { %v4855_v26 = vpop.f32.mrb[55].mxu0  ;;  %1896 = vmatprep.mubr.bf16.mxu0 %v5370_v43  ;;  %3419 = vmatprep.mubr.msk.bf16.mxu1 %vm3905_vm2, %v5369_v40  ;;  %v1600_v14 = vadd.f32 %v4820_v37, %v4914_v44  ;;  %v1602_v29 = vadd.f32 %v4824_v41, %v4922_v2  ;;  %v4931_v41 = vld [vmem:[%s5353_s8] ss:$0 sm:$0xff] }
 0x85c   :  { %1897 = vmatmul.mubr.bf16.vlgmr.msra.gmra.mrb[60].mxu0 %v5370_v43  ;;  %3420 = vmatmul.mubr.bf16.vlgmr.msra.gmra.mrb[52].mxu1 %v5370_v43 }
 0x85d   :  { %1973 = vmatpush1.bf16.msra.mxu0 %v4669_v50  ;;  %3424 = vmatpush3.bf16.msra.mxu1 %v4741_v52 }
 0x85e   :  { %1974 = vmatprep.subr.bf16.mxu0 %v4676_v42  ;;  %3425 = vmatprep.subr.bf16.mxu1 %v5369_v40 }
 0x85f   :  { %2004 = vmatprep.mubr.bf16.mxu0 %v5370_v43  ;;  %3439 = vmatprep.mubr.msk.bf16.mxu1 %vm3905_vm2, %v5369_v40 }
 0x861   :  { %1975 = vmatpush1.bf16.msra.mxu0 %v4681_v4  ;;  %3426 = vmatpush3.bf16.msra.mxu1 %v4765_v51 }
 0x862   :  { %1976 = vmatprep.subr.bf16.mxu0 %v4688_v32  ;;  %3427 = vmatprep.subr.bf16.mxu1 %v5369_v40 }
 0x865   :  { %1977 = vmatpush1.bf16.msra.mxu0 %v4693_v16  ;;  %3428 = vmatpush3.bf16.msra.mxu1 %v4774_v8 }
 0x866   :  { %1978 = vmatprep.subr.bf16.mxu0 %v4700_v33  ;;  %3429 = vmatprep.subr.bf16.mxu1 %v5369_v40 }
 0x869   :  { %1979 = vmatpush1.bf16.msra.mxu0 %v4705_v54  ;;  %3430 = vmatpush3.bf16.msra.mxu1 %v4781_v9 }
 0x86a   :  { %1980 = vmatprep.subr.bf16.mxu0 %v4712_v34  ;;  %3431 = vmatprep.subr.bf16.mxu1 %v5369_v40 }
 0x86d   :  { %1981 = vmatpush1.bf16.msra.mxu0 %v4717_v39  ;;  %3432 = vmatpush3.bf16.msra.mxu1 %v4788_v10 }
 0x86e   :  { %1982 = vmatprep.subr.bf16.mxu0 %v4724_v19  ;;  %3433 = vmatprep.subr.bf16.mxu1 %v5369_v40 }
 0x871   :  { %1983 = vmatpush1.bf16.msra.mxu0 %v4729_v28  ;;  %3434 = vmatpush3.bf16.msra.mxu1 %v4795_v11 }
 0x872   :  { %1984 = vmatprep.subr.bf16.mxu0 %v4736_v0  ;;  %3435 = vmatprep.subr.bf16.mxu1 %v5369_v40 }
 0x875   :  { %1985 = vmatpush1.bf16.msra.mxu0 %v4746_v62  ;;  %3436 = vmatpush3.bf16.msra.mxu1 %v4802_v15 }
 0x876   :  { %1986 = vmatprep.subr.bf16.mxu0 %v4754_v17  ;;  %3437 = vmatprep.subr.bf16.mxu1 %v5369_v40 }
 0x879   :  { %1987 = vmatpush1.bf16.msra.mxu0 %v4760_v35  ;;  %3438 = vmatpush3.bf16.msra.mxu1 %v4809_v18 }
 0x87a   :  { %2081 = vmatprep.subr.bf16.mxu0 %v4664_v48  ;;  %3443 = vmatprep.subr.bf16.mxu1 %v5369_v40 }
 0x927   :  { %v4900_v6 = vpop.f32.mrb[56].mxu0  ;;  %v4902_v45 = vpop.f32.mrb[48].mxu1 }
 0x928   :  { %5373 = vst [vmem:[#allocation7_spill] sm:$0xff] %v4900_v6  ;;  %5374 = vst [vmem:[#allocation6_spill] sm:$0xff] %v4902_v45  ;;  %v4904_v38 = vpop.f32.mrb[57].mxu0  ;;  %v4906_v49 = vpop.f32.mrb[49].mxu1 }
 0x929   :  { %5375 = vst [vmem:[#allocation8_spill] sm:$0xff] %v4904_v38  ;;  %v4908_v53 = vpop.f32.mrb[58].mxu0  ;;  %v4910_v63 = vpop.f32.mrb[50].mxu1 }
 0x92a   :  { %5376 = vst [vmem:[#allocation9_spill] sm:$0xff] %v4908_v53  ;;  %5377 = vst [vmem:[#allocation10_spill] sm:$0xff] %v4910_v63  ;;  %v4916_v57 = vpop.f32.mrb[59].mxu0  ;;  %v4918_v3 = vpop.f32.mrb[51].mxu1 }
 0x92b   :  { %5380 = vst [vmem:[#allocation5_spill] sm:$0xff] %v4916_v57 }
 0x92f   :  { %v1898_v31 = vpop.f32.mrb[60].mxu0  ;;  %v1939_v46 = vpop.f32.mrb[52].mxu1 }
 0x930   :  { %v1945_v21 = vadd.f32 %v1898_v31, %v1600_v14  ;;  %v1900_v60 = vpop.f32.mrb[61].mxu0  ;;  %v3421_v22 = vpop.f32.mrb[53].mxu1  ;;  %v5382_v14 = vsub.s32 2, %v5378_v12  ;;  %v1606_v12 = vadd.f32 %v4832_v5, %v4922_v2 }
 0x931   :  { %v1946_v23 = vadd.f32 %v1900_v60, %v1602_v29  ;;  %v1902_v1 = vpop.f32.mrb[62].mxu0  ;;  %v1942_v63 = vpop.f32.mrb[54].mxu1 }
 0x932   :  { %v3010_v57 = vmul.f32 -1.442695, %v1945_v21  ;;  %v1903_v53 = vpop.f32.mrb[63].mxu0  ;;  %v3422_v45 = vpop.f32.mrb[55].mxu1  ;;  %v4935_v29 = vrot.slane %v1415_v7, %v5382_v14 }
 0x933   :  { %v3011_v36 = vmul.f32 -1.442695, %v1946_v23  ;;  %v1959_v53 = vadd.f32 %v4931_v41, %v1939_v46 }
 0x934   :  { %3782 = vpow2.f32 %v3010_v57  ;;  %v1673_v57 = vadd.f32 %v4826_v59, %v4935_v29  ;;  %v1604_v59 = vadd.f32 %v4828_v55, %v4914_v44 }
 0x935   :  { %3784 = vpow2.f32 %v3011_v36 }
 0x93e   :  { %v3783_v38 = vpop.eup %3782 }
 0x93f   :  { %v1953_v6 = vadd.f32 1.0, %v3783_v38  ;;  %v3785_v37 = vpop.eup %3784 }
 0x940   :  { %v1954_v63 = vadd.f32 1.0, %v3785_v37 }
 0x941   :  { %3786 = vrcp.f32 %v1953_v6 }
 0x942   :  { %3788 = vrcp.f32 %v1954_v63 }
 0x94b   :  { %v3787_v45 = vpop.eup %3786 }
 0x94c   :  { %v1960_v38 = vmul.f32 %v3787_v45, %v1959_v53  ;;  %v3789_v31 = vpop.eup %3788 }
 0x94d   :  { %v1963_v21 = vsub.f32 1.0, %v3789_v31  ;;  %v1965_v23 = vmul.f32 0.0, %v3789_v31 }
 0x94e   :  { %v1961_v6 = vadd.f32 %v1960_v38, %v1673_v57 }
 0x950   :  { %3790 = vtanh.f32 %v1961_v6 }
 0x95a   :  { %v3791_v60 = vpop.eup %3790 }
 0x95b   :  { %v1964_v22 = vmul.f32 %v3791_v60, %v1963_v21 }
 0x95d   :  { %v4940_v1 = vadd.f32 %v1965_v23, %v1964_v22 }
 0x95f   :  { %v1971_v7 = vpack.c.bf16 %v4940_v1, %v4940_v1 }
 0x961   :  { %2005 = vmatmul.mubr.bf16.vlgmr.msra.gmra.mrb[64].mxu0 %v1971_v7  ;;  %3440 = vmatmul.mubr.bf16.vlgmr.msra.gmra.mrb[56].mxu1 %v1971_v7 }
 0x962   :  { %2082 = vmatpush1.bf16.msra.mxu0 %v4669_v50  ;;  %3444 = vmatpush3.bf16.msra.mxu1 %v4741_v52 }
 0x963   :  { %2083 = vmatprep.subr.bf16.mxu0 %v4676_v42  ;;  %3445 = vmatprep.subr.bf16.mxu1 %v5369_v40 }
 0x964   :  { %2113 = vmatprep.mubr.bf16.mxu0 %v5370_v43  ;;  %3459 = vmatprep.mubr.msk.bf16.mxu1 %vm3905_vm2, %v5369_v40 }
 0x966   :  { %2084 = vmatpush1.bf16.msra.mxu0 %v4681_v4  ;;  %3446 = vmatpush3.bf16.msra.mxu1 %v4765_v51 }
 0x967   :  { %2085 = vmatprep.subr.bf16.mxu0 %v4688_v32  ;;  %3447 = vmatprep.subr.bf16.mxu1 %v5369_v40 }
 0x96a   :  { %2086 = vmatpush1.bf16.msra.mxu0 %v4693_v16  ;;  %3448 = vmatpush3.bf16.msra.mxu1 %v4774_v8 }
 0x96b   :  { %2087 = vmatprep.subr.bf16.mxu0 %v4700_v33  ;;  %3449 = vmatprep.subr.bf16.mxu1 %v5369_v40 }
 0x96e   :  { %2088 = vmatpush1.bf16.msra.mxu0 %v4705_v54  ;;  %3450 = vmatpush3.bf16.msra.mxu1 %v4781_v9 }
 0x96f   :  { %2089 = vmatprep.subr.bf16.mxu0 %v4712_v34  ;;  %3451 = vmatprep.subr.bf16.mxu1 %v5369_v40 }
 0x972   :  { %2090 = vmatpush1.bf16.msra.mxu0 %v4717_v39  ;;  %3452 = vmatpush3.bf16.msra.mxu1 %v4788_v10 }
 0x973   :  { %2091 = vmatprep.subr.bf16.mxu0 %v4724_v19  ;;  %3453 = vmatprep.subr.bf16.mxu1 %v5369_v40 }
 0x976   :  { %2092 = vmatpush1.bf16.msra.mxu0 %v4729_v28  ;;  %3454 = vmatpush3.bf16.msra.mxu1 %v4795_v11 }
 0x977   :  { %2093 = vmatprep.subr.bf16.mxu0 %v4736_v0  ;;  %3455 = vmatprep.subr.bf16.mxu1 %v5369_v40 }
 0x97a   :  { %2094 = vmatpush1.bf16.msra.mxu0 %v4746_v62  ;;  %3456 = vmatpush3.bf16.msra.mxu1 %v4802_v15 }
 0x97b   :  { %2095 = vmatprep.subr.bf16.mxu0 %v4754_v17  ;;  %3457 = vmatprep.subr.bf16.mxu1 %v5369_v40 }
 0x97e   :  { %2096 = vmatpush1.bf16.msra.mxu0 %v4760_v35  ;;  %3458 = vmatpush3.bf16.msra.mxu1 %v4809_v18 }
 0x97f   :  { %2190 = vmatprep.subr.bf16.mxu0 %v4664_v48  ;;  %3463 = vmatprep.subr.bf16.mxu1 %v5369_v40 }
 0xa34   :  { %v2006_v46 = vpop.f32.mrb[64].mxu0  ;;  %v2047_v36 = vpop.f32.mrb[56].mxu1 }
 0xa35   :  { %v2053_v37 = vadd.f32 %v2006_v46, %v1604_v59  ;;  %v2008_v14 = vpop.f32.mrb[65].mxu0  ;;  %v3441_v63 = vpop.f32.mrb[57].mxu1  ;;  %v2067_v5 = vadd.f32 %v4931_v41, %v2047_v36  ;;  %v1676_v59 = vadd.f32 %v4834_v13, %v4935_v29  ;;  %v1610_v13 = vadd.f32 %v4836_v61, %v4914_v44 }
 0xa36   :  { %v2054_v53 = vadd.f32 %v2008_v14, %v1606_v12  ;;  %v2010_v45 = vpop.f32.mrb[66].mxu0  ;;  %v2050_v57 = vpop.f32.mrb[58].mxu1  ;;  %v1612_v36 = vadd.f32 %v4838_v30, %v4922_v2 }
 0xa37   :  { %v3012_v38 = vmul.f32 -1.442695, %v2053_v37  ;;  %v2011_v6 = vpop.f32.mrb[67].mxu0  ;;  %v3442_v31 = vpop.f32.mrb[59].mxu1 }
 0xa38   :  { %v3013_v21 = vmul.f32 -1.442695, %v2054_v53 }
 0xa39   :  { %3792 = vpow2.f32 %v3012_v38 }
 0xa3a   :  { %3794 = vpow2.f32 %v3013_v21 }
 0xa43   :  { %v3793_v60 = vpop.eup %3792 }
 0xa44   :  { %v2061_v22 = vadd.f32 1.0, %v3793_v60  ;;  %v3795_v55 = vpop.eup %3794 }
 0xa45   :  { %v2062_v23 = vadd.f32 1.0, %v3795_v55 }
 0xa46   :  { %3796 = vrcp.f32 %v2061_v22 }
 0xa47   :  { %3798 = vrcp.f32 %v2062_v23 }
 0xa50   :  { %v3797_v7 = vpop.eup %3796 }
 0xa51   :  { %v2068_v12 = vmul.f32 %v3797_v7, %v2067_v5  ;;  %v3799_v37 = vpop.eup %3798 }
 0xa52   :  { %v2071_v14 = vsub.f32 1.0, %v3799_v37  ;;  %v2073_v45 = vmul.f32 %v3799_v37, %v4940_v1 }
 0xa53   :  { %v2069_v46 = vadd.f32 %v2068_v12, %v1676_v59 }
 0xa55   :  { %3800 = vtanh.f32 %v2069_v46 }
 0xa5f   :  { %v3801_v63 = vpop.eup %3800 }
 0xa60   :  { %v2072_v53 = vmul.f32 %v3801_v63, %v2071_v14 }
 0xa62   :  { %v4987_v57 = vadd.f32 %v2073_v45, %v2072_v53  ;;  %v1681_v45 = vadd.f32 %v4822_v58, %v4935_v29  ;;  %v1614_v58 = vadd.f32 %v4840_v47, %v4914_v44 }
 0xa64   :  { %v2080_v38 = vpack.c.bf16 %v4987_v57, %v4987_v57 }
 0xa66   :  { %2114 = vmatmul.mubr.bf16.vlgmr.msra.gmra.mrb[68].mxu0 %v2080_v38  ;;  %3460 = vmatmul.mubr.bf16.vlgmr.msra.gmra.mrb[60].mxu1 %v2080_v38 }
 0xa67   :  { %2191 = vmatpush1.bf16.msra.mxu0 %v4669_v50  ;;  %3464 = vmatpush3.bf16.msra.mxu1 %v4741_v52 }
 0xa68   :  { %2192 = vmatprep.subr.bf16.mxu0 %v4676_v42  ;;  %3465 = vmatprep.subr.bf16.mxu1 %v5369_v40 }
 0xa69   :  { %2222 = vmatprep.mubr.bf16.mxu0 %v5370_v43  ;;  %3479 = vmatprep.mubr.msk.bf16.mxu1 %vm3905_vm2, %v5369_v40 }
 0xa6b   :  { %2193 = vmatpush1.bf16.msra.mxu0 %v4681_v4  ;;  %3466 = vmatpush3.bf16.msra.mxu1 %v4765_v51 }
 0xa6c   :  { %2194 = vmatprep.subr.bf16.mxu0 %v4688_v32  ;;  %3467 = vmatprep.subr.bf16.mxu1 %v5369_v40 }
 0xa6f   :  { %2195 = vmatpush1.bf16.msra.mxu0 %v4693_v16  ;;  %3468 = vmatpush3.bf16.msra.mxu1 %v4774_v8 }
 0xa70   :  { %2196 = vmatprep.subr.bf16.mxu0 %v4700_v33  ;;  %3469 = vmatprep.subr.bf16.mxu1 %v5369_v40 }
 0xa73   :  { %2197 = vmatpush1.bf16.msra.mxu0 %v4705_v54  ;;  %3470 = vmatpush3.bf16.msra.mxu1 %v4781_v9 }
 0xa74   :  { %2198 = vmatprep.subr.bf16.mxu0 %v4712_v34  ;;  %3471 = vmatprep.subr.bf16.mxu1 %v5369_v40 }
 0xa77   :  { %2199 = vmatpush1.bf16.msra.mxu0 %v4717_v39  ;;  %3472 = vmatpush3.bf16.msra.mxu1 %v4788_v10 }
 0xa78   :  { %2200 = vmatprep.subr.bf16.mxu0 %v4724_v19  ;;  %3473 = vmatprep.subr.bf16.mxu1 %v5369_v40 }
 0xa7b   :  { %2201 = vmatpush1.bf16.msra.mxu0 %v4729_v28  ;;  %3474 = vmatpush3.bf16.msra.mxu1 %v4795_v11 }
 0xa7c   :  { %2202 = vmatprep.subr.bf16.mxu0 %v4736_v0  ;;  %3475 = vmatprep.subr.bf16.mxu1 %v5369_v40 }
 0xa7f   :  { %2203 = vmatpush1.bf16.msra.mxu0 %v4746_v62  ;;  %3476 = vmatpush3.bf16.msra.mxu1 %v4802_v15 }
 0xa80   :  { %2204 = vmatprep.subr.bf16.mxu0 %v4754_v17  ;;  %3477 = vmatprep.subr.bf16.mxu1 %v5369_v40 }
 0xa83   :  { %2205 = vmatpush1.bf16.msra.mxu0 %v4760_v35  ;;  %3478 = vmatpush3.bf16.msra.mxu1 %v4809_v18 }
 0xa84   :  { %2299 = vmatprep.subr.bf16.mxu0 %v4664_v48  ;;  %3483 = vmatprep.subr.bf16.mxu1 %v5369_v40 }
 0xb39   :  { %v2115_v6 = vpop.f32.mrb[68].mxu0  ;;  %v2156_v31 = vpop.f32.mrb[60].mxu1 }
 0xb3a   :  { %v2162_v21 = vadd.f32 %v2115_v6, %v1610_v13  ;;  %v2117_v60 = vpop.f32.mrb[69].mxu0  ;;  %v3461_v22 = vpop.f32.mrb[61].mxu1  ;;  %v2176_v30 = vadd.f32 %v4931_v41, %v2156_v31  ;;  %v1616_v31 = vadd.f32 %v4842_v20, %v4922_v2 }
 0xb3b   :  { %v2163_v55 = vadd.f32 %v2117_v60, %v1612_v36  ;;  %v2119_v23 = vpop.f32.mrb[70].mxu0  ;;  %v2159_v5 = vpop.f32.mrb[62].mxu1 }
 0xb3c   :  { %v3014_v7 = vmul.f32 -1.442695, %v2162_v21  ;;  %v2120_v59 = vpop.f32.mrb[71].mxu0  ;;  %v3462_v12 = vpop.f32.mrb[63].mxu1 }
 0xb3d   :  { %v3015_v46 = vmul.f32 -1.442695, %v2163_v55 }
 0xb3e   :  { %3802 = vpow2.f32 %v3014_v7 }
 0xb3f   :  { %3804 = vpow2.f32 %v3015_v46 }
 0xb48   :  { %v3803_v37 = vpop.eup %3802 }
 0xb49   :  { %v2170_v14 = vadd.f32 1.0, %v3803_v37  ;;  %v3805_v61 = vpop.eup %3804 }
 0xb4a   :  { %v2171_v63 = vadd.f32 1.0, %v3805_v61 }
 0xb4b   :  { %3806 = vrcp.f32 %v2170_v14 }
 0xb4c   :  { %3808 = vrcp.f32 %v2171_v63 }
 0xb55   :  { %v3807_v53 = vpop.eup %3806 }
 0xb56   :  { %v2177_v38 = vmul.f32 %v3807_v53, %v2176_v30  ;;  %v3809_v36 = vpop.eup %3808 }
 0xb57   :  { %v2180_v6 = vsub.f32 1.0, %v3809_v36  ;;  %v2182_v22 = vmul.f32 %v3809_v36, %v4987_v57 }
 0xb58   :  { %v2178_v13 = vadd.f32 %v2177_v38, %v1681_v45 }
 0xb5a   :  { %3810 = vtanh.f32 %v2178_v13 }
 0xb64   :  { %v3811_v21 = vpop.eup %3810 }
 0xb65   :  { %v2181_v60 = vmul.f32 %v3811_v21, %v2180_v6  ;;  %v1684_v21 = vadd.f32 %v4830_v27, %v4935_v29  ;;  %v1622_v27 = vadd.f32 %v4851_v24, %v4922_v2 }
 0xb67   :  { %v5034_v55 = vadd.f32 %v2182_v22, %v2181_v60 }
 0xb69   :  { %v2189_v23 = vpack.c.bf16 %v5034_v55, %v5034_v55 }
 0xb6b   :  { %2223 = vmatmul.mubr.bf16.vlgmr.msra.gmra.mrb[72].mxu0 %v2189_v23  ;;  %3480 = vmatmul.mubr.bf16.vlgmr.msra.gmra.mrb[64].mxu1 %v2189_v23 }
 0xb6c   :  { %2300 = vmatpush1.bf16.msra.mxu0 %v4669_v50  ;;  %3484 = vmatpush3.bf16.msra.mxu1 %v4741_v52 }
 0xb6d   :  { %2301 = vmatprep.subr.bf16.mxu0 %v4676_v42  ;;  %3485 = vmatprep.subr.bf16.mxu1 %v5369_v40 }
 0xb6e   :  { %2331 = vmatprep.mubr.bf16.mxu0 %v5370_v43  ;;  %3499 = vmatprep.mubr.msk.bf16.mxu1 %vm3905_vm2, %v5369_v40 }
 0xb70   :  { %2302 = vmatpush1.bf16.msra.mxu0 %v4681_v4  ;;  %3486 = vmatpush3.bf16.msra.mxu1 %v4765_v51 }
 0xb71   :  { %2303 = vmatprep.subr.bf16.mxu0 %v4688_v32  ;;  %3487 = vmatprep.subr.bf16.mxu1 %v5369_v40 }
 0xb74   :  { %2304 = vmatpush1.bf16.msra.mxu0 %v4693_v16  ;;  %3488 = vmatpush3.bf16.msra.mxu1 %v4774_v8 }
 0xb75   :  { %2305 = vmatprep.subr.bf16.mxu0 %v4700_v33  ;;  %3489 = vmatprep.subr.bf16.mxu1 %v5369_v40 }
 0xb78   :  { %2306 = vmatpush1.bf16.msra.mxu0 %v4705_v54  ;;  %3490 = vmatpush3.bf16.msra.mxu1 %v4781_v9 }
 0xb79   :  { %2307 = vmatprep.subr.bf16.mxu0 %v4712_v34  ;;  %3491 = vmatprep.subr.bf16.mxu1 %v5369_v40 }
 0xb7c   :  { %2308 = vmatpush1.bf16.msra.mxu0 %v4717_v39  ;;  %3492 = vmatpush3.bf16.msra.mxu1 %v4788_v10 }
 0xb7d   :  { %2309 = vmatprep.subr.bf16.mxu0 %v4724_v19  ;;  %3493 = vmatprep.subr.bf16.mxu1 %v5369_v40 }
 0xb80   :  { %2310 = vmatpush1.bf16.msra.mxu0 %v4729_v28  ;;  %3494 = vmatpush3.bf16.msra.mxu1 %v4795_v11 }
 0xb81   :  { %2311 = vmatprep.subr.bf16.mxu0 %v4736_v0  ;;  %3495 = vmatprep.subr.bf16.mxu1 %v5369_v40 }
 0xb84   :  { %2312 = vmatpush1.bf16.msra.mxu0 %v4746_v62  ;;  %3496 = vmatpush3.bf16.msra.mxu1 %v4802_v15 }
 0xb85   :  { %2313 = vmatprep.subr.bf16.mxu0 %v4754_v17  ;;  %3497 = vmatprep.subr.bf16.mxu1 %v5369_v40 }
 0xb88   :  { %2314 = vmatpush1.bf16.msra.mxu0 %v4760_v35  ;;  %3498 = vmatpush3.bf16.msra.mxu1 %v4809_v18 }
 0xb89   :  { %2408 = vmatprep.subr.bf16.mxu0 %v4664_v48  ;;  %3503 = vmatprep.subr.bf16.mxu1 %v5369_v40 }
 0xc3e   :  { %v2224_v5 = vpop.f32.mrb[72].mxu0  ;;  %v2265_v7 = vpop.f32.mrb[64].mxu1 }
 0xc3f   :  { %v2271_v59 = vadd.f32 %v2224_v5, %v1614_v58  ;;  %v2226_v12 = vpop.f32.mrb[73].mxu0  ;;  %v3481_v46 = vpop.f32.mrb[65].mxu1  ;;  %v2285_v20 = vadd.f32 %v4931_v41, %v2265_v7 }
 0xc40   :  { %v2272_v37 = vadd.f32 %v2226_v12, %v1616_v31  ;;  %v2228_v14 = vpop.f32.mrb[74].mxu0  ;;  %v2268_v61 = vpop.f32.mrb[66].mxu1 }
 0xc41   :  { %v3016_v63 = vmul.f32 -1.442695, %v2271_v59  ;;  %v2229_v30 = vpop.f32.mrb[75].mxu0  ;;  %v3482_v53 = vpop.f32.mrb[67].mxu1 }
 0xc42   :  { %v3017_v45 = vmul.f32 -1.442695, %v2272_v37 }
 0xc43   :  { %3812 = vpow2.f32 %v3016_v63 }
 0xc44   :  { %3814 = vpow2.f32 %v3017_v45 }
 0xc4d   :  { %v3813_v38 = vpop.eup %3812 }
 0xc4e   :  { %v2279_v13 = vadd.f32 1.0, %v3813_v38  ;;  %v3815_v47 = vpop.eup %3814 }
 0xc4f   :  { %v2280_v36 = vadd.f32 1.0, %v3815_v47 }
 0xc50   :  { %3816 = vrcp.f32 %v2279_v13 }
 0xc51   :  { %3818 = vrcp.f32 %v2280_v36 }
 0xc5a   :  { %v3817_v6 = vpop.eup %3816 }
 0xc5b   :  { %v2286_v60 = vmul.f32 %v3817_v6, %v2285_v20  ;;  %v3819_v23 = vpop.eup %3818 }
 0xc5c   :  { %v2289_v58 = vsub.f32 1.0, %v3819_v23  ;;  %v2291_v59 = vmul.f32 %v3819_v23, %v5034_v55 }
 0xc5d   :  { %v2287_v22 = vadd.f32 %v2286_v60, %v1684_v21  ;;  %v1689_v60 = vadd.f32 %v4906_v49, %v4935_v29  ;;  %v5135_v49 = vld [vmem:[%s5350_s6] ss:$12 sps:$4 sm:$0xff]  }
 0xc5f   :  { %3820 = vtanh.f32 %v2287_v22 }
 0xc69   :  { %v3821_v31 = vpop.eup %3820 }
 0xc6a   :  { %v2290_v5 = vmul.f32 %v3821_v31, %v2289_v58 }
 0xc6c   :  { %v5081_v12 = vadd.f32 %v2291_v59, %v2290_v5 }
 0xc6e   :  { %v2298_v46 = vpack.c.bf16 %v5081_v12, %v5081_v12 }
 0xc70   :  { %2332 = vmatmul.mubr.bf16.vlgmr.msra.gmra.mrb[76].mxu0 %v2298_v46  ;;  %3500 = vmatmul.mubr.bf16.vlgmr.msra.gmra.mrb[68].mxu1 %v2298_v46 }
 0xc71   :  { %2409 = vmatpush1.bf16.msra.mxu0 %v4669_v50  ;;  %3504 = vmatpush3.bf16.msra.mxu1 %v4741_v52  ;;  %v1620_v50 = vadd.f32 %v4845_v56, %v4914_v44 }
 0xc72   :  { %2410 = vmatprep.subr.bf16.mxu0 %v4676_v42  ;;  %3505 = vmatprep.subr.bf16.mxu1 %v5369_v40 }
 0xc73   :  { %2440 = vmatprep.mubr.bf16.mxu0 %v5370_v43  ;;  %3519 = vmatprep.mubr.msk.bf16.mxu1 %vm3905_vm2, %v5369_v40 }
 0xc75   :  { %2411 = vmatpush1.bf16.msra.mxu0 %v4681_v4  ;;  %3506 = vmatpush3.bf16.msra.mxu1 %v4765_v51 }
 0xc76   :  { %2412 = vmatprep.subr.bf16.mxu0 %v4688_v32  ;;  %3507 = vmatprep.subr.bf16.mxu1 %v5369_v40 }
 0xc79   :  { %2413 = vmatpush1.bf16.msra.mxu0 %v4693_v16  ;;  %3508 = vmatpush3.bf16.msra.mxu1 %v4774_v8 }
 0xc7a   :  { %2414 = vmatprep.subr.bf16.mxu0 %v4700_v33  ;;  %3509 = vmatprep.subr.bf16.mxu1 %v5369_v40 }
 0xc7d   :  { %2415 = vmatpush1.bf16.msra.mxu0 %v4705_v54  ;;  %3510 = vmatpush3.bf16.msra.mxu1 %v4781_v9 }
 0xc7e   :  { %2416 = vmatprep.subr.bf16.mxu0 %v4712_v34  ;;  %3511 = vmatprep.subr.bf16.mxu1 %v5369_v40 }
 0xc81   :  { %2417 = vmatpush1.bf16.msra.mxu0 %v4717_v39  ;;  %3512 = vmatpush3.bf16.msra.mxu1 %v4788_v10 }
 0xc82   :  { %2418 = vmatprep.subr.bf16.mxu0 %v4724_v19  ;;  %3513 = vmatprep.subr.bf16.mxu1 %v5369_v40 }
 0xc85   :  { %2419 = vmatpush1.bf16.msra.mxu0 %v4729_v28  ;;  %3514 = vmatpush3.bf16.msra.mxu1 %v4795_v11 }
 0xc86   :  { %2420 = vmatprep.subr.bf16.mxu0 %v4736_v0  ;;  %3515 = vmatprep.subr.bf16.mxu1 %v5369_v40 }
 0xc89   :  { %2421 = vmatpush1.bf16.msra.mxu0 %v4746_v62  ;;  %3516 = vmatpush3.bf16.msra.mxu1 %v4802_v15 }
 0xc8a   :  { %2422 = vmatprep.subr.bf16.mxu0 %v4754_v17  ;;  %3517 = vmatprep.subr.bf16.mxu1 %v5369_v40 }
 0xc8d   :  { %2423 = vmatpush1.bf16.msra.mxu0 %v4760_v35  ;;  %3518 = vmatpush3.bf16.msra.mxu1 %v4809_v18 }
 0xc8e   :  { %2517 = vmatprep.subr.bf16.mxu0 %v4664_v48  ;;  %3523 = vmatprep.subr.bf16.mxu1 %v5369_v40 }
 0xd43   :  { %v2333_v7 = vpop.f32.mrb[76].mxu0  ;;  %v2374_v37 = vpop.f32.mrb[68].mxu1 }
 0xd44   :  { %v2380_v14 = vadd.f32 %v2333_v7, %v1620_v50  ;;  %v2335_v61 = vpop.f32.mrb[77].mxu0  ;;  %v3501_v63 = vpop.f32.mrb[69].mxu1  ;;  %v2394_v24 = vadd.f32 %v4931_v41, %v2374_v37 }
 0xd45   :  { %v2381_v30 = vadd.f32 %v2335_v61, %v1622_v27  ;;  %v2337_v53 = vpop.f32.mrb[78].mxu0  ;;  %v2377_v45 = vpop.f32.mrb[70].mxu1 }
 0xd46   :  { %v3018_v38 = vmul.f32 -1.442695, %v2380_v14  ;;  %v2338_v13 = vpop.f32.mrb[79].mxu0  ;;  %v3502_v47 = vpop.f32.mrb[71].mxu1  ;;  %v3882_v45 = vld [vmem:[%s5350_s6 + $0x1c] ss:$12 sps:$4 sm:$0xff]  }
 0xd47   :  { %v3019_v48 = vmul.f32 -1.442695, %v2381_v30  ;;  %v3884_v13 = vld [vmem:[%s5350_s6 + $0x20] ss:$12 sps:$4 sm:$0xff]  }
 0xd48   :  { %3822 = vpow2.f32 %v3018_v38  ;;  %v3883_v38 = vld [vmem:[%s5350_s6 + $0x18] ss:$12 sps:$4 sm:$0xff]   ;;  %v3885_v47 = vld [vmem:[%s5350_s6 + $0x34] ss:$12 sps:$4 sm:$0xff]  }
 0xd49   :  { %3824 = vpow2.f32 %v3019_v48  ;;  %v3887_v48 = vld [vmem:[%s5350_s6 + $0x38] ss:$12 sps:$4 sm:$0xff]  }
 0xd52   :  { %v3823_v36 = vpop.eup %3822 }
 0xd53   :  { %v2388_v20 = vadd.f32 1.0, %v3823_v36  ;;  %v3825_v56 = vpop.eup %3824  ;;  %v3888_v36 = vld [vmem:[%s5350_s6 + $0x4c] ss:$12 sps:$4 sm:$0xff]  }
 0xd54   :  { %v2389_v6 = vadd.f32 1.0, %v3825_v56  ;;  %v3890_v56 = vld [vmem:[%s5350_s6 + $0x50] ss:$12 sps:$4 sm:$0xff]  }
 0xd55   :  { %3826 = vrcp.f32 %v2388_v20  ;;  %v3889_v20 = vld [vmem:[%s5350_s6 + $0x48] ss:$12 sps:$4 sm:$0xff]  }
 0xd56   :  { %3828 = vrcp.f32 %v2389_v6  ;;  %v3891_v6 = vld [vmem:[%s5350_s6 + $0x64] ss:$12 sps:$4 sm:$0xff]  }
 0xd5f   :  { %v3827_v21 = vpop.eup %3826 }
 0xd60   :  { %v2395_v22 = vmul.f32 %v3827_v21, %v2394_v24  ;;  %v3829_v58 = vpop.eup %3828  ;;  %v3892_v24 = vld [vmem:[%s5350_s6 + $0x60] ss:$12 sps:$4 sm:$0xff]   ;;  %v3893_v21 = vld [vmem:[%s5350_s6 + $0x68] ss:$12 sps:$4 sm:$0xff]  }
 0xd61   :  { %v2398_v31 = vsub.f32 1.0, %v3829_v58  ;;  %v2400_v46 = vmul.f32 %v3829_v58, %v5081_v12  ;;  %v3897_v58 = vld [vmem:[%s5350_s6 + $0x94] ss:$12 sps:$4 sm:$0xff]  }
 0xd62   :  { %v2396_v23 = vadd.f32 %v2395_v22, %v1689_v60  ;;  %v3894_v60 = vld [vmem:[%s5350_s6 + $0x7c] ss:$12 sps:$4 sm:$0xff]   ;;  %v3895_v22 = vld [vmem:[%s5350_s6 + $0x78] ss:$12 sps:$4 sm:$0xff]  }
 0xd64   :  { %3830 = vtanh.f32 %v2396_v23  ;;  %v3896_v23 = vld [vmem:[%s5350_s6 + $0x80] ss:$12 sps:$4 sm:$0xff]  }
 0xd6e   :  { %v3831_v5 = vpop.eup %3830 }
 0xd6f   :  { %v2399_v59 = vmul.f32 %v3831_v5, %v2398_v31  ;;  %v3898_v31 = vld [vmem:[%s5350_s6 + $0x90] ss:$12 sps:$4 sm:$0xff]   ;;  %v3899_v5 = vld [vmem:[%s5350_s6 + $0x98] ss:$12 sps:$4 sm:$0xff]  }
 0xd71   :  { %v5128_v50 = vadd.f32 %v2400_v46, %v2399_v59  ;;  %v3900_v59 = vld [vmem:[%s5350_s6 + $0xac] ss:$12 sps:$4 sm:$0xff]   ;;  %v3901_v46 = vld [vmem:[%s5350_s6 + $0xa8] ss:$12 sps:$4 sm:$0xff]  }
 0xd73   :  { %v2407_v27 = vpack.c.bf16 %v5128_v50, %v5128_v50 }
 0xd75   :  { %2441 = vmatmul.mubr.bf16.vlgmr.msra.gmra.mrb[80].mxu0 %v2407_v27  ;;  %3520 = vmatmul.mubr.bf16.vlgmr.msra.gmra.mrb[72].mxu1 %v2407_v27  ;;  %v3902_v27 = vld [vmem:[%s5350_s6 + $0xb0] ss:$12 sps:$4 sm:$0xff]  }
 0xd76   :  { %2518 = vmatpush1.bf16.msra.mxu0 %v5135_v49  ;;  %3524 = vmatpush3.bf16.msra.mxu1 %v4741_v52 }
 0xd77   :  { %2519 = vmatprep.subr.bf16.mxu0 %v4676_v42  ;;  %3525 = vmatprep.subr.bf16.mxu1 %v5369_v40  ;;  %v3880_v42 = vld [vmem:[%s5350_s6 + $0x4] ss:$12 sps:$4 sm:$0xff]  }
 0xd78   :  { %2549 = vmatprep.mubr.bf16.mxu0 %v5370_v43  ;;  %3539 = vmatprep.mubr.msk.bf16.mxu1 %vm3905_vm2, %v5369_v40 }
 0xd7a   :  { %2520 = vmatpush1.bf16.msra.mxu0 %v4681_v4  ;;  %3526 = vmatpush3.bf16.msra.mxu1 %v4765_v51  ;;  %v1624_v4 = vadd.f32 %v4853_v25, %v4914_v44 }
 0xd7b   :  { %2521 = vmatprep.subr.bf16.mxu0 %v4688_v32  ;;  %3527 = vmatprep.subr.bf16.mxu1 %v5369_v40  ;;  %v1626_v32 = vadd.f32 %v4855_v26, %v4922_v2 }
 0xd7e   :  { %2522 = vmatpush1.bf16.msra.mxu0 %v4693_v16  ;;  %3528 = vmatpush3.bf16.msra.mxu1 %v4774_v8 }
 0xd7f   :  { %2523 = vmatprep.subr.bf16.mxu0 %v4700_v33  ;;  %3529 = vmatprep.subr.bf16.mxu1 %v5369_v40 }
 0xd82   :  { %2524 = vmatpush1.bf16.msra.mxu0 %v4705_v54  ;;  %3530 = vmatpush3.bf16.msra.mxu1 %v4781_v9 }
 0xd83   :  { %2525 = vmatprep.subr.bf16.mxu0 %v4712_v34  ;;  %3531 = vmatprep.subr.bf16.mxu1 %v5369_v40 }
 0xd86   :  { %2526 = vmatpush1.bf16.msra.mxu0 %v4717_v39  ;;  %3532 = vmatpush3.bf16.msra.mxu1 %v4788_v10 }
 0xd87   :  { %2527 = vmatprep.subr.bf16.mxu0 %v4724_v19  ;;  %3533 = vmatprep.subr.bf16.mxu1 %v5369_v40 }
 0xd8a   :  { %2528 = vmatpush1.bf16.msra.mxu0 %v4729_v28  ;;  %3534 = vmatpush3.bf16.msra.mxu1 %v4795_v11 }
 0xd8b   :  { %2529 = vmatprep.subr.bf16.mxu0 %v4736_v0  ;;  %3535 = vmatprep.subr.bf16.mxu1 %v5369_v40 }
 0xd8e   :  { %2530 = vmatpush1.bf16.msra.mxu0 %v4746_v62  ;;  %3536 = vmatpush3.bf16.msra.mxu1 %v4802_v15 }
 0xd8f   :  { %2531 = vmatprep.subr.bf16.mxu0 %v4754_v17  ;;  %3537 = vmatprep.subr.bf16.mxu1 %v5369_v40 }
 0xd92   :  { %2532 = vmatpush1.bf16.msra.mxu0 %v4760_v35  ;;  %3538 = vmatpush3.bf16.msra.mxu1 %v4809_v18  ;;  %v1692_v18 = vadd.f32 %v4918_v3, %v4935_v29  ;;  %v3881_v3 = vld [vmem:[%s5350_s6 + $0x8] ss:$12 sps:$4 sm:$0xff]  }
 0xd93   :  { %2626 = vmatprep.subr.bf16.mxu0 %v3880_v42  ;;  %3543 = vmatprep.subr.bf16.mxu1 %v5369_v40  ;;  %v5383_v42 = vld [vmem:[#allocation7_spill] sm:$0xff] }
 0xe48   :  { %v2442_v16 = vpop.f32.mrb[80].mxu0  ;;  %v2483_v33 = vpop.f32.mrb[72].mxu1 }
 0xe49   :  { %v2489_v54 = vadd.f32 %v2442_v16, %v1624_v4  ;;  %v2444_v34 = vpop.f32.mrb[81].mxu0  ;;  %v3521_v39 = vpop.f32.mrb[73].mxu1  ;;  %v2503_v11 = vadd.f32 %v4931_v41, %v2483_v33  ;;  %v1630_v4 = vadd.f32 %v5383_v42, %v4914_v44 }
 0xe4a   :  { %v2490_v19 = vadd.f32 %v2444_v34, %v1626_v32  ;;  %v2446_v28 = vpop.f32.mrb[82].mxu0  ;;  %v2486_v0 = vpop.f32.mrb[74].mxu1 }
 0xe4b   :  { %v3020_v52 = vmul.f32 -1.442695, %v2489_v54  ;;  %v2447_v62 = vpop.f32.mrb[83].mxu0  ;;  %v3522_v17 = vpop.f32.mrb[75].mxu1 }
 0xe4c   :  { %v3021_v35 = vmul.f32 -1.442695, %v2490_v19 }
 0xe4d   :  { %3832 = vpow2.f32 %v3020_v52 }
 0xe4e   :  { %3834 = vpow2.f32 %v3021_v35 }
 0xe57   :  { %v3833_v51 = vpop.eup %3832 }
 0xe58   :  { %v2497_v8 = vadd.f32 1.0, %v3833_v51  ;;  %v3835_v9 = vpop.eup %3834 }
 0xe59   :  { %v2498_v10 = vadd.f32 1.0, %v3835_v9 }
 0xe5a   :  { %3836 = vrcp.f32 %v2497_v8 }
 0xe5b   :  { %3838 = vrcp.f32 %v2498_v10 }
 0xe64   :  { %v3837_v15 = vpop.eup %3836 }
 0xe65   :  { %v2504_v25 = vmul.f32 %v3837_v15, %v2503_v11  ;;  %v3839_v7 = vpop.eup %3838 }
 0xe66   :  { %v2507_v37 = vsub.f32 1.0, %v3839_v7  ;;  %v2509_v63 = vmul.f32 %v3839_v7, %v5128_v50 }
 0xe67   :  { %v2505_v26 = vadd.f32 %v2504_v25, %v1692_v18  ;;  %v5385_v18 = vld [vmem:[#allocation6_spill] sm:$0xff] }
 0xe68   :  { %v1697_v25 = vadd.f32 %v5385_v18, %v4935_v29 }
 0xe69   :  { %3840 = vtanh.f32 %v2505_v26 }
 0xe73   :  { %v3841_v14 = vpop.eup %3840 }
 0xe74   :  { %v2508_v61 = vmul.f32 %v3841_v14, %v2507_v37 }
 0xe76   :  { %v5182_v30 = vadd.f32 %v2509_v63, %v2508_v61 }
 0xe78   :  { %v2516_v53 = vpack.c.bf16 %v5182_v30, %v5182_v30 }
 0xe7a   :  { %2550 = vmatmul.mubr.bf16.vlgmr.msra.gmra.mrb[84].mxu0 %v2516_v53  ;;  %3540 = vmatmul.mubr.bf16.vlgmr.msra.gmra.mrb[76].mxu1 %v2516_v53 }
 0xe7b   :  { %2627 = vmatpush1.bf16.msra.mxu0 %v5135_v49  ;;  %3544 = vmatpush3.bf16.msra.mxu1 %v3881_v3  ;;  %v3694_v49 = vld [vmem:[%s5354_s9] sm:$0xff]  }
 0xe7c   :  { %2628 = vmatprep.subr.bf16.mxu0 %v3882_v45  ;;  %3545 = vmatprep.subr.bf16.mxu1 %v5369_v40 }
 0xe7d   :  { %2658 = vmatprep.mubr.bf16.mxu0 %v5370_v43  ;;  %3559 = vmatprep.mubr.msk.bf16.mxu1 %vm3905_vm2, %v5369_v40  ;;  %v3886_v43 = vld [vmem:[%s5350_s6 + $0x30] ss:$12 sps:$4 sm:$0xff]  }
 0xe7f   :  { %2629 = vmatpush1.bf16.msra.mxu0 %v3883_v38  ;;  %3546 = vmatpush3.bf16.msra.mxu1 %v3884_v13  ;;  %v3695_v38 = vld [vmem:[%s5354_s9 + $0x8] sm:$0xff]   ;;  %v2741_v13 = vpack.c.bf16 %v4987_v57, %v4940_v1  ;;  %v3698_v1 = vld [vmem:[%s5354_s9 + $0x20] sm:$0xff]  }
 0xe80   :  { %2630 = vmatprep.subr.bf16.mxu0 %v3885_v47  ;;  %3547 = vmatprep.subr.bf16.mxu1 %v5369_v40  ;;  %v3696_v47 = vld [vmem:[%s5354_s9 + $0x10] sm:$0xff]   ;;  %v3699_v57 = vld [vmem:[%s5354_s9 + $0x28] sm:$0xff]  }
 0xe83   :  { %2631 = vmatpush1.bf16.msra.mxu0 %v3886_v43  ;;  %3548 = vmatpush3.bf16.msra.mxu1 %v3887_v48  ;;  %v3697_v43 = vld [vmem:[%s5354_s9 + $0x18] sm:$0xff]   ;;  %v3700_v48 = vld [vmem:[%s5354_s9 + $0x30] sm:$0xff]  }
 0xe84   :  { %2632 = vmatprep.subr.bf16.mxu0 %v3888_v36  ;;  %3549 = vmatprep.subr.bf16.mxu1 %v5369_v40  ;;  %v3701_v36 = vld [vmem:[%s5354_s9 + $0x38] sm:$0xff]  }
 0xe87   :  { %2633 = vmatpush1.bf16.msra.mxu0 %v3889_v20  ;;  %3550 = vmatpush3.bf16.msra.mxu1 %v3890_v56  ;;  %v2742_v20 = vpack.c.bf16 %v5081_v12, %v5034_v55  ;;  %v2743_v56 = vpack.c.bf16 %v5182_v30, %v5128_v50 }
 0xe88   :  { %2634 = vmatprep.subr.bf16.mxu0 %v3891_v6  ;;  %3551 = vmatprep.subr.bf16.mxu1 %v5369_v40  ;;  %v5386_v6 = vld [vmem:[#allocation9_spill] sm:$0xff] }
 0xe8b   :  { %2635 = vmatpush1.bf16.msra.mxu0 %v3892_v24  ;;  %3552 = vmatpush3.bf16.msra.mxu1 %v3893_v21  ;;  %v1634_v24 = vadd.f32 %v5386_v6, %v4914_v44  ;;  %v5387_v21 = vld [vmem:[#allocation5_spill] sm:$0xff] }
 0xe8c   :  { %2636 = vmatprep.subr.bf16.mxu0 %v3894_v60  ;;  %3553 = vmatprep.subr.bf16.mxu1 %v5369_v40  ;;  %v1636_v60 = vadd.f32 %v5387_v21, %v4922_v2 }
 0xe8f   :  { %2637 = vmatpush1.bf16.msra.mxu0 %v3895_v22  ;;  %3554 = vmatpush3.bf16.msra.mxu1 %v3896_v23 }
 0xe90   :  { %2638 = vmatprep.subr.bf16.mxu0 %v3897_v58  ;;  %3555 = vmatprep.subr.bf16.mxu1 %v5369_v40 }
 0xe93   :  { %2639 = vmatpush1.bf16.msra.mxu0 %v3898_v31  ;;  %3556 = vmatpush3.bf16.msra.mxu1 %v3899_v5 }
 0xe94   :  { %2640 = vmatprep.subr.bf16.mxu0 %v3900_v59  ;;  %3557 = vmatprep.subr.bf16.mxu1 %v5369_v40  ;;  %v5384_v40 = vld [vmem:[#allocation8_spill] sm:$0xff] }
 0xe95   :  { %v1632_v32 = vadd.f32 %v5384_v40, %v4922_v2 }
 0xe97   :  { %2641 = vmatpush1.bf16.msra.mxu0 %v3901_v46  ;;  %3558 = vmatpush3.bf16.msra.mxu1 %v3902_v27 }
 0xe98   :  { %3563 = vmatprep.subr.bf16.mxu0 %v3694_v49 }
 0xf4d   :  { %v2551_v16 = vpop.f32.mrb[84].mxu0  ;;  %v2592_v33 = vpop.f32.mrb[76].mxu1 }
 0xf4e   :  { %v2598_v54 = vadd.f32 %v2551_v16, %v1630_v4  ;;  %v2553_v34 = vpop.f32.mrb[85].mxu0  ;;  %v3541_v39 = vpop.f32.mrb[77].mxu1  ;;  %v2612_v11 = vadd.f32 %v4931_v41, %v2592_v33 }
 0xf4f   :  { %v2599_v19 = vadd.f32 %v2553_v34, %v1632_v32  ;;  %v2555_v28 = vpop.f32.mrb[86].mxu0  ;;  %v2595_v0 = vpop.f32.mrb[78].mxu1  ;;  %v5388_v32 = vld [vmem:[#allocation10_spill] sm:$0xff] }
 0xf50   :  { %v3022_v52 = vmul.f32 -1.442695, %v2598_v54  ;;  %v2556_v62 = vpop.f32.mrb[87].mxu0  ;;  %v3542_v17 = vpop.f32.mrb[79].mxu1  ;;  %v1700_v16 = vadd.f32 %v5388_v32, %v4935_v29  ;;  %v3027_v54 = vld [vmem:[%s5355_s10] ss:$0 sm:$0xff] }
 0xf51   :  { %v3023_v35 = vmul.f32 -1.442695, %v2599_v19 }
 0xf52   :  { %3842 = vpow2.f32 %v3022_v52 }
 0xf53   :  { %3844 = vpow2.f32 %v3023_v35 }
 0xf5c   :  { %v3843_v51 = vpop.eup %3842 }
 0xf5d   :  { %v2606_v8 = vadd.f32 1.0, %v3843_v51  ;;  %v3845_v9 = vpop.eup %3844 }
 0xf5e   :  { %v2607_v10 = vadd.f32 1.0, %v3845_v9 }
 0xf5f   :  { %3846 = vrcp.f32 %v2606_v8 }
 0xf60   :  { %3848 = vrcp.f32 %v2607_v10 }
 0xf69   :  { %v3847_v15 = vpop.eup %3846 }
 0xf6a   :  { %v2613_v26 = vmul.f32 %v3847_v15, %v2612_v11  ;;  %v3849_v37 = vpop.eup %3848 }
 0xf6b   :  { %v2616_v14 = vsub.f32 1.0, %v3849_v37  ;;  %v2618_v53 = vmul.f32 %v3849_v37, %v5182_v30 }
 0xf6c   :  { %v2614_v7 = vadd.f32 %v2613_v26, %v1697_v25 }
 0xf6e   :  { %3850 = vtanh.f32 %v2614_v7 }
 0xf78   :  { %v3851_v61 = vpop.eup %3850 }
 0xf79   :  { %v2617_v63 = vmul.f32 %v3851_v61, %v2616_v14 }
 0xf7b   :  { %v5274_v3 = vadd.f32 %v2618_v53, %v2617_v63 }
 0xf7d   :  { %v2625_v45 = vpack.c.bf16 %v5274_v3, %v5274_v3 }
 0xf7f   :  { %2659 = vmatmul.mubr.bf16.vlgmr.msra.gmra.mrb[88].mxu0 %v2625_v45  ;;  %3560 = vmatmul.mubr.bf16.vlgmr.msra.gmra.mrb[80].mxu1 %v2625_v45 }
 0xf80   :  { %3564 = vmatpush3.bf16.msra.mxu0 %v3694_v49  ;;  %3579 = vmatprep.mubr.bf16.mxu0 %v2741_v13 }
 0xf81   :  { %3565 = vmatprep.subr.bf16.mxu0 %v3695_v38 }
 0xf84   :  { %3566 = vmatpush3.bf16.msra.mxu0 %v3695_v38 }
 0xf85   :  { %3567 = vmatprep.subr.bf16.mxu0 %v3696_v47 }
 0xf88   :  { %3568 = vmatpush3.bf16.msra.mxu0 %v3696_v47 }
 0xf89   :  { %3569 = vmatprep.subr.bf16.mxu0 %v3697_v43 }
 0xf8c   :  { %3570 = vmatpush3.bf16.msra.mxu0 %v3697_v43 }
 0xf8d   :  { %3571 = vmatprep.subr.bf16.mxu0 %v3698_v1 }
 0xf90   :  { %3572 = vmatpush3.bf16.msra.mxu0 %v3698_v1 }
 0xf91   :  { %3573 = vmatprep.subr.bf16.mxu0 %v3699_v57 }
 0xf94   :  { %3574 = vmatpush3.bf16.msra.mxu0 %v3699_v57 }
 0xf95   :  { %3575 = vmatprep.subr.bf16.mxu0 %v3700_v48 }
 0xf98   :  { %3576 = vmatpush3.bf16.msra.mxu0 %v3700_v48 }
 0xf99   :  { %3577 = vmatprep.subr.bf16.mxu0 %v3701_v36 }
 0xf9c   :  { %3578 = vmatpush3.bf16.msra.mxu0 %v3701_v36 }
 0xf9f   :  { %3580 = vmatmul.mubr.bf16.vlgmr.msra.gmra.mrb[92].mxu0 %v2742_v20 }
 0xfa0   :  { %3583 = vmatprep.mubr.bf16.mxu0 %v2743_v56 }
0x1052   :  { %v2660_v22 = vpop.f32.mrb[88].mxu0  ;;  %v2701_v23 = vpop.f32.mrb[80].mxu1 }
0x1053   :  { %v2707_v58 = vadd.f32 %v2660_v22, %v1634_v24  ;;  %v2662_v31 = vpop.f32.mrb[89].mxu0  ;;  %v3561_v5 = vpop.f32.mrb[81].mxu1  ;;  %v2721_v2 = vadd.f32 %v4931_v41, %v2701_v23 }
0x1054   :  { %v2708_v59 = vadd.f32 %v2662_v31, %v1636_v60  ;;  %v2664_v46 = vpop.f32.mrb[90].mxu0  ;;  %v2704_v27 = vpop.f32.mrb[82].mxu1 }
0x1055   :  { %v3024_v55 = vmul.f32 -1.442695, %v2707_v58  ;;  %v2665_v12 = vpop.f32.mrb[91].mxu0  ;;  %v3562_v49 = vpop.f32.mrb[83].mxu1 }
0x1056   :  { %v3025_v50 = vmul.f32 -1.442695, %v2708_v59 }
0x1057   :  { %3852 = vpow2.f32 %v3024_v55 }
0x1058   :  { %3854 = vpow2.f32 %v3025_v50 }
0x1061   :  { %v3853_v30 = vpop.eup %3852 }
0x1062   :  { %v2715_v42 = vadd.f32 1.0, %v3853_v30  ;;  %v3855_v44 = vpop.eup %3854 }
0x1063   :  { %v2716_v4 = vadd.f32 1.0, %v3855_v44 }
0x1064   :  { %3856 = vrcp.f32 %v2715_v42 }
0x1065   :  { %3858 = vrcp.f32 %v2716_v4 }
0x106e   :  { %v3857_v40 = vpop.eup %3856 }
0x106f   :  { %v2722_v33 = vmul.f32 %v3857_v40, %v2721_v2  ;;  %v3859_v17 = vpop.eup %3858 }
0x1070   :  { %v2725_v35 = vsub.f32 1.0, %v3859_v17  ;;  %v2727_v9 = vmul.f32 %v3859_v17, %v5274_v3 }
0x1071   :  { %v2723_v34 = vadd.f32 %v2722_v33, %v1700_v16 }
0x1072   :  { %v3581_v39 = vpop.f32.mrb[92].mxu0 }
0x1073   :  { %3860 = vtanh.f32 %v2723_v34  ;;  %v2859_v19 = vadd.f32 %v3581_v39, %v3027_v54  ;;  %v2850_v28 = vpop.f32.mrb[93].mxu0 }
0x1074   :  { %v2851_v0 = vadd.f32 %v3027_v54, %v2850_v28  ;;  %v3582_v52 = vpop.f32.mrb[94].mxu0 }
0x1075   :  { %2883 = vst [vmem:[%s5356_s11 + $0x10] sm:$0xff] %v2859_v19  ;;  %v2862_v41 = vadd.f32 %v3582_v52, %v3027_v54  ;;  %v2853_v62 = vpop.f32.mrb[95].mxu0 }
0x1076   :  { %2881 = vst [vmem:[%s5356_s11] sm:$0xff] %v2851_v0  ;;  %v2854_v29 = vadd.f32 %v3027_v54, %v2853_v62 }
0x1077   :  { %2884 = vst [vmem:[%s5356_s11 + $0x18] sm:$0xff] %v2862_v41 }
0x1078   :  { %2882 = vst [vmem:[%s5356_s11 + $0x8] sm:$0xff] %v2854_v29 }
0x107d   :  { %v3861_v51 = vpop.eup %3860 }
0x107e   :  { %v2726_v8 = vmul.f32 %v3861_v51, %v2725_v35 }
0x1080   :  { %v2728_v10 = vadd.f32 %v2727_v9, %v2726_v8 }
0x1082   :  { %3026 = vst [vmem:[%s5351_s12 + $0x8] sm:$0xff] %v2728_v10  ;;  %v2744_v11 = vpack.c.bf16 %v2728_v10, %v5274_v3 }
0x1084   :  { %3584 = vmatmul.mubr.bf16.gmra.mrb[96].mxu0 %v2744_v11 }
0x1157   :  { %v3585_v15 = vpop.f32.mrb[96].mxu0 }
0x1158   :  { %v2875_v18 = vadd.f32 %v3585_v15, %v3027_v54  ;;  %v2866_v25 = vpop.f32.mrb[97].mxu0 }
0x1159   :  { %v2867_v26 = vadd.f32 %v3027_v54, %v2866_v25  ;;  %v3586_v7 = vpop.f32.mrb[98].mxu0 }
0x115a   :  { %2887 = vst [vmem:[%s5356_s11 + $0x30] sm:$0xff] %v2875_v18  ;;  %v2878_v37 = vadd.f32 %v3586_v7, %v3027_v54  ;;  %v2869_v14 = vpop.f32.mrb[99].mxu0 }
0x115b   :  { %2885 = vst [vmem:[%s5356_s11 + $0x20] sm:$0xff] %v2867_v26  ;;  %v2870_v61 = vadd.f32 %v3027_v54, %v2869_v14 }
0x115c   :  { %2888 = vst [vmem:[%s5356_s11 + $0x38] sm:$0xff] %v2878_v37 }
0x115d   :  { %2886 = vst [vmem:[%s5356_s11 + $0x28] sm:$0xff] %v2870_v61 }

</bundles_post_ra>
